<compile_context>
chip_gen: v6e
topology: v6e:2x2x1
jax: 0.10.0
libtpu: 0.0.40
codegen_flags: <defaults>
</compile_context>

<pallas_src>
import jax
import jax.numpy as jnp
from jax.experimental import pallas as pl
from jax.experimental.pallas import tpu as pltpu

BN_EPS = 1e-5
LANE = 128
TM_MAX = 512                       # M tile: fits the 32 MiB scoped VMEM default
VMEM_LIMIT = 32 * 1024 * 1024      # safe on v5e / v6e / v7x (64 MiB physical min)


def _round_up(x, m):
    return (x + m - 1) // m * m


def _pick_tm(m):
    return min(TM_MAX, _round_up(m, 8))


# ----------------------------- Pallas kernels ------------------------------ #

def _matmul_stats_kernel(cols_ref, w_ref, acc_ref, sum_ref, ssq_ref):
    """bf16 matmul tile on the MXU (f32 accumulation) + per-column sum / sumsq
    accumulated across the M grid axis (full-batch BatchNorm statistics)."""
    @pl.when(pl.program_id(0) == 0)
    def _():
        sum_ref[...] = jnp.zeros_like(sum_ref)
        ssq_ref[...] = jnp.zeros_like(ssq_ref)

    acc = jnp.dot(cols_ref[...], w_ref[...], preferred_element_type=jnp.float32)
    acc_ref[...] = acc
    sum_ref[...] += jnp.sum(acc, axis=0, keepdims=True)
    ssq_ref[...] += jnp.sum(acc * acc, axis=0, keepdims=True)


def _bn_relu_kernel(acc_ref, scale_ref, shift_ref, o_ref):
    y = acc_ref[...] * scale_ref[...] + shift_ref[...]
    o_ref[...] = jnp.maximum(y, 0.0).astype(o_ref.dtype)


def _matmul_tanh_kernel(cols_ref, w_ref, o_ref):
    acc = jnp.dot(cols_ref[...], w_ref[...], preferred_element_type=jnp.float32)
    o_ref[...] = jnp.tanh(acc)


# --------------------------- pallas_call wrappers --------------------------- #

def _matmul_stats(cols, wmat):
    """cols (M, Kd) bf16 @ wmat (Kd, Cp) bf16 -> acc (Mp, Cp) f32 plus per-column
    sum / sumsq (1, Cp) f32.  Zero row padding is harmless to the statistics."""
    m, kd = cols.shape
    cp = wmat.shape[1]
    tm = _pick_tm(m)
    mp = _round_up(m, tm)
    if mp != m:
        cols = jnp.pad(cols, ((0, mp - m), (0, 0)))
    flops = 2 * mp * kd * cp
    byts = mp * kd * 2 + kd * cp * 2 + mp * cp * 4 + 2 * cp * 4
    acc, s, ss = pl.pallas_call(
        _matmul_stats_kernel,
        grid=(mp // tm,),
        in_specs=[
            pl.BlockSpec((tm, kd), lambda i: (i, 0)),   # cols tile (pipelined)
            pl.BlockSpec((kd, cp), lambda i: (0, 0)),   # weight stays VMEM-resident
        ],
        out_specs=[
            pl.BlockSpec((tm, cp), lambda i: (i, 0)),   # matmul output tile
            pl.BlockSpec((1, cp), lambda i: (0, 0)),    # per-channel sum accumulator
            pl.BlockSpec((1, cp), lambda i: (0, 0)),    # per-channel sumsq accumulator
        ],
        out_shape=[
            jax.ShapeDtypeStruct((mp, cp), jnp.float32),
            jax.ShapeDtypeStruct((1, cp), jnp.float32),
            jax.ShapeDtypeStruct((1, cp), jnp.float32),
        ],
        compiler_params=pltpu.CompilerParams(
            dimension_semantics=("arbitrary",),         # stats accumulate across M tiles
            vmem_limit_bytes=VMEM_LIMIT),
        cost_estimate=pl.CostEstimate(flops=flops, transcendentals=0,
                                      bytes_accessed=byts),
    )(cols, wmat)
    return acc, s, ss, m


def _bn_relu(acc, scale, shift):
    mp, cp = acc.shape
    tm = _pick_tm(mp)
    mpp = _round_up(mp, tm)
    if mpp != mp:
        acc = jnp.pad(acc, ((0, mpp - mp), (0, 0)))
    out = pl.pallas_call(
        _bn_relu_kernel,
        grid=(mpp // tm,),
        in_specs=[
            pl.BlockSpec((tm, cp), lambda i: (i, 0)),
            pl.BlockSpec((1, cp), lambda i: (0, 0)),
            pl.BlockSpec((1, cp), lambda i: (0, 0)),
        ],
        out_specs=pl.BlockSpec((tm, cp), lambda i: (i, 0)),
        out_shape=jax.ShapeDtypeStruct((mpp, cp), jnp.bfloat16),
        compiler_params=pltpu.CompilerParams(
            dimension_semantics=("parallel",),
            vmem_limit_bytes=VMEM_LIMIT),
        cost_estimate=pl.CostEstimate(flops=2 * mpp * cp, transcendentals=0,
                                      bytes_accessed=mpp * cp * 4 + mpp * cp * 2),
    )(acc, scale, shift)
    return out[:mp]


def _matmul_tanh(cols, wmat):
    m, kd = cols.shape
    cp = wmat.shape[1]
    tm = _pick_tm(m)
    mp = _round_up(m, tm)
    if mp != m:
        cols = jnp.pad(cols, ((0, mp - m), (0, 0)))
    out = pl.pallas_call(
        _matmul_tanh_kernel,
        grid=(mp // tm,),
        in_specs=[
            pl.BlockSpec((tm, kd), lambda i: (i, 0)),
            pl.BlockSpec((kd, cp), lambda i: (0, 0)),
        ],
        out_specs=pl.BlockSpec((tm, cp), lambda i: (i, 0)),
        out_shape=jax.ShapeDtypeStruct((mp, cp), jnp.float32),
        compiler_params=pltpu.CompilerParams(
            dimension_semantics=("parallel",),
            vmem_limit_bytes=VMEM_LIMIT),
        cost_estimate=pl.CostEstimate(
            flops=2 * mp * kd * cp, transcendentals=mp * cp,
            bytes_accessed=mp * kd * 2 + kd * cp * 2 + mp * cp * 4),
    )(cols, wmat)
    return out[:m]


# ------------------------------- glue (JAX) -------------------------------- #

def _im2col_nhwc(x, k, stride, padding):
    """ConvTranspose2d as a regular conv on the zero-dilated, padded NHWC input.
    Column order of the result is (kh, kw, cin)."""
    # TODO(synk): build the K*K shifted views inside the kernel from a once-DMA'd
    # padded input tile (manual make_async_copy / memory_space=pl.ANY) instead of
    # materializing the 16x-expanded patch matrix in HBM.
    n, h, w, c = x.shape
    if stride > 1:
        hd = (h - 1) * stride + 1
        wd = (w - 1) * stride + 1
        xd = jnp.zeros((n, hd, wd, c), x.dtype).at[:, ::stride, ::stride, :].set(x)
    else:
        xd = x
    pad = k - 1 - padding
    xp = jnp.pad(xd, ((0, 0), (pad, pad), (pad, pad), (0, 0)))
    oh = (h - 1) * stride + k - 2 * padding
    ow = (w - 1) * stride + k - 2 * padding
    slabs = [xp[:, kh:kh + oh, kw:kw + ow, :] for kh in range(k) for kw in range(k)]
    cols = jnp.stack(slabs, axis=3).reshape(n * oh * ow, k * k * c)
    return cols, (n, oh, ow)


def _wmat_convt(w, cout_pad):
    """PyTorch ConvTranspose2d weight (Cin, Cout, K, K) -> (K*K*Cin, Cout_pad)
    for the flipped-kernel regular-conv formulation (rows ordered (kh,kw,cin))."""
    cin, cout, k, _ = w.shape
    wf = jnp.flip(w, axis=(2, 3))                               # spatial flip
    wm = wf.transpose(2, 3, 0, 1).reshape(k * k * cin, cout)
    wm = jnp.pad(wm, ((0, 0), (0, cout_pad - cout)))
    return wm.astype(jnp.bfloat16)


def _wmat_project(w, cout_pad):
    """Layer-1 dense weight: ConvT(k,s=1,p=0) on a 1x1 input just stamps the
    kernel, so out[n,oh,ow,co] = sum_ci z[n,ci] * w[ci,co,oh,ow] (no flip)."""
    cin, cout, k, _ = w.shape
    wm = w.transpose(0, 2, 3, 1)                                # (Cin, K, K, Cout)
    wm = jnp.pad(wm, ((0, 0), (0, 0), (0, 0), (0, cout_pad - cout)))
    return wm.reshape(cin, k * k * cout_pad).astype(jnp.bfloat16)


def _bn_fold(col_sum, col_ssq, m_true, gamma, beta, cout_pad):
    """Fold full-batch BN (training mode, biased variance) into scale/shift."""
    mean = col_sum / m_true
    var = jnp.maximum(col_ssq / m_true - mean * mean, 0.0)
    g = jnp.pad(gamma, ((0, 0), (0, cout_pad - gamma.shape[1])))
    b = jnp.pad(beta, ((0, 0), (0, cout_pad - beta.shape[1])))
    scale = g * jax.lax.rsqrt(var + BN_EPS)
    shift = b - mean * scale
    return scale, shift


# ------------------------------- Generator --------------------------------- #

class GeneratorPallas:
    """Mirror of Generator (ConvT->BN->ReLU x3, ConvT->Tanh), forward only."""

    def __init__(self, latent_dim=100, img_channels=3, feature_map_size=64,
                 key=jax.random.PRNGKey(42)):
        fm = feature_map_size
        self.latent_dim = latent_dim
        self.img_channels = img_channels
        self.fm = fm
        ks = jax.random.split(key, 4)
        std = jnp.float32(0.02)  # DCGAN-style deterministic synthetic init
        # ConvTranspose2d weights are (Cin, Cout, K, K), bias=False.
        w1 = std * jax.random.normal(ks[0], (latent_dim, fm * 4, 4, 4), jnp.float32)
        w2 = std * jax.random.normal(ks[1], (fm * 4, fm * 2, 4, 4), jnp.float32)
        w3 = std * jax.random.normal(ks[2], (fm * 2, fm, 4, 4), jnp.float32)
        w4 = std * jax.random.normal(ks[3], (fm, img_channels, 4, 4), jnp.float32)
        # Lane-dense (multiple-of-128) output channel padding for every layer.
        self.cp1 = _round_up(fm * 4, LANE)
        self.cp2 = _round_up(fm * 2, LANE)
        self.cp3 = _round_up(fm, LANE)
        self.cp4 = _round_up(img_channels, LANE)
        self.w1m = _wmat_project(w1, self.cp1)      # layer 1: dense, no zero im2col
        self.w2m = _wmat_convt(w2, self.cp2)
        self.w3m = _wmat_convt(w3, self.cp3)
        self.w4m = _wmat_convt(w4, self.cp4)
        # BatchNorm affine params (PyTorch defaults gamma=1, beta=0), shape (1, C).
        self.g1 = jnp.ones((1, fm * 4), jnp.float32)
        self.b1 = jnp.zeros((1, fm * 4), jnp.float32)
        self.g2 = jnp.ones((1, fm * 2), jnp.float32)
        self.b2 = jnp.zeros((1, fm * 2), jnp.float32)
        self.g3 = jnp.ones((1, fm), jnp.float32)
        self.b3 = jnp.zeros((1, fm), jnp.float32)
        self._fwd = jax.jit(self._forward)

    def _up_layer(self, x, wm, gamma, beta, cout):
        cols, (n, oh, ow) = _im2col_nhwc(x, 4, 2, 1)
        cp = wm.shape[1]
        acc, s, ss, m = _matmul_stats(cols, wm)
        scale, shift = _bn_fold(s, ss, m, gamma, beta, cp)
        y = _bn_relu(acc, scale, shift)
        return y[:m, :cout].reshape(n, oh, ow, cout)

    def _forward(self, z):
        n = z.shape[0]
        fm = self.fm
        # project: ConvT(4,1,0) on 1x1 latent == dense matmul, + BN + ReLU -> (N,4,4,4fm)
        z2 = z.reshape(n, self.latent_dim).astype(jnp.bfloat16)
        acc, s, ss, _ = _matmul_stats(z2, self.w1m)            # (Np, 16*cp1)
        acc = acc[:n].reshape(n * 16, self.cp1)                # rows = (n, oh, ow)
        s = s.reshape(16, self.cp1).sum(axis=0, keepdims=True)
        ss = ss.reshape(16, self.cp1).sum(axis=0, keepdims=True)
        scale, shift = _bn_fold(s, ss, n * 16, self.g1, self.b1, self.cp1)
        x = _bn_relu(acc, scale, shift)[:n * 16, :fm * 4].reshape(n, 4, 4, fm * 4)
        # upsample 1: ConvT(4,2,1) + BN + ReLU  -> (N, 8, 8, 2fm)
        x = self._up_layer(x, self.w2m, self.g2, self.b2, fm * 2)
        # upsample 2: ConvT(4,2,1) + BN + ReLU  -> (N, 16, 16, fm)
        x = self._up_layer(x, self.w3m, self.g3, self.b3, fm)
        # out: ConvT(4,2,1) + Tanh (lane-dense padded Cout) -> (N, 32, 32, imgC)
        cols, (n, oh, ow) = _im2col_nhwc(x, 4, 2, 1)
        y = _matmul_tanh(cols, self.w4m)
        y = y[:, :self.img_channels].reshape(n, oh, ow, self.img_channels)
        return y.transpose(0, 3, 1, 2)                         # NCHW at the boundary

    def __call__(self, z):
        return self._fwd(z)


if __name__ == "__main__":
    # Small, forward-consistent shapes.
    batch, latent_dim, img_channels, fm = 2, 32, 3, 16
    key = jax.random.PRNGKey(0)
    z = jax.random.normal(key, (batch, latent_dim, 1, 1), jnp.float32)  # NCHW latent

    gen = GeneratorPallas(latent_dim=latent_dim, img_channels=img_channels,
                          feature_map_size=fm)
    out = jax.block_until_ready(gen(z))

    assert out.shape == (batch, img_channels, 32, 32), out.shape
    assert out.dtype == jnp.float32
    assert bool(jnp.all(jnp.isfinite(out)))
    assert bool(jnp.all(jnp.abs(out) <= 1.0 + 1e-6))  # tanh range
    print("KERNEL_OK")
</pallas_src>

<mosaic_0001>
module attributes {stable_mosaic.version = 11 : i64} {
  func.func @_matmul_stats_kernel(%arg0: i32, %arg1: memref<8x32xbf16, #tpu.memory_space<vmem>>, %arg2: memref<32x2048xbf16, #tpu.memory_space<vmem>>, %arg3: memref<8x2048xf32, #tpu.memory_space<vmem>>, %arg4: memref<1x2048xf32, #tpu.memory_space<vmem>>, %arg5: memref<1x2048xf32, #tpu.memory_space<vmem>>) attributes {dimension_semantics = [#tpu.dimension_semantics<arbitrary>], iteration_bounds = array<i64: 1>, scalar_prefetch = 0 : i64, scratch_operands = 0 : i64, tpu.core_type = #tpu.core_type<tc>, window_params = [{transform_indices = @transform_0, window_bounds = array<i64: 8, 32>}, {pipeline_mode = #tpu.pipeline_mode<synchronous>, transform_indices = @transform_1, window_bounds = array<i64: 32, 2048>}, {transform_indices = @transform_2, window_bounds = array<i64: 8, 2048>}, {pipeline_mode = #tpu.pipeline_mode<synchronous>, transform_indices = @transform_3, window_bounds = array<i64: 1, 2048>}, {pipeline_mode = #tpu.pipeline_mode<synchronous>, transform_indices = @transform_4, window_bounds = array<i64: 1, 2048>}]} {
    %c0_i32 = arith.constant 0 : i32
    %0 = arith.cmpi eq, %arg0, %c0_i32 : i32
    %1 = arith.extui %0 : i1 to i32
    %c0_i32_0 = arith.constant 0 : i32
    %2 = arith.cmpi ne, %1, %c0_i32_0 : i32
    scf.if %2 {
      %cst_16 = arith.constant 0.000000e+00 : f32
      %18 = vector.broadcast %cst_16 : f32 to vector<1x2048xf32>
      %c0_17 = arith.constant 0 : index
      %c0_18 = arith.constant 0 : index
      %19 = vector.load %arg4[%c0_17, %c0_18] : memref<1x2048xf32, #tpu.memory_space<vmem>>, vector<1x2048xf32>
      tpu.vector_store %arg4[%c0_17, %c0_18], %18 {strides = array<i32>} : memref<1x2048xf32, #tpu.memory_space<vmem>>, vector<1x2048xf32>,
      %cst_19 = arith.constant 0.000000e+00 : f32
      %20 = vector.broadcast %cst_19 : f32 to vector<1x2048xf32>
      %c0_20 = arith.constant 0 : index
      %c0_21 = arith.constant 0 : index
      %21 = vector.load %arg5[%c0_20, %c0_21] : memref<1x2048xf32, #tpu.memory_space<vmem>>, vector<1x2048xf32>
      tpu.vector_store %arg5[%c0_20, %c0_21], %20 {strides = array<i32>} : memref<1x2048xf32, #tpu.memory_space<vmem>>, vector<1x2048xf32>,
    } else {
    }
    %c0 = arith.constant 0 : index
    %c0_1 = arith.constant 0 : index
    %3 = vector.load %arg1[%c0, %c0_1] : memref<8x32xbf16, #tpu.memory_space<vmem>>, vector<8x32xbf16>
    %c0_2 = arith.constant 0 : index
    %c0_3 = arith.constant 0 : index
    %4 = vector.load %arg2[%c0_2, %c0_3] : memref<32x2048xbf16, #tpu.memory_space<vmem>>, vector<32x2048xbf16>
    %cst = arith.constant dense<0.000000e+00> : vector<8x2048xf32>
    %5 = tpu.matmul %3, %4, %cst {dimension_numbers = #tpu.dot_dimension_numbers<[1], [0], [0], [1], [0, 0, 1, 1], [], []>} : vector<8x32xbf16>, vector<32x2048xbf16>, vector<8x2048xf32> -> vector<8x2048xf32>
    %c0_4 = arith.constant 0 : index
    %c0_5 = arith.constant 0 : index
    %6 = vector.load %arg3[%c0_4, %c0_5] : memref<8x2048xf32, #tpu.memory_space<vmem>>, vector<8x2048xf32>
    tpu.vector_store %arg3[%c0_4, %c0_5], %5 {strides = array<i32>} : memref<8x2048xf32, #tpu.memory_space<vmem>>, vector<8x2048xf32>,
    %c0_6 = arith.constant 0 : index
    %c0_7 = arith.constant 0 : index
    %7 = vector.load %arg4[%c0_6, %c0_7] : memref<1x2048xf32, #tpu.memory_space<vmem>>, vector<1x2048xf32>
    %cst_8 = arith.constant dense<0.000000e+00> : vector<2048xf32>
    %8 = vector.multi_reduction <add>, %5, %cst_8 [0] : vector<8x2048xf32> to vector<2048xf32>
    %9 = vector.shape_cast %8 : vector<2048xf32> to vector<1x2048xf32>
    %10 = arith.addf %7, %9 : vector<1x2048xf32>
    %c0_9 = arith.constant 0 : index
    %c0_10 = arith.constant 0 : index
    %11 = vector.load %arg4[%c0_9, %c0_10] : memref<1x2048xf32, #tpu.memory_space<vmem>>, vector<1x2048xf32>
    tpu.vector_store %arg4[%c0_9, %c0_10], %10 {strides = array<i32>} : memref<1x2048xf32, #tpu.memory_space<vmem>>, vector<1x2048xf32>,
    %c0_11 = arith.constant 0 : index
    %c0_12 = arith.constant 0 : index
    %12 = vector.load %arg5[%c0_11, %c0_12] : memref<1x2048xf32, #tpu.memory_space<vmem>>, vector<1x2048xf32>
    %13 = arith.mulf %5, %5 : vector<8x2048xf32>
    %cst_13 = arith.constant dense<0.000000e+00> : vector<2048xf32>
    %14 = vector.multi_reduction <add>, %13, %cst_13 [0] : vector<8x2048xf32> to vector<2048xf32>
    %15 = vector.shape_cast %14 : vector<2048xf32> to vector<1x2048xf32>
    %16 = arith.addf %12, %15 : vector<1x2048xf32>
    %c0_14 = arith.constant 0 : index
    %c0_15 = arith.constant 0 : index
    %17 = vector.load %arg5[%c0_14, %c0_15] : memref<1x2048xf32, #tpu.memory_space<vmem>>, vector<1x2048xf32>
    tpu.vector_store %arg5[%c0_14, %c0_15], %16 {strides = array<i32>} : memref<1x2048xf32, #tpu.memory_space<vmem>>, vector<1x2048xf32>,
    return
  }
  func.func @transform_0(%arg0: i32) -> (i32, i32) {
    %c0_i32 = arith.constant 0 : i32
    %c0_i32_0 = arith.constant 0 : i32
    return %arg0, %c0_i32 : i32, i32
  }
  func.func @transform_1(%arg0: i32) -> (i32, i32) {
    %c0_i32 = arith.constant 0 : i32
    %c0_i32_0 = arith.constant 0 : i32
    %c0_i32_1 = arith.constant 0 : i32
    return %c0_i32, %c0_i32_0 : i32, i32
  }
  func.func @transform_2(%arg0: i32) -> (i32, i32) {
    %c0_i32 = arith.constant 0 : i32
    %c0_i32_0 = arith.constant 0 : i32
    return %arg0, %c0_i32 : i32, i32
  }
  func.func @transform_3(%arg0: i32) -> (i32, i32) {
    %c0_i32 = arith.constant 0 : i32
    %c0_i32_0 = arith.constant 0 : i32
    %c0_i32_1 = arith.constant 0 : i32
    return %c0_i32, %c0_i32_0 : i32, i32
  }
  func.func @transform_4(%arg0: i32) -> (i32, i32) {
    %c0_i32 = arith.constant 0 : i32
    %c0_i32_0 = arith.constant 0 : i32
    %c0_i32_1 = arith.constant 0 : i32
    return %c0_i32, %c0_i32_0 : i32, i32
  }
}

module attributes {stable_mosaic.version = 11 : i64} {
  func.func @_bn_relu_kernel(%arg0: i32, %arg1: memref<32x128xf32, #tpu.memory_space<vmem>>, %arg2: memref<1x128xf32, #tpu.memory_space<vmem>>, %arg3: memref<1x128xf32, #tpu.memory_space<vmem>>, %arg4: memref<32x128xbf16, #tpu.memory_space<vmem>>) attributes {dimension_semantics = [#tpu.dimension_semantics<parallel>], iteration_bounds = array<i64: 1>, scalar_prefetch = 0 : i64, scratch_operands = 0 : i64, tpu.core_type = #tpu.core_type<tc>, window_params = [{transform_indices = @transform_0, window_bounds = array<i64: 32, 128>}, {pipeline_mode = #tpu.pipeline_mode<synchronous>, transform_indices = @transform_1, window_bounds = array<i64: 1, 128>}, {pipeline_mode = #tpu.pipeline_mode<synchronous>, transform_indices = @transform_2, window_bounds = array<i64: 1, 128>}, {transform_indices = @transform_3, window_bounds = array<i64: 32, 128>}]} {
    %c0 = arith.constant 0 : index
    %c0_0 = arith.constant 0 : index
    %0 = vector.load %arg1[%c0, %c0_0] : memref<32x128xf32, #tpu.memory_space<vmem>>, vector<32x128xf32>
    %c0_1 = arith.constant 0 : index
    %c0_2 = arith.constant 0 : index
    %1 = vector.load %arg2[%c0_1, %c0_2] : memref<1x128xf32, #tpu.memory_space<vmem>>, vector<1x128xf32>
    %2 = vector.broadcast %1 : vector<1x128xf32> to vector<32x128xf32>
    %3 = arith.mulf %0, %2 : vector<32x128xf32>
    %c0_3 = arith.constant 0 : index
    %c0_4 = arith.constant 0 : index
    %4 = vector.load %arg3[%c0_3, %c0_4] : memref<1x128xf32, #tpu.memory_space<vmem>>, vector<1x128xf32>
    %5 = vector.broadcast %4 : vector<1x128xf32> to vector<32x128xf32>
    %6 = arith.addf %3, %5 : vector<32x128xf32>
    %cst = arith.constant 0.000000e+00 : f32
    %7 = vector.broadcast %cst : f32 to vector<32x128xf32>
    %8 = arith.maximumf %6, %7 : vector<32x128xf32>
    %9 = arith.truncf %8 : vector<32x128xf32> to vector<32x128xbf16>
    %c0_5 = arith.constant 0 : index
    %c0_6 = arith.constant 0 : index
    %10 = vector.load %arg4[%c0_5, %c0_6] : memref<32x128xbf16, #tpu.memory_space<vmem>>, vector<32x128xbf16>
    tpu.vector_store %arg4[%c0_5, %c0_6], %9 {strides = array<i32>} : memref<32x128xbf16, #tpu.memory_space<vmem>>, vector<32x128xbf16>,
    return
  }
  func.func @transform_0(%arg0: i32) -> (i32, i32) {
    %c0_i32 = arith.constant 0 : i32
    %c0_i32_0 = arith.constant 0 : i32
    return %arg0, %c0_i32 : i32, i32
  }
  func.func @transform_1(%arg0: i32) -> (i32, i32) {
    %c0_i32 = arith.constant 0 : i32
    %c0_i32_0 = arith.constant 0 : i32
    %c0_i32_1 = arith.constant 0 : i32
    return %c0_i32, %c0_i32_0 : i32, i32
  }
  func.func @transform_2(%arg0: i32) -> (i32, i32) {
    %c0_i32 = arith.constant 0 : i32
    %c0_i32_0 = arith.constant 0 : i32
    %c0_i32_1 = arith.constant 0 : i32
    return %c0_i32, %c0_i32_0 : i32, i32
  }
  func.func @transform_3(%arg0: i32) -> (i32, i32) {
    %c0_i32 = arith.constant 0 : i32
    %c0_i32_0 = arith.constant 0 : i32
    return %arg0, %c0_i32 : i32, i32
  }
}

module attributes {stable_mosaic.version = 11 : i64} {
  func.func @_matmul_stats_kernel(%arg0: i32, %arg1: memref<128x1024xbf16, #tpu.memory_space<vmem>>, %arg2: memref<1024x128xbf16, #tpu.memory_space<vmem>>, %arg3: memref<128x128xf32, #tpu.memory_space<vmem>>, %arg4: memref<1x128xf32, #tpu.memory_space<vmem>>, %arg5: memref<1x128xf32, #tpu.memory_space<vmem>>) attributes {dimension_semantics = [#tpu.dimension_semantics<arbitrary>], iteration_bounds = array<i64: 1>, scalar_prefetch = 0 : i64, scratch_operands = 0 : i64, tpu.core_type = #tpu.core_type<tc>, window_params = [{transform_indices = @transform_0, window_bounds = array<i64: 128, 1024>}, {pipeline_mode = #tpu.pipeline_mode<synchronous>, transform_indices = @transform_1, window_bounds = array<i64: 1024, 128>}, {transform_indices = @transform_2, window_bounds = array<i64: 128, 128>}, {pipeline_mode = #tpu.pipeline_mode<synchronous>, transform_indices = @transform_3, window_bounds = array<i64: 1, 128>}, {pipeline_mode = #tpu.pipeline_mode<synchronous>, transform_indices = @transform_4, window_bounds = array<i64: 1, 128>}]} {
    %c0_i32 = arith.constant 0 : i32
    %0 = arith.cmpi eq, %arg0, %c0_i32 : i32
    %1 = arith.extui %0 : i1 to i32
    %c0_i32_0 = arith.constant 0 : i32
    %2 = arith.cmpi ne, %1, %c0_i32_0 : i32
    scf.if %2 {
      %cst_16 = arith.constant 0.000000e+00 : f32
      %18 = vector.broadcast %cst_16 : f32 to vector<1x128xf32>
      %c0_17 = arith.constant 0 : index
      %c0_18 = arith.constant 0 : index
      %19 = vector.load %arg4[%c0_17, %c0_18] : memref<1x128xf32, #tpu.memory_space<vmem>>, vector<1x128xf32>
      tpu.vector_store %arg4[%c0_17, %c0_18], %18 {strides = array<i32>} : memref<1x128xf32, #tpu.memory_space<vmem>>, vector<1x128xf32>,
      %cst_19 = arith.constant 0.000000e+00 : f32
      %20 = vector.broadcast %cst_19 : f32 to vector<1x128xf32>
      %c0_20 = arith.constant 0 : index
      %c0_21 = arith.constant 0 : index
      %21 = vector.load %arg5[%c0_20, %c0_21] : memref<1x128xf32, #tpu.memory_space<vmem>>, vector<1x128xf32>
      tpu.vector_store %arg5[%c0_20, %c0_21], %20 {strides = array<i32>} : memref<1x128xf32, #tpu.memory_space<vmem>>, vector<1x128xf32>,
    } else {
    }
    %c0 = arith.constant 0 : index
    %c0_1 = arith.constant 0 : index
    %3 = vector.load %arg1[%c0, %c0_1] : memref<128x1024xbf16, #tpu.memory_space<vmem>>, vector<128x1024xbf16>
    %c0_2 = arith.constant 0 : index
    %c0_3 = arith.constant 0 : index
    %4 = vector.load %arg2[%c0_2, %c0_3] : memref<1024x128xbf16, #tpu.memory_space<vmem>>, vector<1024x128xbf16>
    %cst = arith.constant dense<0.000000e+00> : vector<128x128xf32>
    %5 = tpu.matmul %3, %4, %cst {dimension_numbers = #tpu.dot_dimension_numbers<[1], [0], [0], [1], [0, 0, 1, 1], [], []>} : vector<128x1024xbf16>, vector<1024x128xbf16>, vector<128x128xf32> -> vector<128x128xf32>
    %c0_4 = arith.constant 0 : index
    %c0_5 = arith.constant 0 : index
    %6 = vector.load %arg3[%c0_4, %c0_5] : memref<128x128xf32, #tpu.memory_space<vmem>>, vector<128x128xf32>
    tpu.vector_store %arg3[%c0_4, %c0_5], %5 {strides = array<i32>} : memref<128x128xf32, #tpu.memory_space<vmem>>, vector<128x128xf32>,
    %c0_6 = arith.constant 0 : index
    %c0_7 = arith.constant 0 : index
    %7 = vector.load %arg4[%c0_6, %c0_7] : memref<1x128xf32, #tpu.memory_space<vmem>>, vector<1x128xf32>
    %cst_8 = arith.constant dense<0.000000e+00> : vector<128xf32>
    %8 = vector.multi_reduction <add>, %5, %cst_8 [0] : vector<128x128xf32> to vector<128xf32>
    %9 = vector.shape_cast %8 : vector<128xf32> to vector<1x128xf32>
    %10 = arith.addf %7, %9 : vector<1x128xf32>
    %c0_9 = arith.constant 0 : index
    %c0_10 = arith.constant 0 : index
    %11 = vector.load %arg4[%c0_9, %c0_10] : memref<1x128xf32, #tpu.memory_space<vmem>>, vector<1x128xf32>
    tpu.vector_store %arg4[%c0_9, %c0_10], %10 {strides = array<i32>} : memref<1x128xf32, #tpu.memory_space<vmem>>, vector<1x128xf32>,
    %c0_11 = arith.constant 0 : index
    %c0_12 = arith.constant 0 : index
    %12 = vector.load %arg5[%c0_11, %c0_12] : memref<1x128xf32, #tpu.memory_space<vmem>>, vector<1x128xf32>
    %13 = arith.mulf %5, %5 : vector<128x128xf32>
    %cst_13 = arith.constant dense<0.000000e+00> : vector<128xf32>
    %14 = vector.multi_reduction <add>, %13, %cst_13 [0] : vector<128x128xf32> to vector<128xf32>
    %15 = vector.shape_cast %14 : vector<128xf32> to vector<1x128xf32>
    %16 = arith.addf %12, %15 : vector<1x128xf32>
    %c0_14 = arith.constant 0 : index
    %c0_15 = arith.constant 0 : index
    %17 = vector.load %arg5[%c0_14, %c0_15] : memref<1x128xf32, #tpu.memory_space<vmem>>, vector<1x128xf32>
    tpu.vector_store %arg5[%c0_14, %c0_15], %16 {strides = array<i32>} : memref<1x128xf32, #tpu.memory_space<vmem>>, vector<1x128xf32>,
    return
  }
  func.func @transform_0(%arg0: i32) -> (i32, i32) {
    %c0_i32 = arith.constant 0 : i32
    %c0_i32_0 = arith.constant 0 : i32
    return %arg0, %c0_i32 : i32, i32
  }
  func.func @transform_1(%arg0: i32) -> (i32, i32) {
    %c0_i32 = arith.constant 0 : i32
    %c0_i32_0 = arith.constant 0 : i32
    %c0_i32_1 = arith.constant 0 : i32
    return %c0_i32, %c0_i32_0 : i32, i32
  }
  func.func @transform_2(%arg0: i32) -> (i32, i32) {
    %c0_i32 = arith.constant 0 : i32
    %c0_i32_0 = arith.constant 0 : i32
    return %arg0, %c0_i32 : i32, i32
  }
  func.func @transform_3(%arg0: i32) -> (i32, i32) {
    %c0_i32 = arith.constant 0 : i32
    %c0_i32_0 = arith.constant 0 : i32
    %c0_i32_1 = arith.constant 0 : i32
    return %c0_i32, %c0_i32_0 : i32, i32
  }
  func.func @transform_4(%arg0: i32) -> (i32, i32) {
    %c0_i32 = arith.constant 0 : i32
    %c0_i32_0 = arith.constant 0 : i32
    %c0_i32_1 = arith.constant 0 : i32
    return %c0_i32, %c0_i32_0 : i32, i32
  }
}

module attributes {stable_mosaic.version = 11 : i64} {
  func.func @_bn_relu_kernel(%arg0: i32, %arg1: memref<128x128xf32, #tpu.memory_space<vmem>>, %arg2: memref<1x128xf32, #tpu.memory_space<vmem>>, %arg3: memref<1x128xf32, #tpu.memory_space<vmem>>, %arg4: memref<128x128xbf16, #tpu.memory_space<vmem>>) attributes {dimension_semantics = [#tpu.dimension_semantics<parallel>], iteration_bounds = array<i64: 1>, scalar_prefetch = 0 : i64, scratch_operands = 0 : i64, tpu.core_type = #tpu.core_type<tc>, window_params = [{transform_indices = @transform_0, window_bounds = array<i64: 128, 128>}, {pipeline_mode = #tpu.pipeline_mode<synchronous>, transform_indices = @transform_1, window_bounds = array<i64: 1, 128>}, {pipeline_mode = #tpu.pipeline_mode<synchronous>, transform_indices = @transform_2, window_bounds = array<i64: 1, 128>}, {transform_indices = @transform_3, window_bounds = array<i64: 128, 128>}]} {
    %c0 = arith.constant 0 : index
    %c0_0 = arith.constant 0 : index
    %0 = vector.load %arg1[%c0, %c0_0] : memref<128x128xf32, #tpu.memory_space<vmem>>, vector<128x128xf32>
    %c0_1 = arith.constant 0 : index
    %c0_2 = arith.constant 0 : index
    %1 = vector.load %arg2[%c0_1, %c0_2] : memref<1x128xf32, #tpu.memory_space<vmem>>, vector<1x128xf32>
    %2 = vector.broadcast %1 : vector<1x128xf32> to vector<128x128xf32>
    %3 = arith.mulf %0, %2 : vector<128x128xf32>
    %c0_3 = arith.constant 0 : index
    %c0_4 = arith.constant 0 : index
    %4 = vector.load %arg3[%c0_3, %c0_4] : memref<1x128xf32, #tpu.memory_space<vmem>>, vector<1x128xf32>
    %5 = vector.broadcast %4 : vector<1x128xf32> to vector<128x128xf32>
    %6 = arith.addf %3, %5 : vector<128x128xf32>
    %cst = arith.constant 0.000000e+00 : f32
    %7 = vector.broadcast %cst : f32 to vector<128x128xf32>
    %8 = arith.maximumf %6, %7 : vector<128x128xf32>
    %9 = arith.truncf %8 : vector<128x128xf32> to vector<128x128xbf16>
    %c0_5 = arith.constant 0 : index
    %c0_6 = arith.constant 0 : index
    %10 = vector.load %arg4[%c0_5, %c0_6] : memref<128x128xbf16, #tpu.memory_space<vmem>>, vector<128x128xbf16>
    tpu.vector_store %arg4[%c0_5, %c0_6], %9 {strides = array<i32>} : memref<128x128xbf16, #tpu.memory_space<vmem>>, vector<128x128xbf16>,
    return
  }
  func.func @transform_0(%arg0: i32) -> (i32, i32) {
    %c0_i32 = arith.constant 0 : i32
    %c0_i32_0 = arith.constant 0 : i32
    return %arg0, %c0_i32 : i32, i32
  }
  func.func @transform_1(%arg0: i32) -> (i32, i32) {
    %c0_i32 = arith.constant 0 : i32
    %c0_i32_0 = arith.constant 0 : i32
    %c0_i32_1 = arith.constant 0 : i32
    return %c0_i32, %c0_i32_0 : i32, i32
  }
  func.func @transform_2(%arg0: i32) -> (i32, i32) {
    %c0_i32 = arith.constant 0 : i32
    %c0_i32_0 = arith.constant 0 : i32
    %c0_i32_1 = arith.constant 0 : i32
    return %c0_i32, %c0_i32_0 : i32, i32
  }
  func.func @transform_3(%arg0: i32) -> (i32, i32) {
    %c0_i32 = arith.constant 0 : i32
    %c0_i32_0 = arith.constant 0 : i32
    return %arg0, %c0_i32 : i32, i32
  }
}

module attributes {stable_mosaic.version = 11 : i64} {
  func.func @_matmul_stats_kernel(%arg0: i32, %arg1: memref<512x512xbf16, #tpu.memory_space<vmem>>, %arg2: memref<512x128xbf16, #tpu.memory_space<vmem>>, %arg3: memref<512x128xf32, #tpu.memory_space<vmem>>, %arg4: memref<1x128xf32, #tpu.memory_space<vmem>>, %arg5: memref<1x128xf32, #tpu.memory_space<vmem>>) attributes {dimension_semantics = [#tpu.dimension_semantics<arbitrary>], iteration_bounds = array<i64: 1>, scalar_prefetch = 0 : i64, scratch_operands = 0 : i64, tpu.core_type = #tpu.core_type<tc>, window_params = [{transform_indices = @transform_0, window_bounds = array<i64: 512, 512>}, {pipeline_mode = #tpu.pipeline_mode<synchronous>, transform_indices = @transform_1, window_bounds = array<i64: 512, 128>}, {transform_indices = @transform_2, window_bounds = array<i64: 512, 128>}, {pipeline_mode = #tpu.pipeline_mode<synchronous>, transform_indices = @transform_3, window_bounds = array<i64: 1, 128>}, {pipeline_mode = #tpu.pipeline_mode<synchronous>, transform_indices = @transform_4, window_bounds = array<i64: 1, 128>}]} {
    %c0_i32 = arith.constant 0 : i32
    %0 = arith.cmpi eq, %arg0, %c0_i32 : i32
    %1 = arith.extui %0 : i1 to i32
    %c0_i32_0 = arith.constant 0 : i32
    %2 = arith.cmpi ne, %1, %c0_i32_0 : i32
    scf.if %2 {
      %cst_16 = arith.constant 0.000000e+00 : f32
      %18 = vector.broadcast %cst_16 : f32 to vector<1x128xf32>
      %c0_17 = arith.constant 0 : index
      %c0_18 = arith.constant 0 : index
      %19 = vector.load %arg4[%c0_17, %c0_18] : memref<1x128xf32, #tpu.memory_space<vmem>>, vector<1x128xf32>
      tpu.vector_store %arg4[%c0_17, %c0_18], %18 {strides = array<i32>} : memref<1x128xf32, #tpu.memory_space<vmem>>, vector<1x128xf32>,
      %cst_19 = arith.constant 0.000000e+00 : f32
      %20 = vector.broadcast %cst_19 : f32 to vector<1x128xf32>
      %c0_20 = arith.constant 0 : index
      %c0_21 = arith.constant 0 : index
      %21 = vector.load %arg5[%c0_20, %c0_21] : memref<1x128xf32, #tpu.memory_space<vmem>>, vector<1x128xf32>
      tpu.vector_store %arg5[%c0_20, %c0_21], %20 {strides = array<i32>} : memref<1x128xf32, #tpu.memory_space<vmem>>, vector<1x128xf32>,
    } else {
    }
    %c0 = arith.constant 0 : index
    %c0_1 = arith.constant 0 : index
    %3 = vector.load %arg1[%c0, %c0_1] : memref<512x512xbf16, #tpu.memory_space<vmem>>, vector<512x512xbf16>
    %c0_2 = arith.constant 0 : index
    %c0_3 = arith.constant 0 : index
    %4 = vector.load %arg2[%c0_2, %c0_3] : memref<512x128xbf16, #tpu.memory_space<vmem>>, vector<512x128xbf16>
    %cst = arith.constant dense<0.000000e+00> : vector<512x128xf32>
    %5 = tpu.matmul %3, %4, %cst {dimension_numbers = #tpu.dot_dimension_numbers<[1], [0], [0], [1], [0, 0, 1, 1], [], []>} : vector<512x512xbf16>, vector<512x128xbf16>, vector<512x128xf32> -> vector<512x128xf32>
    %c0_4 = arith.constant 0 : index
    %c0_5 = arith.constant 0 : index
    %6 = vector.load %arg3[%c0_4, %c0_5] : memref<512x128xf32, #tpu.memory_space<vmem>>, vector<512x128xf32>
    tpu.vector_store %arg3[%c0_4, %c0_5], %5 {strides = array<i32>} : memref<512x128xf32, #tpu.memory_space<vmem>>, vector<512x128xf32>,
    %c0_6 = arith.constant 0 : index
    %c0_7 = arith.constant 0 : index
    %7 = vector.load %arg4[%c0_6, %c0_7] : memref<1x128xf32, #tpu.memory_space<vmem>>, vector<1x128xf32>
    %cst_8 = arith.constant dense<0.000000e+00> : vector<128xf32>
    %8 = vector.multi_reduction <add>, %5, %cst_8 [0] : vector<512x128xf32> to vector<128xf32>
    %9 = vector.shape_cast %8 : vector<128xf32> to vector<1x128xf32>
    %10 = arith.addf %7, %9 : vector<1x128xf32>
    %c0_9 = arith.constant 0 : index
    %c0_10 = arith.constant 0 : index
    %11 = vector.load %arg4[%c0_9, %c0_10] : memref<1x128xf32, #tpu.memory_space<vmem>>, vector<1x128xf32>
    tpu.vector_store %arg4[%c0_9, %c0_10], %10 {strides = array<i32>} : memref<1x128xf32, #tpu.memory_space<vmem>>, vector<1x128xf32>,
    %c0_11 = arith.constant 0 : index
    %c0_12 = arith.constant 0 : index
    %12 = vector.load %arg5[%c0_11, %c0_12] : memref<1x128xf32, #tpu.memory_space<vmem>>, vector<1x128xf32>
    %13 = arith.mulf %5, %5 : vector<512x128xf32>
    %cst_13 = arith.constant dense<0.000000e+00> : vector<128xf32>
    %14 = vector.multi_reduction <add>, %13, %cst_13 [0] : vector<512x128xf32> to vector<128xf32>
    %15 = vector.shape_cast %14 : vector<128xf32> to vector<1x128xf32>
    %16 = arith.addf %12, %15 : vector<1x128xf32>
    %c0_14 = arith.constant 0 : index
    %c0_15 = arith.constant 0 : index
    %17 = vector.load %arg5[%c0_14, %c0_15] : memref<1x128xf32, #tpu.memory_space<vmem>>, vector<1x128xf32>
    tpu.vector_store %arg5[%c0_14, %c0_15], %16 {strides = array<i32>} : memref<1x128xf32, #tpu.memory_space<vmem>>, vector<1x128xf32>,
    return
  }
  func.func @transform_0(%arg0: i32) -> (i32, i32) {
    %c0_i32 = arith.constant 0 : i32
    %c0_i32_0 = arith.constant 0 : i32
    return %arg0, %c0_i32 : i32, i32
  }
  func.func @transform_1(%arg0: i32) -> (i32, i32) {
    %c0_i32 = arith.constant 0 : i32
    %c0_i32_0 = arith.constant 0 : i32
    %c0_i32_1 = arith.constant 0 : i32
    return %c0_i32, %c0_i32_0 : i32, i32
  }
  func.func @transform_2(%arg0: i32) -> (i32, i32) {
    %c0_i32 = arith.constant 0 : i32
    %c0_i32_0 = arith.constant 0 : i32
    return %arg0, %c0_i32 : i32, i32
  }
  func.func @transform_3(%arg0: i32) -> (i32, i32) {
    %c0_i32 = arith.constant 0 : i32
    %c0_i32_0 = arith.constant 0 : i32
    %c0_i32_1 = arith.constant 0 : i32
    return %c0_i32, %c0_i32_0 : i32, i32
  }
  func.func @transform_4(%arg0: i32) -> (i32, i32) {
    %c0_i32 = arith.constant 0 : i32
    %c0_i32_0 = arith.constant 0 : i32
    %c0_i32_1 = arith.constant 0 : i32
    return %c0_i32, %c0_i32_0 : i32, i32
  }
}

module attributes {stable_mosaic.version = 11 : i64} {
  func.func @_bn_relu_kernel(%arg0: i32, %arg1: memref<512x128xf32, #tpu.memory_space<vmem>>, %arg2: memref<1x128xf32, #tpu.memory_space<vmem>>, %arg3: memref<1x128xf32, #tpu.memory_space<vmem>>, %arg4: memref<512x128xbf16, #tpu.memory_space<vmem>>) attributes {dimension_semantics = [#tpu.dimension_semantics<parallel>], iteration_bounds = array<i64: 1>, scalar_prefetch = 0 : i64, scratch_operands = 0 : i64, tpu.core_type = #tpu.core_type<tc>, window_params = [{transform_indices = @transform_0, window_bounds = array<i64: 512, 128>}, {pipeline_mode = #tpu.pipeline_mode<synchronous>, transform_indices = @transform_1, window_bounds = array<i64: 1, 128>}, {pipeline_mode = #tpu.pipeline_mode<synchronous>, transform_indices = @transform_2, window_bounds = array<i64: 1, 128>}, {transform_indices = @transform_3, window_bounds = array<i64: 512, 128>}]} {
    %c0 = arith.constant 0 : index
    %c0_0 = arith.constant 0 : index
    %0 = vector.load %arg1[%c0, %c0_0] : memref<512x128xf32, #tpu.memory_space<vmem>>, vector<512x128xf32>
    %c0_1 = arith.constant 0 : index
    %c0_2 = arith.constant 0 : index
    %1 = vector.load %arg2[%c0_1, %c0_2] : memref<1x128xf32, #tpu.memory_space<vmem>>, vector<1x128xf32>
    %2 = vector.broadcast %1 : vector<1x128xf32> to vector<512x128xf32>
    %3 = arith.mulf %0, %2 : vector<512x128xf32>
    %c0_3 = arith.constant 0 : index
    %c0_4 = arith.constant 0 : index
    %4 = vector.load %arg3[%c0_3, %c0_4] : memref<1x128xf32, #tpu.memory_space<vmem>>, vector<1x128xf32>
    %5 = vector.broadcast %4 : vector<1x128xf32> to vector<512x128xf32>
    %6 = arith.addf %3, %5 : vector<512x128xf32>
    %cst = arith.constant 0.000000e+00 : f32
    %7 = vector.broadcast %cst : f32 to vector<512x128xf32>
    %8 = arith.maximumf %6, %7 : vector<512x128xf32>
    %9 = arith.truncf %8 : vector<512x128xf32> to vector<512x128xbf16>
    %c0_5 = arith.constant 0 : index
    %c0_6 = arith.constant 0 : index
    %10 = vector.load %arg4[%c0_5, %c0_6] : memref<512x128xbf16, #tpu.memory_space<vmem>>, vector<512x128xbf16>
    tpu.vector_store %arg4[%c0_5, %c0_6], %9 {strides = array<i32>} : memref<512x128xbf16, #tpu.memory_space<vmem>>, vector<512x128xbf16>,
    return
  }
  func.func @transform_0(%arg0: i32) -> (i32, i32) {
    %c0_i32 = arith.constant 0 : i32
    %c0_i32_0 = arith.constant 0 : i32
    return %arg0, %c0_i32 : i32, i32
  }
  func.func @transform_1(%arg0: i32) -> (i32, i32) {
    %c0_i32 = arith.constant 0 : i32
    %c0_i32_0 = arith.constant 0 : i32
    %c0_i32_1 = arith.constant 0 : i32
    return %c0_i32, %c0_i32_0 : i32, i32
  }
  func.func @transform_2(%arg0: i32) -> (i32, i32) {
    %c0_i32 = arith.constant 0 : i32
    %c0_i32_0 = arith.constant 0 : i32
    %c0_i32_1 = arith.constant 0 : i32
    return %c0_i32, %c0_i32_0 : i32, i32
  }
  func.func @transform_3(%arg0: i32) -> (i32, i32) {
    %c0_i32 = arith.constant 0 : i32
    %c0_i32_0 = arith.constant 0 : i32
    return %arg0, %c0_i32 : i32, i32
  }
}

module attributes {stable_mosaic.version = 11 : i64} {
  func.func @_matmul_tanh_kernel(%arg0: i32, %arg1: memref<512x256xbf16, #tpu.memory_space<vmem>>, %arg2: memref<256x128xbf16, #tpu.memory_space<vmem>>, %arg3: memref<512x128xf32, #tpu.memory_space<vmem>>) attributes {dimension_semantics = [#tpu.dimension_semantics<parallel>], iteration_bounds = array<i64: 4>, scalar_prefetch = 0 : i64, scratch_operands = 0 : i64, tpu.core_type = #tpu.core_type<tc>, window_params = [{transform_indices = @transform_0, window_bounds = array<i64: 512, 256>}, {pipeline_mode = #tpu.pipeline_mode<synchronous>, transform_indices = @transform_1, window_bounds = array<i64: 256, 128>}, {transform_indices = @transform_2, window_bounds = array<i64: 512, 128>}]} {
    %c0 = arith.constant 0 : index
    %c0_0 = arith.constant 0 : index
    %0 = vector.load %arg1[%c0, %c0_0] : memref<512x256xbf16, #tpu.memory_space<vmem>>, vector<512x256xbf16>
    %c0_1 = arith.constant 0 : index
    %c0_2 = arith.constant 0 : index
    %1 = vector.load %arg2[%c0_1, %c0_2] : memref<256x128xbf16, #tpu.memory_space<vmem>>, vector<256x128xbf16>
    %cst = arith.constant dense<0.000000e+00> : vector<512x128xf32>
    %2 = tpu.matmul %0, %1, %cst {dimension_numbers = #tpu.dot_dimension_numbers<[1], [0], [0], [1], [0, 0, 1, 1], [], []>} : vector<512x256xbf16>, vector<256x128xbf16>, vector<512x128xf32> -> vector<512x128xf32>
    %3 = math.tanh %2 : vector<512x128xf32>
    %c0_3 = arith.constant 0 : index
    %c0_4 = arith.constant 0 : index
    %4 = vector.load %arg3[%c0_3, %c0_4] : memref<512x128xf32, #tpu.memory_space<vmem>>, vector<512x128xf32>
    tpu.vector_store %arg3[%c0_3, %c0_4], %3 {strides = array<i32>} : memref<512x128xf32, #tpu.memory_space<vmem>>, vector<512x128xf32>,
    return
  }
  func.func @transform_0(%arg0: i32) -> (i32, i32) {
    %c0_i32 = arith.constant 0 : i32
    %c0_i32_0 = arith.constant 0 : i32
    return %arg0, %c0_i32 : i32, i32
  }
  func.func @transform_1(%arg0: i32) -> (i32, i32) {
    %c0_i32 = arith.constant 0 : i32
    %c0_i32_0 = arith.constant 0 : i32
    %c0_i32_1 = arith.constant 0 : i32
    return %c0_i32, %c0_i32_0 : i32, i32
  }
  func.func @transform_2(%arg0: i32) -> (i32, i32) {
    %c0_i32 = arith.constant 0 : i32
    %c0_i32_0 = arith.constant 0 : i32
    return %arg0, %c0_i32 : i32, i32
  }
}

</mosaic_0001>

<bundles_post_ra>
// kernel: _forward.8
= control target key start
LH: loop header
LB: loop body
LE: loop exit
PB: predicated region body
PF: predicated region fallthrough
CT: control target
= control target key end

     0   :  { %s133_s0 = inlined_call_operand.vmem [shape: f32[32,128], index: 0, kind: input, shape index: {}]   ;;  %s134_s1 = inlined_call_operand.vmem [shape: f32[1,128], index: 1, kind: input, shape index: {}]   ;;  %s135_s2 = inlined_call_operand.vmem [shape: f32[1,128], index: 2, kind: input, shape index: {}]   ;;  %s136_s3 = inlined_call_operand.vmem [shape: bf16[32,128], index: 3, kind: output, shape index: {}]  }
   0x1   :  { %v14_v0 = vld [vmem:[%s133_s0] sm:$0xff]  ;;  %v15_v1 = vld [vmem:[%s133_s0 + $0x8] sm:$0xff]  ;;  %v16_v6 = vld [vmem:[%s133_s0 + $0x10] sm:$0xff] }
   0x2   :  { %v68_v2 = vld [vmem:[%s134_s1] ss:$0 sm:$0xff]  ;;  %v17_v7 = vld [vmem:[%s133_s0 + $0x18] sm:$0xff] }
   0x3   :  { %v25_v3 = vmul.f32 %v68_v2, %v14_v0  ;;  %v26_v4 = vmul.f32 %v68_v2, %v15_v1  ;;  %v69_v5 = vld [vmem:[%s135_s2] ss:$0 sm:$0xff]  ;;  %v27_v8 = vmul.f32 %v68_v2, %v16_v6  ;;  %v28_v9 = vmul.f32 %v68_v2, %v17_v7 }
   0x5   :  { %v36_v10 = vadd.f32 %v69_v5, %v25_v3  ;;  %v37_v11 = vadd.f32 %v69_v5, %v26_v4  ;;  %v38_v12 = vadd.f32 %v69_v5, %v27_v8  ;;  %v39_v13 = vadd.f32 %v69_v5, %v28_v9 }
   0x7   :  { %v40_v14 = vmax.f32 %v36_v10, 0.0  ;;  %v41_v15 = vmax.f32 %v37_v11, 0.0  ;;  %v42_v16 = vmax.f32 %v38_v12, 0.0  ;;  %v43_v17 = vmax.f32 %v39_v13, 0.0 }
   0x9   :  { %v81_v18 = vpack.c.bf16 %v41_v15, %v40_v14  ;;  %v86_v19 = vpack.c.bf16 %v43_v17, %v42_v16 }
   0xb   :  { %82 = vst [vmem:[%s136_s3] sm:$0xff] %v81_v18   ;;  %88 = vst [vmem:[%s136_s3 + $0x8] sm:$0xff] %v86_v19  }

// kernel: _forward.7
= control target key start
LH: loop header
LB: loop body
LE: loop exit
PB: predicated region body
PF: predicated region fallthrough
CT: control target
= control target key end

     0   :  { %10 = vsyncpa [#allocation3], 0  ;;  %s1111_s15 = smov [#allocation2]   ;;  %s1325_s0 = inlined_call_operand.vmem [shape: bf16[8,32], index: 0, kind: input, shape index: {}]   ;;  %s1326_s1 = inlined_call_operand.hbm [shape: bf16[32,2048], index: 1, kind: input, shape index: {}]   ;;  %s1327_s2 = inlined_call_operand.vmem [shape: f32[8,2048], index: 2, kind: output, shape index: {0}]   ;;  %s1328_s3 = inlined_call_operand.vmem [shape: f32[1,2048], index: 3, kind: output, shape index: {1}]   ;;  %s1329_s4 = inlined_call_operand.vmem [shape: f32[1,2048], index: 4, kind: output, shape index: {2}]  }
   0x1   :  { %s18_s16 = sshll.u32 %s1111_s15, 4  ;;  %s19_s16 = int_to_ptr.vmem [resolvable:$true] %s18_s16 }
   0x2   :  { %s1097_s17 = scalar_lea.vmem %s19_s16, 4096  ;;  %p1102_p1 = scmp.lt.s32.totalorder %s19_s16, %s19_s16 }
   0x3   :  { %p1098_p0 = scmp.ne.s32.totalorder %s19_s16, %s1097_s17  ;;  %p1103_p2 = scmp.lt.s32.totalorder %s1097_s17, %s1097_s17 }
   0x5   :  { %p1104_p3 = por %p1103_p2, %p1102_p1 }
   0x7   :  { %p1105_p4 = pnand %p1104_p3, %p1098_p0 }
   0x9   :  { %1108 = shalt.err (!%p1105_p4)
}
   0xa   :  { %s1112_s18 = smov 1024   ;;  %s1113_s19 = smov 64  }
   0xb   :  { %24 = dma.hbm_to_vmem [thread:$0]  %s1326_s1, 4096, %s19_s16, [#allocation3], %s1112_s18, %s1112_s18, %s1113_s19  }
   0xc   :  { %1109 = dma.done.wait [#allocation3], 4096  }
   0xd   :  { %1110 = vsyncadd [#allocation3], 4294963200  ;;  %v1114_v0 = vmov 0   ;;  %v54_v1 = vld [vmem:[#allocation2 + $0x80] sm:$0xff]  ;;  %v55_v3 = vld [vmem:[#allocation2 + $0x88] sm:$0xff]  ;;  %vm230_vm0 = vcmask 261120  }
   0xe   :  { %266 = vmatprep.mubr.bf16.mxu0 %v1114_v0  ;;  %307 = vmatprep.mubr.bf16.mxu1 %v1114_v0  ;;  %v62_v2 = vld [vmem:[#allocation2 + $0xc0] sm:$0xff]  ;;  %v63_v5 = vld [vmem:[#allocation2 + $0xc8] sm:$0xff]  ;;  %v56_v15 = vld [vmem:[#allocation2 + $0x90] sm:$0xff] }
   0xf   :  { %v1060_v4 = vcombine.high %v54_v1, %v62_v2  ;;  %v1059_v6 = vcombine.low %v54_v1, %v62_v2  ;;  %v38_v7 = vld [vmem:[#allocation2] sm:$0xff]  ;;  %v1062_v9 = vcombine.high %v55_v3, %v63_v5  ;;  %v1061_v10 = vcombine.low %v55_v3, %v63_v5  ;;  %v39_v12 = vld [vmem:[#allocation2 + $0x8] sm:$0xff]  ;;  %v64_v16 = vld [vmem:[#allocation2 + $0xd0] sm:$0xff] }
  0x10   :  { %v46_v8 = vld [vmem:[#allocation2 + $0x40] sm:$0xff]  ;;  %v47_v13 = vld [vmem:[#allocation2 + $0x48] sm:$0xff]  ;;  %v57_v17 = vld [vmem:[#allocation2 + $0x98] sm:$0xff]  ;;  %v1064_v21 = vcombine.high %v56_v15, %v64_v16  ;;  %v1063_v28 = vcombine.low %v56_v15, %v64_v16 }
  0x11   :  { %v1044_v11 = vcombine.high %v38_v7, %v46_v8  ;;  %246 = vmatprep.subr.bf16.mxu0 %v1060_v4  ;;  %v1046_v14 = vcombine.high %v39_v12, %v47_v13  ;;  %287 = vmatprep.subr.bf16.mxu1 %v1062_v9  ;;  %v1043_v18 = vcombine.low %v38_v7, %v46_v8  ;;  %v65_v19 = vld [vmem:[#allocation2 + $0xd8] sm:$0xff]  ;;  %v40_v23 = vld [vmem:[#allocation2 + $0x10] sm:$0xff]  ;;  %v1149_v27 = vld [vmem:[%s1325_s0] sm:$0xf] }
  0x12   :  { %247 = vmatpush1.bf16.msra.mxu0 %v1059_v6  ;;  %288 = vmatpush1.bf16.msra.mxu1 %v1061_v10  ;;  %v1045_v20 = vcombine.low %v39_v12, %v47_v13  ;;  %v1066_v22 = vcombine.high %v57_v17, %v65_v19  ;;  %v48_v24 = vld [vmem:[#allocation2 + $0x50] sm:$0xff]  ;;  %v41_v25 = vld [vmem:[#allocation2 + $0x18] sm:$0xff]  ;;  %v1065_v29 = vcombine.low %v57_v17, %v65_v19  ;;  %v58_v32 = vld [vmem:[#allocation2 + $0xa0] sm:$0xff] }
  0x13   :  { %248 = vmatprep.subr.bf16.mxu0 %v1044_v11  ;;  %289 = vmatprep.subr.bf16.mxu1 %v1046_v14  ;;  %v49_v26 = vld [vmem:[#allocation2 + $0x58] sm:$0xff]  ;;  %v1048_v30 = vcombine.high %v40_v23, %v48_v24  ;;  %v66_v33 = vld [vmem:[#allocation2 + $0xe0] sm:$0xff]  ;;  %v59_v34 = vld [vmem:[#allocation2 + $0xa8] sm:$0xff]  ;;  %v1047_v36 = vcombine.low %v40_v23, %v48_v24 }
  0x14   :  { %v1050_v31 = vcombine.high %v41_v25, %v49_v26  ;;  %v67_v35 = vld [vmem:[#allocation2 + $0xe8] sm:$0xff]  ;;  %v1049_v37 = vcombine.low %v41_v25, %v49_v26  ;;  %v1068_v38 = vcombine.high %v58_v32, %v66_v33  ;;  %v42_v40 = vld [vmem:[#allocation2 + $0x20] sm:$0xff]  ;;  %v1067_v44 = vcombine.low %v58_v32, %v66_v33  ;;  %v60_v48 = vld [vmem:[#allocation2 + $0xb0] sm:$0xff] }
  0x15   :  { %v1070_v39 = vcombine.high %v59_v34, %v67_v35  ;;  %v50_v41 = vld [vmem:[#allocation2 + $0x60] sm:$0xff]  ;;  %v43_v42 = vld [vmem:[#allocation2 + $0x28] sm:$0xff]  ;;  %v1069_v45 = vcombine.low %v59_v34, %v67_v35  ;;  %v68_v49 = vld [vmem:[#allocation2 + $0xf0] sm:$0xff] }
  0x16   :  { %249 = vmatpush1.bf16.msra.mxu0 %v1043_v18  ;;  %290 = vmatpush1.bf16.msra.mxu1 %v1045_v20  ;;  %v51_v43 = vld [vmem:[#allocation2 + $0x68] sm:$0xff]  ;;  %v1052_v46 = vcombine.high %v42_v40, %v50_v41  ;;  %v61_v50 = vld [vmem:[#allocation2 + $0xb8] sm:$0xff]  ;;  %v1051_v52 = vcombine.low %v42_v40, %v50_v41  ;;  %v1072_v54 = vcombine.high %v60_v48, %v68_v49  ;;  %v44_v56 = vld [vmem:[#allocation2 + $0x30] sm:$0xff]  ;;  %v1115_v41 = vmov 1966171168  }
  0x17   :  { %328 = vmatprep.subr.bf16.mxu0 %v1064_v21  ;;  %369 = vmatprep.subr.bf16.mxu1 %v1066_v22  ;;  %v1054_v47 = vcombine.high %v43_v42, %v51_v43  ;;  %v69_v51 = vld [vmem:[#allocation2 + $0xf8] sm:$0xff]  ;;  %v1053_v53 = vcombine.low %v43_v42, %v51_v43  ;;  %v52_v57 = vld [vmem:[#allocation2 + $0x70] sm:$0xff]  ;;  %v1071_v60 = vcombine.low %v60_v48, %v68_v49  ;;  %v697_v42 = vunpack.c.l.s4 %v1115_v41 }
  0x18   :  { %v1074_v55 = vcombine.high %v61_v50, %v69_v51  ;;  %v45_v58 = vld [vmem:[#allocation2 + $0x38] sm:$0xff]  ;;  %v1073_v61 = vcombine.low %v61_v50, %v69_v51  ;;  %v1056_v62 = vcombine.high %v44_v56, %v52_v57  ;;  %v1055_v1 = vcombine.low %v44_v56, %v52_v57 }
  0x19   :  { %1075 = vmatmul.mubr.msk.bf16.vlgmr.msra.gmra.mxu0 %vm230_vm0, %v1149_v27  ;;  %1076 = vmatmul.mubr.msk.bf16.vlgmr.msra.gmra.mxu1 %vm230_vm0, %v1149_v27  ;;  %v53_v59 = vld [vmem:[#allocation2 + $0x78] sm:$0xff]  ;;  %v699_v43 = vlaneseq }
  0x1a   :  { %329 = vmatpush1.bf16.msra.mxu0 %v1063_v28  ;;  %370 = vmatpush1.bf16.msra.mxu1 %v1065_v29  ;;  %v1058_v63 = vcombine.high %v45_v58, %v53_v59  ;;  %v1057_v2 = vcombine.low %v45_v58, %v53_v59  ;;  %v698_v58 = vunpack.c.0.s8 %v697_v42 }
  0x1b   :  { %330 = vmatprep.subr.bf16.mxu0 %v1048_v30  ;;  %371 = vmatprep.subr.bf16.mxu1 %v1050_v31  ;;  %v700_v59 = vshrl.u32 %v699_v43, 7 }
  0x1c   :  { %348 = vmatprep.mubr.bf16.mxu0 %v1114_v0  ;;  %389 = vmatprep.mubr.bf16.mxu1 %v1114_v0 }
  0x1e   :  { %331 = vmatpush1.bf16.msra.mxu0 %v1047_v36  ;;  %372 = vmatpush1.bf16.msra.mxu1 %v1049_v37 }
  0x1f   :  { %410 = vmatprep.subr.bf16.mxu0 %v1068_v38  ;;  %451 = vmatprep.subr.bf16.mxu1 %v1070_v39 }
  0x21   :  { %1077 = vmatmul.mubr.msk.bf16.vlgmr.msra.gmra.mxu0 %vm230_vm0, %v1149_v27  ;;  %1078 = vmatmul.mubr.msk.bf16.vlgmr.msra.gmra.mxu1 %vm230_vm0, %v1149_v27 }
  0x22   :  { %411 = vmatpush1.bf16.msra.mxu0 %v1067_v44  ;;  %452 = vmatpush1.bf16.msra.mxu1 %v1069_v45 }
  0x23   :  { %412 = vmatprep.subr.bf16.mxu0 %v1052_v46  ;;  %453 = vmatprep.subr.bf16.mxu1 %v1054_v47 }
  0x24   :  { %430 = vmatprep.mubr.bf16.mxu0 %v1114_v0  ;;  %471 = vmatprep.mubr.bf16.mxu1 %v1114_v0 }
  0x26   :  { %413 = vmatpush1.bf16.msra.mxu0 %v1051_v52  ;;  %454 = vmatpush1.bf16.msra.mxu1 %v1053_v53 }
  0x27   :  { %492 = vmatprep.subr.bf16.mxu0 %v1072_v54  ;;  %533 = vmatprep.subr.bf16.mxu1 %v1074_v55 }
  0x29   :  { %1079 = vmatmul.mubr.msk.bf16.vlgmr.msra.gmra.mxu0 %vm230_vm0, %v1149_v27  ;;  %1080 = vmatmul.mubr.msk.bf16.vlgmr.msra.gmra.mxu1 %vm230_vm0, %v1149_v27 }
  0x2a   :  { %493 = vmatpush1.bf16.msra.mxu0 %v1071_v60  ;;  %534 = vmatpush1.bf16.msra.mxu1 %v1073_v61 }
  0x2b   :  { %494 = vmatprep.subr.bf16.mxu0 %v1056_v62  ;;  %535 = vmatprep.subr.bf16.mxu1 %v1058_v63 }
  0x2c   :  { %512 = vmatprep.mubr.bf16.mxu0 %v1114_v0  ;;  %553 = vmatprep.mubr.bf16.mxu1 %v1114_v0 }
  0x2e   :  { %495 = vmatpush1.bf16.msra.mxu0 %v1055_v1  ;;  %536 = vmatpush1.bf16.msra.mxu1 %v1057_v2 }
  0x31   :  { %1081 = vmatmul.mubr.msk.bf16.vlgmr.msra.gmra.mxu0 %vm230_vm0, %v1149_v27  ;;  %1082 = vmatmul.mubr.msk.bf16.vlgmr.msra.gmra.mxu1 %vm230_vm0, %v1149_v27 }
  0xd9   :  { %v268_v3 = vpop.f32.mrf.mxu0  ;;  %v309_v6 = vpop.f32.mrf.mxu1 }
  0xda   :  { %562 = vst [vmem:[%s1327_s2] sm:$0xff] %v268_v3  ;;  %v580_v4 = vrot.slane %v268_v3, 4  ;;  %v798_v5 = vmul.f32 %v268_v3, %v268_v3  ;;  %564 = vst [vmem:[%s1327_s2 + $0x10] sm:$0xff] %v309_v6  ;;  %v592_v0 = vrot.slane %v309_v6, 4  ;;  %v800_v7 = vmul.f32 %v309_v6, %v309_v6 }
  0xdb   :  { %v270_v8 = vpop.f32.mrf.mxu0  ;;  %v311_v13 = vpop.f32.mrf.mxu1 }
  0xdc   :  { %v581_v9 = vadd.f32 %v580_v4, %v268_v3  ;;  %v814_v10 = vrot.slane %v798_v5, 4  ;;  %563 = vst [vmem:[%s1327_s2 + $0x8] sm:$0xff] %v270_v8  ;;  %v586_v11 = vrot.slane %v270_v8, 4  ;;  %v799_v12 = vmul.f32 %v270_v8, %v270_v8  ;;  %565 = vst [vmem:[%s1327_s2 + $0x18] sm:$0xff] %v311_v13 }
  0xdd   :  { %v593_v14 = vadd.f32 %v592_v0, %v309_v6  ;;  %v826_v15 = vrot.slane %v800_v7, 4  ;;  %v598_v16 = vrot.slane %v311_v13, 4  ;;  %v801_v17 = vmul.f32 %v311_v13, %v311_v13  ;;  %v272_v18 = vpop.f32.mrf.mxu0  ;;  %v313_v23 = vpop.f32.mrf.mxu1 }
  0xde   :  { %v582_v19 = vrot.slane %v581_v9, 2  ;;  %v815_v20 = vadd.f32 %v814_v10, %v798_v5  ;;  %v587_v21 = vadd.f32 %v586_v11, %v270_v8  ;;  %v820_v22 = vrot.slane %v799_v12, 4 }
  0xdf   :  { %v594_v24 = vrot.slane %v593_v14, 2  ;;  %v599_v25 = vadd.f32 %v598_v16, %v311_v13  ;;  %v832_v26 = vrot.slane %v801_v17, 4  ;;  %v273_v27 = vpop.f32.mrf.mxu0  ;;  %v827_v28 = vadd.f32 %v826_v15, %v800_v7  ;;  %v314_v31 = vpop.f32.mrf.mxu1 }
  0xe0   :  { %v588_v29 = vrot.slane %v587_v21, 2  ;;  %v821_v30 = vadd.f32 %v820_v22, %v799_v12  ;;  %v583_v35 = vadd.f32 %v582_v19, %v581_v9  ;;  %v816_v36 = vrot.slane %v815_v20, 2 }
  0xe1   :  { %v600_v32 = vrot.slane %v599_v25, 2  ;;  %v833_v33 = vadd.f32 %v832_v26, %v801_v17  ;;  %v350_v34 = vpop.f32.mrf.mxu0  ;;  %v391_v39 = vpop.f32.mrf.mxu1  ;;  %v595_v40 = vadd.f32 %v594_v24, %v593_v14  ;;  %v828_v46 = vrot.slane %v827_v28, 2 }
  0xe2   :  { %v589_v37 = vadd.f32 %v588_v29, %v587_v21  ;;  %v822_v38 = vrot.slane %v821_v30, 2  ;;  %566 = vst [vmem:[%s1327_s2 + $0x20] sm:$0xff] %v350_v34  ;;  %568 = vst [vmem:[%s1327_s2 + $0x30] sm:$0xff] %v391_v39  ;;  %v584_v52 = vrot.slane %v583_v35, 1  ;;  %v817_v53 = vadd.f32 %v816_v36, %v815_v20 }
  0xe3   :  { %v601_v44 = vadd.f32 %v600_v32, %v599_v25  ;;  %v352_v45 = vpop.f32.mrf.mxu0  ;;  %v834_v47 = vrot.slane %v833_v33, 2  ;;  %v1194_v48 = vpop.f32.mrf.mxu1  ;;  %v604_v55 = vrot.slane %v350_v34, 4  ;;  %v596_v57 = vrot.slane %v595_v40, 1 }
  0xe4   :  { %567 = vst [vmem:[%s1327_s2 + $0x28] sm:$0xff] %v352_v45  ;;  %v590_v49 = vrot.slane %v589_v37, 1  ;;  %v823_v50 = vadd.f32 %v822_v38, %v821_v30  ;;  %569 = vst [vmem:[%s1327_s2 + $0x38] sm:$0xff] %v1194_v48  ;;  %v802_v60 = vmul.f32 %v350_v34, %v350_v34  ;;  %v829_v62 = vadd.f32 %v828_v46, %v827_v28 }
  0xe5   :  { %v354_v51 = vpop.f32.mrf.mxu0  ;;  %v602_v54 = vrot.slane %v601_v44, 1  ;;  %v395_v56 = vpop.f32.mrf.mxu1  ;;  %v835_v63 = vadd.f32 %v834_v47, %v833_v33  ;;  %v605_v1 = vadd.f32 %v604_v55, %v350_v34  ;;  %v616_v2 = vrot.slane %v391_v39, 4 }
  0xe6   :  { %v591_v4 = vadd.f32 %v590_v49, %v589_v37  ;;  %v824_v5 = vrot.slane %v823_v50, 1  ;;  %v838_v6 = vrot.slane %v802_v60, 4  ;;  %v804_v0 = vmul.f32 %v391_v39, %v391_v39 }
  0xe7   :  { %v355_v61 = vpop.f32.mrf.mxu0  ;;  %v396_v3 = vpop.f32.mrf.mxu1  ;;  %v585_v8 = vadd.f32 %v584_v52, %v583_v35  ;;  %v818_v9 = vrot.slane %v817_v53, 1  ;;  %v603_v10 = vadd.f32 %v602_v54, %v601_v44  ;;  %v606_v12 = vrot.slane %v605_v1, 2 }
  0xe8   :  { %v839_v13 = vadd.f32 %v838_v6, %v802_v60  ;;  %v617_v14 = vadd.f32 %v616_v2, %v391_v39  ;;  %v850_v15 = vrot.slane %v804_v0, 4  ;;  %v830_v17 = vrot.slane %v829_v62, 1 }
  0xe9   :  { %v1200_v7 = vpop.f32.mrf.mxu0  ;;  %v1206_v11 = vpop.f32.mrf.mxu1  ;;  %v1214_v18 = vsub.s32 %v698_v58, %v700_v59  ;;  %v836_v19 = vrot.slane %v835_v63, 1  ;;  %v610_v20 = vrot.slane %v352_v45, 4  ;;  %v597_v22 = vadd.f32 %v596_v57, %v595_v40 }
  0xea   :  { %570 = vst [vmem:[%s1327_s2 + $0x40] sm:$0xff] %v1200_v7  ;;  %572 = vst [vmem:[%s1327_s2 + $0x50] sm:$0xff] %v1206_v11  ;;  %v692_v23 = vcombine.low %v585_v8, %v591_v4  ;;  %v825_v24 = vadd.f32 %v824_v5, %v823_v50  ;;  %v840_v25 = vrot.slane %v839_v13, 2  ;;  %v851_v27 = vadd.f32 %v850_v15, %v804_v0 }
  0xeb   :  { %v1212_v16 = vpop.f32.mrf.mxu0  ;;  %v1220_v21 = vpop.f32.mrf.mxu1  ;;  %v611_v28 = vadd.f32 %v610_v20, %v352_v45  ;;  %v803_v29 = vmul.f32 %v352_v45, %v352_v45  ;;  %v819_v31 = vadd.f32 %v818_v9, %v817_v53  ;;  %v693_v32 = vcombine.low %v597_v22, %v603_v10 }
  0xec   :  { %571 = vst [vmem:[%s1327_s2 + $0x48] sm:$0xff] %v1212_v16  ;;  %573 = vst [vmem:[%s1327_s2 + $0x58] sm:$0xff] %v1220_v21  ;;  %v607_v33 = vadd.f32 %v606_v12, %v605_v1  ;;  %v618_v34 = vrot.slane %v617_v14, 2  ;;  %v831_v36 = vadd.f32 %v830_v17, %v829_v62  ;;  %v837_v37 = vadd.f32 %v836_v19, %v835_v63 }
  0xed   :  { %v436_v26 = vpop.f32.mrf.mxu0  ;;  %v477_v30 = vpop.f32.mrf.mxu1  ;;  %v612_v38 = vrot.slane %v611_v28, 2  ;;  %v844_v39 = vrot.slane %v803_v29, 4  ;;  %v702_v41 = vrot.slane %v692_v23, %v1214_v18  ;;  %v926_v42 = vcombine.low %v819_v31, %v825_v24 }
  0xee   :  { %v841_v43 = vadd.f32 %v840_v25, %v839_v13  ;;  %v622_v44 = vrot.slane %v1194_v48, 4  ;;  %v852_v45 = vrot.slane %v851_v27, 2  ;;  %v805_v50 = vmul.f32 %v1194_v48, %v1194_v48 }
  0xef   :  { %v437_v35 = vpop.f32.mrf.mxu0  ;;  %v478_v40 = vpop.f32.mrf.mxu1  ;;  %v613_v47 = vadd.f32 %v612_v38, %v611_v28  ;;  %v845_v49 = vadd.f32 %v844_v39, %v803_v29  ;;  %v709_v52 = vrot.slane %v693_v32, %v1214_v18  ;;  %v608_v53 = vrot.slane %v607_v33, 1 }
  0xf0   :  { %v619_v54 = vadd.f32 %v618_v34, %v617_v14  ;;  %v623_v55 = vadd.f32 %v622_v44, %v1194_v48  ;;  %v927_v57 = vcombine.low %v831_v36, %v837_v37  ;;  %v856_v60 = vrot.slane %v805_v50, 4 }
  0xf1   :  { %v1228_v46 = vpop.f32.mrf.mxu0  ;;  %v1236_v51 = vpop.f32.mrf.mxu1  ;;  %v614_v58 = vrot.slane %v613_v47, 1  ;;  %v846_v59 = vrot.slane %v845_v49, 2  ;;  %v1253_v48 = vrot.slane %v926_v42, %v1214_v18  ;;  %v842_v62 = vrot.slane %v841_v43, 1 }
  0xf2   :  { %574 = vst [vmem:[%s1327_s2 + $0x60] sm:$0xff] %v1228_v46  ;;  %576 = vst [vmem:[%s1327_s2 + $0x70] sm:$0xff] %v1236_v51  ;;  %v624_v63 = vrot.slane %v623_v55, 2  ;;  %v628_v1 = vrot.slane %v1200_v7, 4  ;;  %v853_v3 = vadd.f32 %v852_v45, %v851_v27  ;;  %v857_v6 = vadd.f32 %v856_v60, %v805_v50 }
  0xf3   :  { %v1244_v56 = vpop.f32.mrf.mxu0  ;;  %v1250_v61 = vpop.f32.mrf.mxu1  ;;  %v615_v4 = vadd.f32 %v614_v58, %v613_v47  ;;  %v847_v5 = vadd.f32 %v846_v59, %v845_v49  ;;  %v609_v8 = vadd.f32 %v608_v53, %v607_v33  ;;  %v620_v9 = vrot.slane %v619_v54, 1 }
  0xf4   :  { %575 = vst [vmem:[%s1327_s2 + $0x68] sm:$0xff] %v1244_v56  ;;  %577 = vst [vmem:[%s1327_s2 + $0x78] sm:$0xff] %v1250_v61  ;;  %v625_v10 = vadd.f32 %v624_v63, %v623_v55  ;;  %v806_v12 = vmul.f32 %v1200_v7, %v1200_v7  ;;  %v724_v14 = vcombine.low %v702_v41, %v709_v52  ;;  %v858_v19 = vrot.slane %v857_v6, 2 }
  0xf5   :  { %v518_v2 = vpop.f32.mrf.mxu0  ;;  %v559_v0 = vpop.f32.mrf.mxu1  ;;  %v943_v15 = vrot.slane %v927_v57, %v1214_v18  ;;  %v848_v17 = vrot.slane %v847_v5, 1  ;;  %v843_v22 = vadd.f32 %v842_v62, %v841_v43  ;;  %v694_v23 = vcombine.low %v609_v8, %v615_v4 }
  0xf6   :  { %v626_v24 = vrot.slane %v625_v10, 1  ;;  %v629_v25 = vadd.f32 %v628_v1, %v1200_v7  ;;  %v854_v26 = vrot.slane %v853_v3, 1  ;;  %v859_v28 = vadd.f32 %v858_v19, %v857_v6 }
  0xf7   :  { %v519_v13 = vpop.f32.mrf.mxu0  ;;  %v560_v20 = vpop.f32.mrf.mxu1  ;;  %v849_v27 = vadd.f32 %v848_v17, %v847_v5  ;;  %v640_v29 = vrot.slane %v1206_v11, 4  ;;  %v621_v30 = vadd.f32 %v620_v9, %v619_v54  ;;  %v862_v32 = vrot.slane %v806_v12, 4 }
  0xf8   :  { %v627_v31 = vadd.f32 %v626_v24, %v625_v10  ;;  %v860_v34 = vrot.slane %v859_v28, 1  ;;  %v808_v35 = vmul.f32 %v1206_v11, %v1206_v11  ;;  %v634_v36 = vrot.slane %v1212_v16, 4 }
  0xf9   :  { %v928_v33 = vcombine.low %v843_v22, %v849_v27  ;;  %v732_v37 = vrot.slane %v724_v14, %v1214_v18  ;;  %v716_v38 = vrot.slane %v694_v23, %v1214_v18  ;;  %v630_v39 = vrot.slane %v629_v25, 2 }
  0xfa   :  { %v695_v7 = vcombine.low %v621_v30, %v627_v31  ;;  %v958_v40 = vcombine.low %v1253_v48, %v943_v15  ;;  %v855_v41 = vadd.f32 %v854_v26, %v853_v3  ;;  %v861_v42 = vadd.f32 %v860_v34, %v859_v28 }
  0xfb   :  { %v641_v43 = vadd.f32 %v640_v29, %v1206_v11  ;;  %v863_v45 = vadd.f32 %v862_v32, %v806_v12  ;;  %v635_v47 = vadd.f32 %v634_v36, %v1212_v16  ;;  %v807_v49 = vmul.f32 %v1212_v16, %v1212_v16 }
  0xfc   :  { %v723_v44 = vrot.slane %v695_v7, %v1214_v18  ;;  %v950_v50 = vrot.slane %v928_v33, %v1214_v18  ;;  %v929_v52 = vcombine.low %v855_v41, %v861_v42  ;;  %v874_v53 = vrot.slane %v808_v35, 4 }
  0xfd   :  { %v646_v54 = vrot.slane %v1220_v21, 4  ;;  %v631_v57 = vadd.f32 %v630_v39, %v629_v25  ;;  %v868_v58 = vrot.slane %v807_v49, 4  ;;  %v809_v11 = vmul.f32 %v1220_v21, %v1220_v21 }
  0xfe   :  { %v725_v55 = vcombine.low %v716_v38, %v723_v44  ;;  %v957_v59 = vrot.slane %v929_v52, %v1214_v18  ;;  %v642_v60 = vrot.slane %v641_v43, 2  ;;  %v652_v62 = vrot.slane %v1228_v46, 4 }
  0xff   :  { %v647_v48 = vadd.f32 %v646_v54, %v1220_v21  ;;  %v864_v63 = vrot.slane %v863_v45, 2  ;;  %v636_v1 = vrot.slane %v635_v47, 2  ;;  %v880_v2 = vrot.slane %v809_v11, 4 }
 0x100   :  { %v739_v16 = vrot.slane %v725_v55, %v1214_v18  ;;  %v959_v3 = vcombine.low %v950_v50, %v957_v59  ;;  %v875_v4 = vadd.f32 %v874_v53, %v808_v35  ;;  %v869_v5 = vadd.f32 %v868_v58, %v807_v49 }
 0x101   :  { %v648_v6 = vrot.slane %v647_v48, 2  ;;  %v881_v8 = vadd.f32 %v880_v2, %v809_v11  ;;  %v653_v9 = vadd.f32 %v652_v62, %v1228_v46  ;;  %v810_v10 = vmul.f32 %v1228_v46, %v1228_v46 }
 0x102   :  { %v740_v0 = vcombine.low %v732_v37, %v739_v16  ;;  %v966_v21 = vrot.slane %v958_v40, %v1214_v18  ;;  %v973_v12 = vrot.slane %v959_v3, %v1214_v18  ;;  %v643_v13 = vadd.f32 %v642_v60, %v641_v43 }
 0x103   :  { %v865_v14 = vadd.f32 %v864_v63, %v863_v45  ;;  %v637_v15 = vadd.f32 %v636_v1, %v635_v47  ;;  %v886_v17 = vrot.slane %v810_v10, 4  ;;  %v632_v20 = vrot.slane %v631_v57, 1 }
 0x104   :  { %v974_v19 = vcombine.low %v966_v21, %v973_v12  ;;  %v876_v22 = vrot.slane %v875_v4, 2  ;;  %v870_v23 = vrot.slane %v869_v5, 2  ;;  %794 = vst [vmem:[%s1328_s3] sm:$0xff] %v740_v0  ;;  %v649_v24 = vadd.f32 %v648_v6, %v647_v48 }
 0x105   :  { %v882_v25 = vrot.slane %v881_v8, 2  ;;  %v654_v26 = vrot.slane %v653_v9, 2  ;;  %v664_v46 = vrot.slane %v1236_v51, 4  ;;  %v887_v27 = vadd.f32 %v886_v17, %v810_v10 }
 0x106   :  { %v866_v28 = vrot.slane %v865_v14, 1  ;;  %v644_v29 = vrot.slane %v643_v13, 1  ;;  %v638_v30 = vrot.slane %v637_v15, 1  ;;  %1028 = vst [vmem:[%s1329_s4] sm:$0xff] %v974_v19  ;;  %v633_v32 = vadd.f32 %v632_v20, %v631_v57 }
 0x107   :  { %v665_v31 = vadd.f32 %v664_v46, %v1236_v51  ;;  %v871_v33 = vadd.f32 %v870_v23, %v869_v5  ;;  %v812_v34 = vmul.f32 %v1236_v51, %v1236_v51  ;;  %v658_v35 = vrot.slane %v1244_v56, 4 }
 0x108   :  { %v877_v36 = vadd.f32 %v876_v22, %v875_v4  ;;  %v650_v37 = vrot.slane %v649_v24, 1  ;;  %v883_v38 = vadd.f32 %v882_v25, %v881_v8  ;;  %v655_v7 = vadd.f32 %v654_v26, %v653_v9 }
 0x109   :  { %v888_v39 = vrot.slane %v887_v27, 2  ;;  %v898_v40 = vrot.slane %v812_v34, 4  ;;  %v659_v41 = vadd.f32 %v658_v35, %v1244_v56  ;;  %v811_v42 = vmul.f32 %v1244_v56, %v1244_v56 }
 0x10a   :  { %v867_v43 = vadd.f32 %v866_v28, %v865_v14  ;;  %v645_v44 = vadd.f32 %v644_v29, %v643_v13  ;;  %v639_v45 = vadd.f32 %v638_v30, %v637_v15  ;;  %v666_v47 = vrot.slane %v665_v31, 2 }
 0x10b   :  { %v872_v49 = vrot.slane %v871_v33, 1  ;;  %v899_v50 = vadd.f32 %v898_v40, %v812_v34  ;;  %v660_v51 = vrot.slane %v659_v41, 2  ;;  %v892_v52 = vrot.slane %v811_v42, 4 }
 0x10c   :  { %v878_v53 = vrot.slane %v877_v36, 1  ;;  %v651_v54 = vadd.f32 %v650_v37, %v649_v24  ;;  %v656_v55 = vrot.slane %v655_v7, 1  ;;  %v670_v57 = vrot.slane %v1250_v61, 4 }
 0x10d   :  { %v884_v58 = vrot.slane %v883_v38, 1  ;;  %v889_v11 = vadd.f32 %v888_v39, %v887_v27  ;;  %v661_v59 = vadd.f32 %v660_v51, %v659_v41  ;;  %v893_v60 = vadd.f32 %v892_v52, %v811_v42 }
 0x10e   :  { %v667_v48 = vadd.f32 %v666_v47, %v665_v31  ;;  %v900_v62 = vrot.slane %v899_v50, 2  ;;  %v671_v56 = vadd.f32 %v670_v57, %v1250_v61  ;;  %v813_v16 = vmul.f32 %v1250_v61, %v1250_v61 }
 0x10f   :  { %v741_v63 = vcombine.low %v633_v32, %v639_v45  ;;  %v873_v1 = vadd.f32 %v872_v49, %v871_v33  ;;  %v662_v2 = vrot.slane %v661_v59, 1  ;;  %v894_v3 = vrot.slane %v893_v60, 2 }
 0x110   :  { %v742_v4 = vcombine.low %v645_v44, %v651_v54  ;;  %v657_v5 = vadd.f32 %v656_v55, %v655_v7  ;;  %v672_v6 = vrot.slane %v671_v56, 2  ;;  %v904_v0 = vrot.slane %v813_v16, 4 }
 0x111   :  { %v885_v8 = vadd.f32 %v884_v58, %v883_v38  ;;  %v890_v9 = vrot.slane %v889_v11, 1  ;;  %v663_v10 = vadd.f32 %v662_v2, %v661_v59  ;;  %v895_v21 = vadd.f32 %v894_v3, %v893_v60 }
 0x112   :  { %v668_v12 = vrot.slane %v667_v48, 1  ;;  %v901_v13 = vadd.f32 %v900_v62, %v899_v50  ;;  %v673_v14 = vadd.f32 %v672_v6, %v671_v56  ;;  %v905_v15 = vadd.f32 %v904_v0, %v813_v16 }
 0x113   :  { %v879_v17 = vadd.f32 %v878_v53, %v877_v36  ;;  %v751_v19 = vrot.slane %v741_v63, %v1214_v18  ;;  %v896_v61 = vrot.slane %v895_v21, 1  ;;  %v975_v20 = vcombine.low %v867_v43, %v873_v1 }
 0x114   :  { %v743_v22 = vcombine.low %v657_v5, %v663_v10  ;;  %v674_v23 = vrot.slane %v673_v14, 1  ;;  %v906_v24 = vrot.slane %v905_v15, 2  ;;  %v758_v25 = vrot.slane %v742_v4, %v1214_v18 }
 0x115   :  { %v976_v26 = vcombine.low %v879_v17, %v885_v8  ;;  %v891_v46 = vadd.f32 %v890_v9, %v889_v11  ;;  %v897_v27 = vadd.f32 %v896_v61, %v895_v21  ;;  %v669_v28 = vadd.f32 %v668_v12, %v667_v48 }
 0x116   :  { %v902_v29 = vrot.slane %v901_v13, 1  ;;  %v675_v30 = vadd.f32 %v674_v23, %v673_v14  ;;  %v907_v31 = vadd.f32 %v906_v24, %v905_v15  ;;  %v765_v32 = vrot.slane %v743_v22, %v1214_v18 }
 0x117   :  { %v977_v33 = vcombine.low %v891_v46, %v897_v27  ;;  %v985_v36 = vrot.slane %v975_v20, %v1214_v18  ;;  %v773_v37 = vcombine.low %v751_v19, %v758_v25  ;;  %v992_v38 = vrot.slane %v976_v26, %v1214_v18 }
 0x118   :  { %v744_v34 = vcombine.low %v669_v28, %v675_v30  ;;  %v908_v35 = vrot.slane %v907_v31, 1  ;;  %v903_v7 = vadd.f32 %v902_v29, %v901_v13 }
 0x119   :  { %v999_v41 = vrot.slane %v977_v33, %v1214_v18  ;;  %v781_v44 = vrot.slane %v773_v37, %v1214_v18  ;;  %v1007_v45 = vcombine.low %v985_v36, %v992_v38 }
 0x11a   :  { %v772_v39 = vrot.slane %v744_v34, %v1214_v18  ;;  %v909_v40 = vadd.f32 %v908_v35, %v907_v31 }
 0x11b   :  { %v1015_v52 = vrot.slane %v1007_v45, %v1214_v18 }
 0x11c   :  { %v774_v42 = vcombine.low %v765_v32, %v772_v39  ;;  %v978_v43 = vcombine.low %v903_v7, %v909_v40 }
 0x11e   :  { %v788_v47 = vrot.slane %v774_v42, %v1214_v18  ;;  %v1006_v49 = vrot.slane %v978_v43, %v1214_v18 }
 0x120   :  { %v789_v50 = vcombine.low %v781_v44, %v788_v47  ;;  %v1008_v51 = vcombine.low %v999_v41, %v1006_v49 }
 0x122   :  { %v1022_v53 = vrot.slane %v1008_v51, %v1214_v18  ;;  %795 = vst [vmem:[%s1328_s3 + $0x8] sm:$0xff] %v789_v50 }
 0x124   :  { %v1023_v54 = vcombine.low %v1015_v52, %v1022_v53 }
 0x126   :  { %1029 = vst [vmem:[%s1329_s4 + $0x8] sm:$0xff] %v1023_v54 }
 0x127   :  { %1042 = vsyncpa [#allocation3], 1 }

// kernel: _forward.10
= control target key start
LH: loop header
LB: loop body
LE: loop exit
PB: predicated region body
PF: predicated region fallthrough
CT: control target
= control target key end

     0   :  { %s391_s0 = inlined_call_operand.vmem [shape: f32[128,128], index: 0, kind: input, shape index: {}]   ;;  %s392_s1 = inlined_call_operand.vmem [shape: f32[1,128], index: 1, kind: input, shape index: {}]   ;;  %s393_s2 = inlined_call_operand.vmem [shape: f32[1,128], index: 2, kind: input, shape index: {}]   ;;  %s394_s3 = inlined_call_operand.vmem [shape: bf16[128,128], index: 3, kind: output, shape index: {}]  }
   0x1   :  { %v14_v0 = vld [vmem:[%s391_s0] sm:$0xff]  ;;  %v15_v1 = vld [vmem:[%s391_s0 + $0x8] sm:$0xff]  ;;  %v16_v6 = vld [vmem:[%s391_s0 + $0x10] sm:$0xff] }
   0x2   :  { %v286_v2 = vld [vmem:[%s392_s1] ss:$0 sm:$0xff]  ;;  %v17_v7 = vld [vmem:[%s391_s0 + $0x18] sm:$0xff]  ;;  %v19_v11 = vld [vmem:[%s391_s0 + $0x28] sm:$0xff] }
   0x3   :  { %v37_v3 = vmul.f32 %v286_v2, %v14_v0  ;;  %v38_v4 = vmul.f32 %v286_v2, %v15_v1  ;;  %v293_v5 = vld [vmem:[%s393_s2] ss:$0 sm:$0xff]  ;;  %v39_v8 = vmul.f32 %v286_v2, %v16_v6  ;;  %v40_v9 = vmul.f32 %v286_v2, %v17_v7  ;;  %v20_v12 = vld [vmem:[%s391_s0 + $0x30] sm:$0xff]  ;;  %v21_v17 = vld [vmem:[%s391_s0 + $0x38] sm:$0xff] }
   0x4   :  { %v18_v10 = vld [vmem:[%s391_s0 + $0x20] sm:$0xff]  ;;  %v42_v16 = vmul.f32 %v286_v2, %v19_v11  ;;  %v43_v20 = vmul.f32 %v286_v2, %v20_v12  ;;  %v44_v21 = vmul.f32 %v286_v2, %v21_v17  ;;  %v23_v27 = vld [vmem:[%s391_s0 + $0x48] sm:$0xff]  ;;  %v24_v32 = vld [vmem:[%s391_s0 + $0x50] sm:$0xff] }
   0x5   :  { %v60_v13 = vadd.f32 %v293_v5, %v37_v3  ;;  %v61_v14 = vadd.f32 %v293_v5, %v38_v4  ;;  %v41_v15 = vmul.f32 %v286_v2, %v18_v10  ;;  %v62_v18 = vadd.f32 %v293_v5, %v39_v8  ;;  %v22_v22 = vld [vmem:[%s391_s0 + $0x40] sm:$0xff]  ;;  %v25_v33 = vld [vmem:[%s391_s0 + $0x58] sm:$0xff]  ;;  %v27_v39 = vld [vmem:[%s391_s0 + $0x68] sm:$0xff] }
   0x6   :  { %v63_v19 = vadd.f32 %v293_v5, %v40_v9  ;;  %v65_v26 = vadd.f32 %v293_v5, %v42_v16  ;;  %v66_v30 = vadd.f32 %v293_v5, %v43_v20  ;;  %v67_v31 = vadd.f32 %v293_v5, %v44_v21  ;;  %v26_v38 = vld [vmem:[%s391_s0 + $0x60] sm:$0xff]  ;;  %v28_v44 = vld [vmem:[%s391_s0 + $0x70] sm:$0xff]  ;;  %v29_v49 = vld [vmem:[%s391_s0 + $0x78] sm:$0xff] }
   0x7   :  { %v76_v23 = vmax.f32 %v60_v13, 0.0  ;;  %v77_v24 = vmax.f32 %v61_v14, 0.0  ;;  %v64_v25 = vadd.f32 %v293_v5, %v41_v15  ;;  %v78_v28 = vmax.f32 %v62_v18, 0.0 }
   0x8   :  { %v79_v29 = vmax.f32 %v63_v19, 0.0  ;;  %v81_v36 = vmax.f32 %v65_v26, 0.0  ;;  %v45_v37 = vmul.f32 %v286_v2, %v22_v22  ;;  %v82_v41 = vmax.f32 %v66_v30, 0.0 }
   0x9   :  { %v213_v34 = vpack.c.bf16 %v77_v24, %v76_v23  ;;  %v80_v35 = vmax.f32 %v64_v25, 0.0  ;;  %v83_v42 = vmax.f32 %v67_v31, 0.0  ;;  %v46_v43 = vmul.f32 %v286_v2, %v23_v27 }
   0xa   :  { %v218_v40 = vpack.c.bf16 %v79_v29, %v78_v28  ;;  %v68_v46 = vadd.f32 %v293_v5, %v45_v37  ;;  %v47_v47 = vmul.f32 %v286_v2, %v24_v32  ;;  %v48_v48 = vmul.f32 %v286_v2, %v25_v33 }
   0xb   :  { %214 = vst [vmem:[%s394_s3] sm:$0xff] %v213_v34   ;;  %v223_v45 = vpack.c.bf16 %v81_v36, %v80_v35  ;;  %v228_v50 = vpack.c.bf16 %v83_v42, %v82_v41  ;;  %v69_v51 = vadd.f32 %v293_v5, %v46_v43  ;;  %v49_v52 = vmul.f32 %v286_v2, %v26_v38 }
   0xc   :  { %250 = vst [vmem:[%s394_s3 + $0x8] sm:$0xff] %v218_v40   ;;  %v50_v53 = vmul.f32 %v286_v2, %v27_v39  ;;  %v84_v54 = vmax.f32 %v68_v46, 0.0  ;;  %v70_v55 = vadd.f32 %v293_v5, %v47_v47  ;;  %v71_v56 = vadd.f32 %v293_v5, %v48_v48 }
   0xd   :  { %251 = vst [vmem:[%s394_s3 + $0x10] sm:$0xff] %v223_v45   ;;  %v51_v57 = vmul.f32 %v286_v2, %v28_v44  ;;  %252 = vst [vmem:[%s394_s3 + $0x18] sm:$0xff] %v228_v50   ;;  %v85_v58 = vmax.f32 %v69_v51, 0.0  ;;  %v72_v59 = vadd.f32 %v293_v5, %v49_v52  ;;  %v52_v61 = vmul.f32 %v286_v2, %v29_v49 }
   0xe   :  { %v73_v60 = vadd.f32 %v293_v5, %v50_v53  ;;  %v86_v62 = vmax.f32 %v70_v55, 0.0  ;;  %v87_v63 = vmax.f32 %v71_v56, 0.0 }
   0xf   :  { %v74_v0 = vadd.f32 %v293_v5, %v51_v57  ;;  %v233_v1 = vpack.c.bf16 %v85_v58, %v84_v54  ;;  %v88_v3 = vmax.f32 %v72_v59, 0.0  ;;  %v75_v6 = vadd.f32 %v293_v5, %v52_v61 }
  0x10   :  { %v89_v4 = vmax.f32 %v73_v60, 0.0  ;;  %v238_v7 = vpack.c.bf16 %v87_v63, %v86_v62 }
  0x11   :  { %v90_v8 = vmax.f32 %v74_v0, 0.0  ;;  %253 = vst [vmem:[%s394_s3 + $0x20] sm:$0xff] %v233_v1   ;;  %v91_v10 = vmax.f32 %v75_v6, 0.0 }
  0x12   :  { %v243_v9 = vpack.c.bf16 %v89_v4, %v88_v3  ;;  %254 = vst [vmem:[%s394_s3 + $0x28] sm:$0xff] %v238_v7  }
  0x13   :  { %v248_v2 = vpack.c.bf16 %v91_v10, %v90_v8 }
  0x14   :  { %255 = vst [vmem:[%s394_s3 + $0x30] sm:$0xff] %v243_v9  }
  0x15   :  { %256 = vst [vmem:[%s394_s3 + $0x38] sm:$0xff] %v248_v2  }

// kernel: _forward.9
= control target key start
LH: loop header
LB: loop body
LE: loop exit
PB: predicated region body
PF: predicated region fallthrough
CT: control target
= control target key end

     0   :  { %10 = vsyncpa [#allocation3], 0  ;;  %s1886_s15 = smov [#allocation2]   ;;  %s2368_s0 = inlined_call_operand.vmem [shape: bf16[128,1024], index: 0, kind: input, shape index: {}]   ;;  %s2369_s1 = inlined_call_operand.hbm [shape: bf16[1024,128], index: 1, kind: input, shape index: {}]   ;;  %s2370_s2 = inlined_call_operand.vmem [shape: f32[128,128], index: 2, kind: output, shape index: {0}]   ;;  %s2371_s3 = inlined_call_operand.vmem [shape: f32[1,128], index: 3, kind: output, shape index: {1}]   ;;  %s2372_s4 = inlined_call_operand.vmem [shape: f32[1,128], index: 4, kind: output, shape index: {2}]  }
   0x1   :  { %s18_s16 = sshll.u32 %s1886_s15, 4  ;;  %s19_s16 = int_to_ptr.vmem [resolvable:$true] %s18_s16 }
   0x2   :  { %s1872_s17 = scalar_lea.vmem %s19_s16, 8192  ;;  %p1877_p1 = scmp.lt.s32.totalorder %s19_s16, %s19_s16 }
   0x3   :  { %p1873_p0 = scmp.ne.s32.totalorder %s19_s16, %s1872_s17  ;;  %p1878_p2 = scmp.lt.s32.totalorder %s1872_s17, %s1872_s17 }
   0x5   :  { %p1879_p3 = por %p1878_p2, %p1877_p1 }
   0x7   :  { %p1880_p4 = pnand %p1879_p3, %p1873_p0 }
   0x9   :  { %1883 = shalt.err (!%p1880_p4)
}
   0xa   :  { %s1887_s18 = smov 64   ;;  %s1888_s19 = smov 4  }
   0xb   :  { %24 = dma.hbm_to_vmem [thread:$0]  %s2369_s1, 8192, %s19_s16, [#allocation3], %s1887_s18, %s1887_s18, %s1888_s19  }
   0xc   :  { %1884 = dma.done.wait [#allocation3], 8192  }
   0xd   :  { %1885 = vsyncadd [#allocation3], 4294959104  ;;  %v1800_v0 = vld [vmem:[#allocation2 + $0x78] sm:$0xff]   ;;  %v1804_v4 = vld [vmem:[#allocation2 + $0x70] sm:$0xff]  }
   0xe   :  { %v1801_v1 = vld [vmem:[#allocation2 + $0xf8] sm:$0xff]   ;;  %1540 = vmatprep.subr.bf16.mxu0 %v1800_v0  ;;  %v1805_v5 = vld [vmem:[#allocation2 + $0xf0] sm:$0xff]   ;;  %v1808_v8 = vld [vmem:[#allocation2 + $0x68] sm:$0xff]  }
   0xf   :  { %v1802_v2 = vld [vmem:[#allocation2 + $0x38] sm:$0xff]   ;;  %1604 = vmatprep.subr.bf16.mxu1 %v1801_v1  ;;  %v1806_v6 = vld [vmem:[#allocation2 + $0x30] sm:$0xff]   ;;  %v1809_v9 = vld [vmem:[#allocation2 + $0xe8] sm:$0xff]  }
  0x10   :  { %v1803_v3 = vld [vmem:[#allocation2 + $0xb8] sm:$0xff]   ;;  %1541 = vmatpush3.bf16.msra.mxu0 %v1802_v2  ;;  %v1807_v7 = vld [vmem:[#allocation2 + $0xb0] sm:$0xff]   ;;  %v1810_v10 = vld [vmem:[#allocation2 + $0x28] sm:$0xff]  }
  0x11   :  { %1605 = vmatpush3.bf16.msra.mxu1 %v1803_v3  ;;  %1542 = vmatprep.subr.bf16.mxu0 %v1804_v4  ;;  %v1811_v11 = vld [vmem:[#allocation2 + $0xa8] sm:$0xff]   ;;  %v1812_v12 = vld [vmem:[#allocation2 + $0x60] sm:$0xff]   ;;  %v1816_v16 = vld [vmem:[#allocation2 + $0x58] sm:$0xff]  }
  0x12   :  { %1606 = vmatprep.subr.bf16.mxu1 %v1805_v5  ;;  %v1813_v13 = vld [vmem:[#allocation2 + $0xe0] sm:$0xff]   ;;  %v1817_v17 = vld [vmem:[#allocation2 + $0xd8] sm:$0xff]   ;;  %v1820_v20 = vld [vmem:[#allocation2 + $0x50] sm:$0xff]  }
  0x13   :  { %v1814_v14 = vld [vmem:[#allocation2 + $0x20] sm:$0xff]   ;;  %v1818_v18 = vld [vmem:[#allocation2 + $0x18] sm:$0xff]   ;;  %v1821_v21 = vld [vmem:[#allocation2 + $0xd0] sm:$0xff]  }
  0x14   :  { %1543 = vmatpush3.bf16.msra.mxu0 %v1806_v6  ;;  %v1815_v15 = vld [vmem:[#allocation2 + $0xa0] sm:$0xff]   ;;  %v1819_v19 = vld [vmem:[#allocation2 + $0x98] sm:$0xff]   ;;  %v1822_v22 = vld [vmem:[#allocation2 + $0x10] sm:$0xff]  }
  0x15   :  { %1607 = vmatpush3.bf16.msra.mxu1 %v1807_v7  ;;  %1544 = vmatprep.subr.bf16.mxu0 %v1808_v8  ;;  %v1823_v23 = vld [vmem:[#allocation2 + $0x90] sm:$0xff]   ;;  %v1824_v24 = vld [vmem:[#allocation2 + $0x48] sm:$0xff]   ;;  %v1828_v28 = vld [vmem:[#allocation2 + $0x40] sm:$0xff]  }
  0x16   :  { %1608 = vmatprep.subr.bf16.mxu1 %v1809_v9  ;;  %v1825_v25 = vld [vmem:[#allocation2 + $0xc8] sm:$0xff]   ;;  %v1829_v29 = vld [vmem:[#allocation2 + $0xc0] sm:$0xff]   ;;  %v1832_v40 = vld [vmem:[#allocation2 + $0x178] sm:$0xff]  }
  0x17   :  { %v1826_v26 = vld [vmem:[#allocation2 + $0x8] sm:$0xff]   ;;  %v1830_v30 = vld [vmem:[#allocation2] sm:$0xff]   ;;  %v1833_v41 = vld [vmem:[#allocation2 + $0x138] sm:$0xff]  }
  0x18   :  { %1545 = vmatpush3.bf16.msra.mxu0 %v1810_v10  ;;  %v1827_v27 = vld [vmem:[#allocation2 + $0x88] sm:$0xff]   ;;  %v1831_v31 = vld [vmem:[#allocation2 + $0x80] sm:$0xff]   ;;  %v1834_v42 = vld [vmem:[#allocation2 + $0x1f8] sm:$0xff]  }
  0x19   :  { %1609 = vmatpush3.bf16.msra.mxu1 %v1811_v11  ;;  %1546 = vmatprep.subr.bf16.mxu0 %v1812_v12  ;;  %v35_v32 = vld [vmem:[%s2368_s0] sm:$0xff]  ;;  %v36_v34 = vld [vmem:[%s2368_s0 + $0x8] sm:$0xff]  ;;  %v1835_v43 = vld [vmem:[#allocation2 + $0x1b8] sm:$0xff]  }
  0x1a   :  { %1610 = vmatprep.subr.bf16.mxu1 %v1813_v13  ;;  %v39_v33 = vld [vmem:[%s2368_s0 + $0x20] sm:$0xff]  ;;  %v40_v37 = vld [vmem:[%s2368_s0 + $0x28] sm:$0xff]  ;;  %v1836_v50 = vld [vmem:[#allocation2 + $0x170] sm:$0xff]  }
  0x1b   :  { %v1412_v35 = vcombine.low %v35_v32, %v39_v33  ;;  %v1413_v36 = vcombine.high %v35_v32, %v39_v33  ;;  %v1414_v38 = vcombine.low %v36_v34, %v40_v37  ;;  %v1415_v39 = vcombine.high %v36_v34, %v40_v37  ;;  %v43_v44 = vld [vmem:[%s2368_s0 + $0x40] sm:$0xff]  ;;  %v44_v47 = vld [vmem:[%s2368_s0 + $0x48] sm:$0xff]  ;;  %v1837_v52 = vld [vmem:[#allocation2 + $0x130] sm:$0xff]  }
  0x1c   :  { %1547 = vmatpush3.bf16.msra.mxu0 %v1814_v14  ;;  %v47_v45 = vld [vmem:[%s2368_s0 + $0x60] sm:$0xff]  ;;  %v48_v48 = vld [vmem:[%s2368_s0 + $0x68] sm:$0xff]  ;;  %v1838_v54 = vld [vmem:[#allocation2 + $0x1f0] sm:$0xff]  }
  0x1d   :  { %1611 = vmatpush3.bf16.msra.mxu1 %v1815_v15  ;;  %1548 = vmatprep.subr.bf16.mxu0 %v1816_v16  ;;  %v1421_v46 = vcombine.high %v43_v44, %v47_v45  ;;  %v1423_v49 = vcombine.high %v44_v47, %v48_v48  ;;  %v1420_v51 = vcombine.low %v43_v44, %v47_v45  ;;  %v1839_v55 = vld [vmem:[#allocation2 + $0x1b0] sm:$0xff]   ;;  %v51_v56 = vld [vmem:[%s2368_s0 + $0x80] sm:$0xff]  ;;  %v52_v58 = vld [vmem:[%s2368_s0 + $0x88] sm:$0xff] }
  0x1e   :  { %1612 = vmatprep.subr.bf16.mxu1 %v1817_v17  ;;  %963 = vmatprep.mubr.bf16.mxu0 %v1413_v36  ;;  %v1422_v53 = vcombine.low %v44_v47, %v48_v48  ;;  %v55_v57 = vld [vmem:[%s2368_s0 + $0xa0] sm:$0xff]  ;;  %v56_v59 = vld [vmem:[%s2368_s0 + $0xa8] sm:$0xff]  ;;  %v1854_v32 = vld [vmem:[#allocation2 + $0x1d0] sm:$0xff]  }
  0x1f   :  { %1060 = vmatprep.mubr.bf16.mxu1 %v1415_v39  ;;  %v1429_v60 = vcombine.high %v51_v56, %v55_v57  ;;  %v1431_v61 = vcombine.high %v52_v58, %v56_v59  ;;  %v1840_v62 = vld [vmem:[#allocation2 + $0x168] sm:$0xff]   ;;  %v1428_v2 = vcombine.low %v51_v56, %v55_v57  ;;  %v59_v3 = vld [vmem:[%s2368_s0 + $0xc0] sm:$0xff]  ;;  %v1430_v6 = vcombine.low %v52_v58, %v56_v59  ;;  %v1855_v33 = vld [vmem:[#allocation2 + $0x190] sm:$0xff]  }
  0x20   :  { %1549 = vmatpush3.bf16.msra.mxu0 %v1818_v18  ;;  %v1841_v63 = vld [vmem:[#allocation2 + $0x128] sm:$0xff]   ;;  %v63_v4 = vld [vmem:[%s2368_s0 + $0xe0] sm:$0xff]  ;;  %v1848_v18 = vld [vmem:[#allocation2 + $0x158] sm:$0xff]  }
  0x21   :  { %1613 = vmatpush3.bf16.msra.mxu1 %v1819_v19  ;;  %1550 = vmatprep.subr.bf16.mxu0 %v1820_v20  ;;  %v1842_v0 = vld [vmem:[#allocation2 + $0x1e8] sm:$0xff]   ;;  %v1437_v7 = vcombine.high %v59_v3, %v63_v4  ;;  %v1844_v10 = vld [vmem:[#allocation2 + $0x160] sm:$0xff]   ;;  %v1436_v19 = vcombine.low %v59_v3, %v63_v4  ;;  %v1849_v20 = vld [vmem:[#allocation2 + $0x118] sm:$0xff]  }
  0x22   :  { %1614 = vmatprep.subr.bf16.mxu1 %v1821_v21  ;;  %v1843_v1 = vld [vmem:[#allocation2 + $0x1a8] sm:$0xff]   ;;  %v1845_v11 = vld [vmem:[#allocation2 + $0x120] sm:$0xff]  }
  0x23   :  { %v60_v5 = vld [vmem:[%s2368_s0 + $0xc8] sm:$0xff]  ;;  %v1846_v12 = vld [vmem:[#allocation2 + $0x1e0] sm:$0xff]  }
  0x24   :  { %1551 = vmatpush3.bf16.msra.mxu0 %v1822_v22  ;;  %v64_v8 = vld [vmem:[%s2368_s0 + $0xe8] sm:$0xff]  ;;  %v1847_v13 = vld [vmem:[#allocation2 + $0x1a0] sm:$0xff]  }
  0x25   :  { %1615 = vmatpush3.bf16.msra.mxu1 %v1823_v23  ;;  %1552 = vmatprep.subr.bf16.mxu0 %v1824_v24  ;;  %v1439_v9 = vcombine.high %v60_v5, %v64_v8  ;;  %v67_v14 = vld [vmem:[%s2368_s0 + $0x100] sm:$0xff]  ;;  %v68_v16 = vld [vmem:[%s2368_s0 + $0x108] sm:$0xff]  ;;  %v1438_v21 = vcombine.low %v60_v5, %v64_v8  ;;  %v1850_v23 = vld [vmem:[#allocation2 + $0x1d8] sm:$0xff]  }
  0x26   :  { %1616 = vmatprep.subr.bf16.mxu1 %v1825_v25  ;;  %v71_v15 = vld [vmem:[%s2368_s0 + $0x120] sm:$0xff]  ;;  %v72_v17 = vld [vmem:[%s2368_s0 + $0x128] sm:$0xff]  ;;  %v1851_v25 = vld [vmem:[#allocation2 + $0x198] sm:$0xff]  }
  0x27   :  { %v1445_v22 = vcombine.high %v67_v14, %v71_v15  ;;  %v1447_v24 = vcombine.high %v68_v16, %v72_v17  ;;  %v1444_v34 = vcombine.low %v67_v14, %v71_v15  ;;  %v1857_v39 = vld [vmem:[#allocation2 + $0x108] sm:$0xff]   ;;  %v1861_v48 = vld [vmem:[#allocation2 + $0x100] sm:$0xff]   ;;  %v46_v8 = vld [vmem:[%s2368_s0 + $0x58] sm:$0xff] }
  0x28   :  { %1553 = vmatpush3.bf16.msra.mxu0 %v1826_v26  ;;  %v75_v26 = vld [vmem:[%s2368_s0 + $0x140] sm:$0xff]  ;;  %v84_v44 = vld [vmem:[%s2368_s0 + $0x188] sm:$0xff]  ;;  %v53_v14 = vld [vmem:[%s2368_s0 + $0x90] sm:$0xff] }
  0x29   :  { %1617 = vmatpush3.bf16.msra.mxu1 %v1827_v27  ;;  %1554 = vmatprep.subr.bf16.mxu0 %v1828_v28  ;;  %v79_v27 = vld [vmem:[%s2368_s0 + $0x160] sm:$0xff]  ;;  %v1852_v28 = vld [vmem:[#allocation2 + $0x150] sm:$0xff]   ;;  %v88_v45 = vld [vmem:[%s2368_s0 + $0x1a8] sm:$0xff] }
  0x2a   :  { %1618 = vmatprep.subr.bf16.mxu1 %v1829_v29  ;;  %v76_v29 = vld [vmem:[%s2368_s0 + $0x148] sm:$0xff]  ;;  %v1453_v36 = vcombine.high %v75_v26, %v79_v27  ;;  %v1452_v47 = vcombine.low %v75_v26, %v79_v27  ;;  %v1462_v59 = vcombine.low %v84_v44, %v88_v45  ;;  %v57_v15 = vld [vmem:[%s2368_s0 + $0xb0] sm:$0xff] }
  0x2b   :  { %v92_v56 = vld [vmem:[%s2368_s0 + $0x1c8] sm:$0xff]  ;;  %v1432_v26 = vcombine.low %v53_v14, %v57_v15 }
  0x2c   :  { %1555 = vmatpush3.bf16.msra.mxu0 %v1830_v30  ;;  %v80_v30 = vld [vmem:[%s2368_s0 + $0x168] sm:$0xff] }
  0x2d   :  { %1619 = vmatpush3.bf16.msra.mxu1 %v1831_v31  ;;  %1668 = vmatprep.subr.bf16.mxu0 %v1832_v40  ;;  %v1853_v31 = vld [vmem:[#allocation2 + $0x110] sm:$0xff]   ;;  %v1455_v37 = vcombine.high %v76_v29, %v80_v30  ;;  %v1858_v40 = vld [vmem:[#allocation2 + $0x1c8] sm:$0xff]  }
  0x2e   :  { %1732 = vmatprep.subr.bf16.mxu1 %v1834_v42  ;;  %v87_v42 = vld [vmem:[%s2368_s0 + $0x1a0] sm:$0xff]  ;;  %v96_v57 = vld [vmem:[%s2368_s0 + $0x1e8] sm:$0xff] }
  0x2f   :  { %964 = vmatmul.mubr.bf16.vlgmr.msra.gmra.mxu0 %v1412_v35  ;;  %v1446_v35 = vcombine.low %v68_v16, %v72_v17  ;;  %v1470_v3 = vcombine.low %v92_v56, %v96_v57  ;;  %v54_v16 = vld [vmem:[%s2368_s0 + $0x98] sm:$0xff] }
  0x30   :  { %1061 = vmatmul.mubr.bf16.vlgmr.msra.gmra.mxu1 %v1414_v38  ;;  %1669 = vmatpush3.bf16.msra.mxu0 %v1833_v41  ;;  %v1856_v38 = vld [vmem:[#allocation2 + $0x148] sm:$0xff]   ;;  %v83_v41 = vld [vmem:[%s2368_s0 + $0x180] sm:$0xff]  ;;  %v58_v17 = vld [vmem:[%s2368_s0 + $0xb8] sm:$0xff] }
  0x31   :  { %1733 = vmatpush3.bf16.msra.mxu1 %v1835_v43  ;;  %971 = vmatprep.mubr.bf16.mxu0 %v1421_v46  ;;  %v1859_v43 = vld [vmem:[#allocation2 + $0x188] sm:$0xff]   ;;  %v1860_v46 = vld [vmem:[#allocation2 + $0x140] sm:$0xff]   ;;  %v1460_v58 = vcombine.low %v83_v41, %v87_v42  ;;  %v1434_v27 = vcombine.low %v54_v16, %v58_v17 }
  0x32   :  { %1068 = vmatprep.mubr.bf16.mxu1 %v1423_v49  ;;  %1670 = vmatprep.subr.bf16.mxu0 %v1836_v50  ;;  %v1454_v49 = vcombine.low %v76_v29, %v80_v30  ;;  %v1461_v50 = vcombine.high %v83_v41, %v87_v42  ;;  %v69_v30 = vld [vmem:[%s2368_s0 + $0x110] sm:$0xff]  ;;  %v82_v41 = vld [vmem:[%s2368_s0 + $0x178] sm:$0xff] }
  0x33   :  { %1734 = vmatprep.subr.bf16.mxu1 %v1838_v54  ;;  %v91_v54 = vld [vmem:[%s2368_s0 + $0x1c0] sm:$0xff] }
  0x34   :  { %1671 = vmatpush3.bf16.msra.mxu0 %v1837_v52  ;;  %v1463_v52 = vcombine.high %v84_v44, %v88_v45 }
  0x35   :  { %1735 = vmatpush3.bf16.msra.mxu1 %v1839_v55  ;;  %1672 = vmatprep.subr.bf16.mxu0 %v1840_v62  ;;  %v95_v55 = vld [vmem:[%s2368_s0 + $0x1e0] sm:$0xff]  ;;  %v37_v62 = vld [vmem:[%s2368_s0 + $0x10] sm:$0xff] }
  0x36   :  { %1736 = vmatprep.subr.bf16.mxu1 %v1842_v0  ;;  %v38_v0 = vld [vmem:[%s2368_s0 + $0x18] sm:$0xff] }
  0x37   :  { %972 = vmatmul.mubr.bf16.gmra.mxu0 %v1420_v51  ;;  %v1862_v51 = vld [vmem:[#allocation2 + $0x1c0] sm:$0xff]  }
  0x38   :  { %1069 = vmatmul.mubr.bf16.gmra.mxu1 %v1422_v53  ;;  %979 = vmatprep.mubr.bf16.mxu0 %v1429_v60  ;;  %v1863_v53 = vld [vmem:[#allocation2 + $0x180] sm:$0xff]   ;;  %v1469_v60 = vcombine.high %v91_v54, %v95_v55 }
  0x39   :  { %1076 = vmatprep.mubr.bf16.mxu1 %v1431_v61  ;;  %1673 = vmatpush3.bf16.msra.mxu0 %v1841_v63  ;;  %v1471_v61 = vcombine.high %v92_v56, %v96_v57  ;;  %v41_v63 = vld [vmem:[%s2368_s0 + $0x30] sm:$0xff]  ;;  %v94_v56 = vld [vmem:[%s2368_s0 + $0x1d8] sm:$0xff] }
  0x3a   :  { %1737 = vmatpush3.bf16.msra.mxu1 %v1843_v1  ;;  %1674 = vmatprep.subr.bf16.mxu0 %v1844_v10  ;;  %v42_v1 = vld [vmem:[%s2368_s0 + $0x38] sm:$0xff]  ;;  %v1417_v4 = vcombine.high %v37_v62, %v41_v63  ;;  %v1416_v10 = vcombine.low %v37_v62, %v41_v63 }
  0x3b   :  { %1738 = vmatprep.subr.bf16.mxu1 %v1846_v12  ;;  %v1419_v5 = vcombine.high %v38_v0, %v42_v1  ;;  %v98_v57 = vld [vmem:[%s2368_s0 + $0x1f8] sm:$0xff] }
  0x3c   :  { %v1474_v63 = vcombine.low %v94_v56, %v98_v57 }
  0x3d   :  { %1675 = vmatpush3.bf16.msra.mxu0 %v1845_v11  ;;  %v1418_v11 = vcombine.low %v38_v0, %v42_v1 }
  0x3e   :  { %1739 = vmatpush3.bf16.msra.mxu1 %v1847_v13  ;;  %1676 = vmatprep.subr.bf16.mxu0 %v1848_v18 }
  0x3f   :  { %980 = vmatmul.mubr.bf16.gmra.mxu0 %v1428_v2  ;;  %1740 = vmatprep.subr.bf16.mxu1 %v1850_v23  ;;  %v1468_v2 = vcombine.low %v91_v54, %v95_v55  ;;  %v65_v23 = vld [vmem:[%s2368_s0 + $0xf0] sm:$0xff] }
  0x40   :  { %1077 = vmatmul.mubr.bf16.gmra.mxu1 %v1430_v6  ;;  %987 = vmatprep.mubr.bf16.mxu0 %v1437_v7  ;;  %v45_v6 = vld [vmem:[%s2368_s0 + $0x50] sm:$0xff] }
  0x41   :  { %1084 = vmatprep.mubr.bf16.mxu1 %v1439_v9  ;;  %1677 = vmatpush3.bf16.msra.mxu0 %v1849_v20  ;;  %v49_v7 = vld [vmem:[%s2368_s0 + $0x70] sm:$0xff]  ;;  %v50_v9 = vld [vmem:[%s2368_s0 + $0x78] sm:$0xff]  ;;  %v1433_v20 = vcombine.high %v53_v14, %v57_v15 }
  0x42   :  { %1741 = vmatpush3.bf16.msra.mxu1 %v1851_v25  ;;  %1678 = vmatprep.subr.bf16.mxu0 %v1852_v28  ;;  %v1425_v12 = vcombine.high %v45_v6, %v49_v7  ;;  %v1427_v13 = vcombine.high %v46_v8, %v50_v9  ;;  %v1424_v18 = vcombine.low %v45_v6, %v49_v7  ;;  %v66_v25 = vld [vmem:[%s2368_s0 + $0xf8] sm:$0xff]  ;;  %v93_v54 = vld [vmem:[%s2368_s0 + $0x1d0] sm:$0xff] }
  0x43   :  { %1742 = vmatprep.subr.bf16.mxu1 %v1854_v32  ;;  %v70_v32 = vld [vmem:[%s2368_s0 + $0x118] sm:$0xff]  ;;  %v97_v55 = vld [vmem:[%s2368_s0 + $0x1f0] sm:$0xff] }
  0x44   :  { %v1472_v62 = vcombine.low %v93_v54, %v97_v55 }
  0x45   :  { %1679 = vmatpush3.bf16.msra.mxu0 %v1853_v31  ;;  %v73_v31 = vld [vmem:[%s2368_s0 + $0x130] sm:$0xff] }
  0x46   :  { %1743 = vmatpush3.bf16.msra.mxu1 %v1855_v33  ;;  %1680 = vmatprep.subr.bf16.mxu0 %v1856_v38  ;;  %v74_v33 = vld [vmem:[%s2368_s0 + $0x138] sm:$0xff]  ;;  %v77_v38 = vld [vmem:[%s2368_s0 + $0x150] sm:$0xff]  ;;  %v1448_v42 = vcombine.low %v69_v30, %v73_v31 }
  0x47   :  { %988 = vmatmul.mubr.bf16.gmra.mxu0 %v1436_v19  ;;  %1744 = vmatprep.subr.bf16.mxu1 %v1858_v40  ;;  %v1426_v19 = vcombine.low %v46_v8, %v50_v9  ;;  %v78_v40 = vld [vmem:[%s2368_s0 + $0x158] sm:$0xff] }
  0x48   :  { %1085 = vmatmul.mubr.bf16.gmra.mxu1 %v1438_v21  ;;  %995 = vmatprep.mubr.bf16.mxu0 %v1445_v22  ;;  %v1435_v21 = vcombine.high %v54_v16, %v58_v17  ;;  %v61_v22 = vld [vmem:[%s2368_s0 + $0xd0] sm:$0xff]  ;;  %v1459_v45 = vcombine.high %v78_v40, %v82_v41 }
  0x49   :  { %1092 = vmatprep.mubr.bf16.mxu1 %v1447_v24  ;;  %1681 = vmatpush3.bf16.msra.mxu0 %v1857_v39  ;;  %v62_v24 = vld [vmem:[%s2368_s0 + $0xd8] sm:$0xff]  ;;  %v1441_v28 = vcombine.high %v61_v22, %v65_v23  ;;  %v81_v39 = vld [vmem:[%s2368_s0 + $0x170] sm:$0xff] }
  0x4a   :  { %1745 = vmatpush3.bf16.msra.mxu1 %v1859_v43  ;;  %1682 = vmatprep.subr.bf16.mxu0 %v1860_v46  ;;  %v1443_v29 = vcombine.high %v62_v24, %v66_v25  ;;  %v1450_v43 = vcombine.low %v70_v32, %v74_v33  ;;  %v1457_v44 = vcombine.high %v77_v38, %v81_v39  ;;  %v85_v46 = vld [vmem:[%s2368_s0 + $0x190] sm:$0xff] }
  0x4b   :  { %1746 = vmatprep.subr.bf16.mxu1 %v1862_v51  ;;  %v1458_v51 = vcombine.low %v78_v40, %v82_v41 }
  0x4d   :  { %1683 = vmatpush3.bf16.msra.mxu0 %v1861_v48  ;;  %v86_v48 = vld [vmem:[%s2368_s0 + $0x198] sm:$0xff] }
  0x4e   :  { %1747 = vmatpush3.bf16.msra.mxu1 %v1863_v53 }
  0x4f   :  { %996 = vmatmul.mubr.bf16.gmra.mxu0 %v1444_v34  ;;  %v1440_v34 = vcombine.low %v61_v22, %v65_v23 }
  0x50   :  { %1093 = vmatmul.mubr.bf16.gmra.mxu1 %v1446_v35  ;;  %1003 = vmatprep.mubr.bf16.mxu0 %v1453_v36  ;;  %v1442_v35 = vcombine.low %v62_v24, %v66_v25  ;;  %v1449_v36 = vcombine.high %v69_v30, %v73_v31 }
  0x51   :  { %1100 = vmatprep.mubr.bf16.mxu1 %v1455_v37  ;;  %v1451_v37 = vcombine.high %v70_v32, %v74_v33 }
  0x57   :  { %1004 = vmatmul.mubr.bf16.gmra.mxu0 %v1452_v47  ;;  %v89_v47 = vld [vmem:[%s2368_s0 + $0x1b0] sm:$0xff] }
  0x58   :  { %1101 = vmatmul.mubr.bf16.gmra.mxu1 %v1454_v49  ;;  %1011 = vmatprep.mubr.bf16.mxu0 %v1461_v50  ;;  %v90_v49 = vld [vmem:[%s2368_s0 + $0x1b8] sm:$0xff]  ;;  %v1456_v50 = vcombine.low %v77_v38, %v81_v39 }
  0x59   :  { %1108 = vmatprep.mubr.bf16.mxu1 %v1463_v52  ;;  %v1465_v52 = vcombine.high %v85_v46, %v89_v47  ;;  %v1467_v53 = vcombine.high %v86_v48, %v90_v49 }
  0x5f   :  { %1012 = vmatmul.mubr.bf16.gmra.mxu0 %v1460_v58  ;;  %v1464_v58 = vcombine.low %v85_v46, %v89_v47 }
  0x60   :  { %1109 = vmatmul.mubr.bf16.gmra.mxu1 %v1462_v59  ;;  %1019 = vmatprep.mubr.bf16.mxu0 %v1469_v60  ;;  %v1466_v59 = vcombine.low %v86_v48, %v90_v49  ;;  %v1473_v60 = vcombine.high %v93_v54, %v97_v55 }
  0x61   :  { %1116 = vmatprep.mubr.bf16.mxu1 %v1471_v61  ;;  %v1475_v61 = vcombine.high %v94_v56, %v98_v57 }
  0x67   :  { %1020 = vmatmul.mubr.bf16.gmra.mxu0 %v1468_v2 }
  0x68   :  { %1117 = vmatmul.mubr.bf16.gmra.mxu1 %v1470_v3  ;;  %1157 = vmatprep.mubr.bf16.mxu0 %v1417_v4 }
  0x69   :  { %1254 = vmatprep.mubr.bf16.mxu1 %v1419_v5  ;;  %v1889_v5 = vmov 0.0  }
  0x6a   :  { %33 = vst [vmem:[%s2371_s3] sm:$0x1] %v1889_v5  ;;  %34 = vst [vmem:[%s2372_s4] sm:$0x1] %v1889_v5 }
  0x6f   :  { %1158 = vmatmul.mubr.bf16.vlgmr.msra.gmra.mxu0 %v1416_v10 }
  0x70   :  { %1255 = vmatmul.mubr.bf16.vlgmr.msra.gmra.mxu1 %v1418_v11  ;;  %1165 = vmatprep.mubr.bf16.mxu0 %v1425_v12 }
  0x71   :  { %1262 = vmatprep.mubr.bf16.mxu1 %v1427_v13 }
  0x77   :  { %1166 = vmatmul.mubr.bf16.gmra.mxu0 %v1424_v18 }
  0x78   :  { %1263 = vmatmul.mubr.bf16.gmra.mxu1 %v1426_v19  ;;  %1173 = vmatprep.mubr.bf16.mxu0 %v1433_v20 }
  0x79   :  { %1270 = vmatprep.mubr.bf16.mxu1 %v1435_v21 }
  0x7f   :  { %1174 = vmatmul.mubr.bf16.gmra.mxu0 %v1432_v26 }
  0x80   :  { %1271 = vmatmul.mubr.bf16.gmra.mxu1 %v1434_v27  ;;  %1181 = vmatprep.mubr.bf16.mxu0 %v1441_v28 }
  0x81   :  { %1278 = vmatprep.mubr.bf16.mxu1 %v1443_v29 }
  0x87   :  { %1182 = vmatmul.mubr.bf16.gmra.mxu0 %v1440_v34 }
  0x88   :  { %1279 = vmatmul.mubr.bf16.gmra.mxu1 %v1442_v35  ;;  %1189 = vmatprep.mubr.bf16.mxu0 %v1449_v36 }
  0x89   :  { %1286 = vmatprep.mubr.bf16.mxu1 %v1451_v37 }
  0x8f   :  { %1190 = vmatmul.mubr.bf16.gmra.mxu0 %v1448_v42 }
  0x90   :  { %1287 = vmatmul.mubr.bf16.gmra.mxu1 %v1450_v43  ;;  %1197 = vmatprep.mubr.bf16.mxu0 %v1457_v44 }
  0x91   :  { %1294 = vmatprep.mubr.bf16.mxu1 %v1459_v45 }
  0x97   :  { %1198 = vmatmul.mubr.bf16.gmra.mxu0 %v1456_v50 }
  0x98   :  { %1295 = vmatmul.mubr.bf16.gmra.mxu1 %v1458_v51  ;;  %1205 = vmatprep.mubr.bf16.mxu0 %v1465_v52 }
  0x99   :  { %1302 = vmatprep.mubr.bf16.mxu1 %v1467_v53 }
  0x9f   :  { %1206 = vmatmul.mubr.bf16.gmra.mxu0 %v1464_v58 }
  0xa0   :  { %1303 = vmatmul.mubr.bf16.gmra.mxu1 %v1466_v59  ;;  %1213 = vmatprep.mubr.bf16.mxu0 %v1473_v60 }
  0xa1   :  { %1310 = vmatprep.mubr.bf16.mxu1 %v1475_v61 }
  0xa7   :  { %1214 = vmatmul.mubr.bf16.gmra.mxu0 %v1472_v62 }
  0xa8   :  { %1311 = vmatmul.mubr.bf16.gmra.mxu1 %v1474_v63 }
  0xef   :  { %v2110_v0 = vpop.f32.mrf.mxu0 }
  0xf0   :  { %v2112_v1 = vpop.f32.mrf.mxu1 }
  0xf1   :  { %v2114_v2 = vpop.f32.mrf.mxu0 }
  0xf2   :  { %v2116_v3 = vpop.f32.mrf.mxu1  ;;  %v1558_v5 = vadd.f32 %v2114_v2, %v2110_v0 }
  0xf3   :  { %v2118_v4 = vpop.f32.mrf.mxu0 }
  0xf4   :  { %v2126_v6 = vpop.f32.mrf.mxu1 }
  0xf5   :  { %v2128_v7 = vpop.f32.mrf.mxu0 }
  0xf6   :  { %v2130_v8 = vpop.f32.mrf.mxu1 }
  0xf7   :  { %v2132_v9 = vpop.f32.mrf.mxu0 }
  0xf8   :  { %v2134_v10 = vpop.f32.mrf.mxu1 }
  0xf9   :  { %v2136_v11 = vpop.f32.mrf.mxu0 }
  0xfa   :  { %v2138_v12 = vpop.f32.mrf.mxu1 }
  0xfb   :  { %v2140_v13 = vpop.f32.mrf.mxu0 }
  0xfc   :  { %v2142_v14 = vpop.f32.mrf.mxu1 }
  0xfd   :  { %v2144_v15 = vpop.f32.mrf.mxu0 }
  0xfe   :  { %v2146_v16 = vpop.f32.mrf.mxu1 }
  0xff   :  { %v2148_v17 = vpop.f32.mrf.mxu0 }
 0x100   :  { %v2150_v18 = vpop.f32.mrf.mxu1 }
 0x101   :  { %v2152_v19 = vpop.f32.mrf.mxu0 }
 0x102   :  { %v2154_v20 = vpop.f32.mrf.mxu1 }
 0x103   :  { %v2156_v21 = vpop.f32.mrf.mxu0 }
 0x104   :  { %v2158_v22 = vpop.f32.mrf.mxu1 }
 0x105   :  { %v2160_v23 = vpop.f32.mrf.mxu0 }
 0x106   :  { %v2162_v24 = vpop.f32.mrf.mxu1 }
 0x107   :  { %v2164_v25 = vpop.f32.mrf.mxu0 }
 0x108   :  { %v2166_v26 = vpop.f32.mrf.mxu1 }
 0x109   :  { %v2168_v27 = vpop.f32.mrf.mxu0 }
 0x10a   :  { %v2170_v28 = vpop.f32.mrf.mxu1 }
 0x10b   :  { %v2172_v29 = vpop.f32.mrf.mxu0 }
 0x10c   :  { %v2174_v30 = vpop.f32.mrf.mxu1 }
 0x10d   :  { %v2176_v31 = vpop.f32.mrf.mxu0 }
 0x10e   :  { %v2178_v32 = vpop.f32.mrf.mxu1 }
 0x10f   :  { %v2180_v33 = vpop.f32.mrf.mxu0 }
 0x110   :  { %v2182_v34 = vpop.f32.mrf.mxu1 }
 0x111   :  { %v2184_v35 = vpop.f32.mrf.mxu0 }
 0x112   :  { %v2186_v36 = vpop.f32.mrf.mxu1 }
 0x113   :  { %v2188_v37 = vpop.f32.mrf.mxu0 }
 0x114   :  { %v2190_v38 = vpop.f32.mrf.mxu1 }
 0x115   :  { %v2192_v39 = vpop.f32.mrf.mxu0 }
 0x116   :  { %v2194_v40 = vpop.f32.mrf.mxu1 }
 0x117   :  { %v2196_v41 = vpop.f32.mrf.mxu0 }
 0x118   :  { %v2198_v42 = vpop.f32.mrf.mxu1 }
 0x119   :  { %v2200_v43 = vpop.f32.mrf.mxu0 }
 0x11a   :  { %v2202_v44 = vpop.f32.mrf.mxu1 }
 0x11b   :  { %v2204_v45 = vpop.f32.mrf.mxu0 }
 0x11c   :  { %v2206_v46 = vpop.f32.mrf.mxu1 }
 0x11d   :  { %v2208_v47 = vpop.f32.mrf.mxu0 }
 0x11e   :  { %v2210_v48 = vpop.f32.mrf.mxu1 }
 0x11f   :  { %v2212_v49 = vpop.f32.mrf.mxu0 }
 0x120   :  { %v2214_v50 = vpop.f32.mrf.mxu1 }
 0x121   :  { %2373 = vst [vmem:[#allocation5_spill] sm:$0xff] %v2214_v50  ;;  %v2216_v51 = vpop.f32.mrf.mxu0 }
 0x122   :  { %v2218_v52 = vpop.f32.mrf.mxu1 }
 0x123   :  { %2374 = vst [vmem:[#allocation6_spill] sm:$0xff] %v2218_v52  ;;  %v2220_v53 = vpop.f32.mrf.mxu0 }
 0x124   :  { %2375 = vst [vmem:[#allocation7_spill] sm:$0xff] %v2220_v53  ;;  %v2222_v54 = vpop.f32.mrf.mxu1 }
 0x125   :  { %2376 = vst [vmem:[#allocation8_spill] sm:$0xff] %v2222_v54  ;;  %v2224_v55 = vpop.f32.mrf.mxu0 }
 0x126   :  { %2377 = vst [vmem:[#allocation9_spill] sm:$0xff] %v2224_v55  ;;  %v2226_v56 = vpop.f32.mrf.mxu1 }
 0x127   :  { %2378 = vst [vmem:[#allocation10_spill] sm:$0xff] %v2226_v56  ;;  %v2228_v57 = vpop.f32.mrf.mxu0  ;;  %v1622_v56 = vadd.f32 %v2116_v3, %v2112_v1  ;;  %v1564_v1 = vadd.f32 %v2136_v11, %v2132_v9  ;;  %v1628_v3 = vadd.f32 %v2138_v12, %v2134_v10  ;;  %v1567_v9 = vadd.f32 %v2144_v15, %v2140_v13 }
 0x128   :  { %2379 = vst [vmem:[#allocation11_spill] sm:$0xff] %v2228_v57  ;;  %v2230_v58 = vpop.f32.mrf.mxu1  ;;  %v1631_v10 = vadd.f32 %v2146_v16, %v2142_v14  ;;  %v1570_v13 = vadd.f32 %v2152_v19, %v2148_v17  ;;  %v1634_v14 = vadd.f32 %v2154_v20, %v2150_v18  ;;  %v1573_v18 = vadd.f32 %v2160_v23, %v2156_v21 }
 0x129   :  { %2380 = vst [vmem:[#allocation12_spill] sm:$0xff] %v2230_v58  ;;  %v2232_v59 = vpop.f32.mrf.mxu0  ;;  %v1637_v20 = vadd.f32 %v2162_v24, %v2158_v22  ;;  %v1576_v21 = vadd.f32 %v2168_v27, %v2164_v25  ;;  %v1640_v22 = vadd.f32 %v2170_v28, %v2166_v26  ;;  %v1579_v26 = vadd.f32 %v2176_v31, %v2172_v29 }
 0x12a   :  { %2381 = vst [vmem:[#allocation13_spill] sm:$0xff] %v2232_v59  ;;  %v2234_v60 = vpop.f32.mrf.mxu1  ;;  %v1063_v59 = vadd.f32 %v1622_v56, %v1558_v5  ;;  %v1074_v16 = vadd.f32 %v1631_v10, %v1567_v9  ;;  %v1079_v17 = vadd.f32 %v1634_v14, %v1570_v13  ;;  %v1643_v28 = vadd.f32 %v2178_v32, %v2174_v30 }
 0x12b   :  { %2382 = vst [vmem:[#allocation14_spill] sm:$0xff] %v2234_v60  ;;  %v2236_v61 = vpop.f32.mrf.mxu0  ;;  %v1561_v60 = vadd.f32 %v2128_v7, %v2118_v4  ;;  %v1082_v24 = vadd.f32 %v1637_v20, %v1573_v18  ;;  %v1087_v25 = vadd.f32 %v1640_v22, %v1576_v21  ;;  %v1582_v29 = vadd.f32 %v2184_v35, %v2180_v33 }
 0x12c   :  { %2383 = vst [vmem:[#allocation15_spill] sm:$0xff] %v2236_v61  ;;  %v2238_v62 = vpop.f32.mrf.mxu1  ;;  %v1646_v30 = vadd.f32 %v2186_v36, %v2182_v34  ;;  %v1090_v32 = vadd.f32 %v1643_v28, %v1579_v26  ;;  %v1585_v34 = vadd.f32 %v2192_v39, %v2188_v37  ;;  %v1649_v36 = vadd.f32 %v2194_v40, %v2190_v38 }
 0x12d   :  { %2384 = vst [vmem:[#allocation16_spill] sm:$0xff] %v2238_v62  ;;  %v2240_v63 = vpop.f32.mrf.mxu0  ;;  %v1625_v62 = vadd.f32 %v2130_v8, %v2126_v6  ;;  %v1588_v37 = vadd.f32 %v2200_v43, %v2196_v41  ;;  %v1652_v38 = vadd.f32 %v2202_v44, %v2198_v42  ;;  %v1591_v42 = vadd.f32 %v2208_v47, %v2204_v45  ;;  %v2387_v47 = vld [vmem:[#allocation5_spill] sm:$0xff] }
 0x12e   :  { %2385 = vst [vmem:[#allocation17_spill] sm:$0xff] %v2240_v63  ;;  %v2246_v54 = vpop.f32.mrf.mxu1  ;;  %v1095_v33 = vadd.f32 %v1646_v30, %v1582_v29  ;;  %v1098_v40 = vadd.f32 %v1649_v36, %v1585_v34  ;;  %v1655_v44 = vadd.f32 %v2210_v48, %v2206_v46  ;;  %v1594_v45 = vadd.f32 %v2216_v51, %v2212_v49  ;;  %v2389_v51 = vld [vmem:[#allocation7_spill] sm:$0xff] }
 0x12f   :  { %2386 = vst [vmem:[#allocation18_spill] sm:$0xff] %v2246_v54  ;;  %v1684_v57 = vpop.f32.mrf.mxu0  ;;  %v1066_v56 = vadd.f32 %v1625_v62, %v1561_v60  ;;  %v1103_v41 = vadd.f32 %v1652_v38, %v1588_v37 }
 0x130   :  { %v1748_v58 = vpop.f32.mrf.mxu1  ;;  %v2395_v38 = vld [vmem:[#allocation12_spill] sm:$0xff] }
 0x131   :  { %v1685_v55 = vpop.f32.mrf.mxu0 }
 0x132   :  { %v1686_v61 = vadd.f32 %v1685_v55, %v1684_v57  ;;  %v1749_v63 = vpop.f32.mrf.mxu1  ;;  %v1071_v57 = vadd.f32 %v1628_v3, %v1564_v1 }
 0x133   :  { %v1687_v53 = vpop.f32.mrf.mxu0  ;;  %v1750_v0 = vadd.f32 %v1749_v63, %v1748_v58 }
 0x134   :  { %v1160_v52 = vadd.f32 %v1686_v61, %v1063_v59  ;;  %v1751_v2 = vpop.f32.mrf.mxu1 }
 0x135   :  { %v1688_v54 = vpop.f32.mrf.mxu0 }
 0x136   :  { %v1257_v5 = vadd.f32 %v1750_v0, %v1160_v52  ;;  %v1689_v50 = vadd.f32 %v1688_v54, %v1687_v53  ;;  %v1752_v4 = vpop.f32.mrf.mxu1 }
 0x137   :  { %v1690_v7 = vpop.f32.mrf.mxu0  ;;  %v1753_v8 = vadd.f32 %v1752_v4, %v1751_v2 }
 0x138   :  { %1319 = vst [vmem:[%s2370_s2] sm:$0xff] %v1257_v5  ;;  %v1163_v6 = vadd.f32 %v1689_v50, %v1066_v56  ;;  %v1754_v55 = vpop.f32.mrf.mxu1  ;;  %v1360_v53 = vmul.f32 %v1257_v5, %v1257_v5 }
 0x139   :  { %v1691_v58 = vpop.f32.mrf.mxu0 }
 0x13a   :  { %v1260_v11 = vadd.f32 %v1753_v8, %v1163_v6  ;;  %v1692_v12 = vadd.f32 %v1691_v58, %v1690_v7  ;;  %v1755_v52 = vpop.f32.mrf.mxu1 }
 0x13b   :  { %v1693_v54 = vpop.f32.mrf.mxu0  ;;  %v1756_v61 = vadd.f32 %v1755_v52, %v1754_v55 }
 0x13c   :  { %1320 = vst [vmem:[%s2370_s2 + $0x8] sm:$0xff] %v1260_v11  ;;  %v1336_v50 = vadd.f32 %v1260_v11, %v1257_v5  ;;  %v1361_v59 = vmul.f32 %v1260_v11, %v1260_v11  ;;  %v1168_v60 = vadd.f32 %v1692_v12, %v1071_v57  ;;  %v1757_v62 = vpop.f32.mrf.mxu1 }
 0x13d   :  { %v1694_v15 = vpop.f32.mrf.mxu0 }
 0x13e   :  { %v1376_v63 = vadd.f32 %v1361_v59, %v1360_v53  ;;  %v1265_v0 = vadd.f32 %v1756_v61, %v1168_v60  ;;  %v1695_v2 = vadd.f32 %v1694_v15, %v1693_v54  ;;  %v1758_v1 = vpop.f32.mrf.mxu1 }
 0x13f   :  { %v1696_v3 = vpop.f32.mrf.mxu0  ;;  %v1759_v7 = vadd.f32 %v1758_v1, %v1757_v62 }
 0x140   :  { %1321 = vst [vmem:[%s2370_s2 + $0x10] sm:$0xff] %v1265_v0  ;;  %v1337_v56 = vadd.f32 %v1336_v50, %v1265_v0  ;;  %v1362_v5 = vmul.f32 %v1265_v0, %v1265_v0  ;;  %v1171_v4 = vadd.f32 %v1695_v2, %v1074_v16  ;;  %v1760_v6 = vpop.f32.mrf.mxu1 }
 0x141   :  { %v1697_v19 = vpop.f32.mrf.mxu0 }
 0x142   :  { %v1377_v8 = vadd.f32 %v1376_v63, %v1362_v5  ;;  %v1268_v55 = vadd.f32 %v1759_v7, %v1171_v4  ;;  %v1698_v57 = vadd.f32 %v1697_v19, %v1696_v3  ;;  %v1761_v58 = vpop.f32.mrf.mxu1 }
 0x143   :  { %v1699_v9 = vpop.f32.mrf.mxu0  ;;  %v1762_v52 = vadd.f32 %v1761_v58, %v1760_v6 }
 0x144   :  { %1322 = vst [vmem:[%s2370_s2 + $0x18] sm:$0xff] %v1268_v55  ;;  %v1338_v10 = vadd.f32 %v1337_v56, %v1268_v55  ;;  %v1363_v11 = vmul.f32 %v1268_v55, %v1268_v55  ;;  %v1176_v12 = vadd.f32 %v1698_v57, %v1079_v17  ;;  %v1763_v53 = vpop.f32.mrf.mxu1 }
 0x145   :  { %v1700_v23 = vpop.f32.mrf.mxu0 }
 0x146   :  { %v1378_v54 = vadd.f32 %v1377_v8, %v1363_v11  ;;  %v1273_v50 = vadd.f32 %v1762_v52, %v1176_v12  ;;  %v1701_v59 = vadd.f32 %v1700_v23, %v1699_v9  ;;  %v1764_v60 = vpop.f32.mrf.mxu1 }
 0x147   :  { %v1702_v61 = vpop.f32.mrf.mxu0  ;;  %v1765_v15 = vadd.f32 %v1764_v60, %v1763_v53 }
 0x148   :  { %1323 = vst [vmem:[%s2370_s2 + $0x20] sm:$0xff] %v1273_v50  ;;  %v1339_v62 = vadd.f32 %v1338_v10, %v1273_v50  ;;  %v1364_v13 = vmul.f32 %v1273_v50, %v1273_v50  ;;  %v1179_v14 = vadd.f32 %v1701_v59, %v1082_v24  ;;  %v1766_v16 = vpop.f32.mrf.mxu1 }
 0x149   :  { %v1703_v27 = vpop.f32.mrf.mxu0 }
 0x14a   :  { %v1379_v63 = vadd.f32 %v1378_v54, %v1364_v13  ;;  %v1276_v0 = vadd.f32 %v1765_v15, %v1179_v14  ;;  %v1704_v2 = vadd.f32 %v1703_v27, %v1702_v61  ;;  %v1767_v1 = vpop.f32.mrf.mxu1 }
 0x14b   :  { %v1705_v3 = vpop.f32.mrf.mxu0  ;;  %v1768_v7 = vadd.f32 %v1767_v1, %v1766_v16 }
 0x14c   :  { %1324 = vst [vmem:[%s2370_s2 + $0x28] sm:$0xff] %v1276_v0  ;;  %v1340_v56 = vadd.f32 %v1339_v62, %v1276_v0  ;;  %v1365_v5 = vmul.f32 %v1276_v0, %v1276_v0  ;;  %v1184_v4 = vadd.f32 %v1704_v2, %v1087_v25  ;;  %v1769_v6 = vpop.f32.mrf.mxu1 }
 0x14d   :  { %v1706_v31 = vpop.f32.mrf.mxu0 }
 0x14e   :  { %v1380_v17 = vadd.f32 %v1379_v63, %v1365_v5  ;;  %v1281_v18 = vadd.f32 %v1768_v7, %v1184_v4  ;;  %v1707_v19 = vadd.f32 %v1706_v31, %v1705_v3  ;;  %v1770_v20 = vpop.f32.mrf.mxu1  ;;  %v2388_v7 = vld [vmem:[#allocation6_spill] sm:$0xff] }
 0x14f   :  { %v1708_v8 = vpop.f32.mrf.mxu0  ;;  %v1771_v9 = vadd.f32 %v1770_v20, %v1769_v6  ;;  %v1658_v46 = vadd.f32 %v2388_v7, %v2387_v47  ;;  %v1106_v6 = vadd.f32 %v1655_v44, %v1591_v42  ;;  %v2397_v44 = vld [vmem:[#allocation15_spill] sm:$0xff] }
 0x150   :  { %1325 = vst [vmem:[%s2370_s2 + $0x30] sm:$0xff] %v1281_v18  ;;  %v1341_v55 = vadd.f32 %v1340_v56, %v1281_v18  ;;  %v1366_v57 = vmul.f32 %v1281_v18, %v1281_v18  ;;  %v1187_v58 = vadd.f32 %v1707_v19, %v1090_v32  ;;  %v1772_v10 = vpop.f32.mrf.mxu1 }
 0x151   :  { %v1709_v35 = vpop.f32.mrf.mxu0  ;;  %v1111_v49 = vadd.f32 %v1658_v46, %v1594_v45 }
 0x152   :  { %v1381_v11 = vadd.f32 %v1380_v17, %v1366_v57  ;;  %v1284_v12 = vadd.f32 %v1771_v9, %v1187_v58  ;;  %v1710_v52 = vadd.f32 %v1709_v35, %v1708_v8  ;;  %v1773_v53 = vpop.f32.mrf.mxu1  ;;  %v2390_v57 = vld [vmem:[#allocation9_spill] sm:$0xff] }
 0x153   :  { %v1711_v21 = vpop.f32.mrf.mxu0  ;;  %v1774_v54 = vadd.f32 %v1773_v53, %v1772_v10  ;;  %v1597_v58 = vadd.f32 %v2390_v57, %v2389_v51  ;;  %v2391_v10 = vld [vmem:[#allocation8_spill] sm:$0xff] }
 0x154   :  { %1326 = vst [vmem:[%s2370_s2 + $0x38] sm:$0xff] %v1284_v12  ;;  %v1342_v22 = vadd.f32 %v1341_v55, %v1284_v12  ;;  %v1367_v23 = vmul.f32 %v1284_v12, %v1284_v12  ;;  %v1192_v24 = vadd.f32 %v1710_v52, %v1095_v33  ;;  %v1775_v50 = vpop.f32.mrf.mxu1  ;;  %v2392_v33 = vld [vmem:[#allocation10_spill] sm:$0xff] }
 0x155   :  { %v1712_v39 = vpop.f32.mrf.mxu0  ;;  %v1661_v34 = vadd.f32 %v2392_v33, %v2391_v10 }
 0x156   :  { %v1382_v59 = vadd.f32 %v1381_v11, %v1367_v23  ;;  %v1289_v60 = vadd.f32 %v1774_v54, %v1192_v24  ;;  %v1713_v61 = vadd.f32 %v1712_v39, %v1711_v21  ;;  %v1776_v62 = vpop.f32.mrf.mxu1  ;;  %v2393_v54 = vld [vmem:[#allocation11_spill] sm:$0xff]  ;;  %v2396_v39 = vld [vmem:[#allocation14_spill] sm:$0xff] }
 0x157   :  { %v1714_v13 = vpop.f32.mrf.mxu0  ;;  %v1777_v25 = vadd.f32 %v1776_v62, %v1775_v50  ;;  %v2394_v50 = vld [vmem:[#allocation13_spill] sm:$0xff] }
 0x158   :  { %1327 = vst [vmem:[%s2370_s2 + $0x40] sm:$0xff] %v1289_v60  ;;  %v1343_v14 = vadd.f32 %v1342_v22, %v1289_v60  ;;  %v1368_v15 = vmul.f32 %v1289_v60, %v1289_v60  ;;  %v1195_v16 = vadd.f32 %v1713_v61, %v1098_v40  ;;  %v1778_v26 = vpop.f32.mrf.mxu1  ;;  %v1600_v37 = vadd.f32 %v2394_v50, %v2393_v54 }
 0x159   :  { %v1715_v43 = vpop.f32.mrf.mxu0  ;;  %v1664_v40 = vadd.f32 %v2396_v39, %v2395_v38  ;;  %v1114_v60 = vadd.f32 %v1661_v34, %v1597_v58 }
 0x15a   :  { %v1383_v27 = vadd.f32 %v1382_v59, %v1368_v15  ;;  %v1292_v28 = vadd.f32 %v1777_v25, %v1195_v16  ;;  %v1716_v63 = vadd.f32 %v1715_v43, %v1714_v13  ;;  %v1779_v0 = vpop.f32.mrf.mxu1 }
 0x15b   :  { %v1717_v2 = vpop.f32.mrf.mxu0  ;;  %v1780_v5 = vadd.f32 %v1779_v0, %v1778_v26  ;;  %v1119_v43 = vadd.f32 %v1664_v40, %v1600_v37  ;;  %v2399_v0 = vld [vmem:[#allocation16_spill] sm:$0xff] }
 0x15c   :  { %1328 = vst [vmem:[%s2370_s2 + $0x48] sm:$0xff] %v1292_v28  ;;  %v1344_v1 = vadd.f32 %v1343_v14, %v1292_v28  ;;  %v1369_v3 = vmul.f32 %v1292_v28, %v1292_v28  ;;  %v1200_v56 = vadd.f32 %v1716_v63, %v1103_v41  ;;  %v1781_v4 = vpop.f32.mrf.mxu1 }
 0x15d   :  { %v1718_v48 = vpop.f32.mrf.mxu0 }
 0x15e   :  { %v1384_v29 = vadd.f32 %v1383_v27, %v1369_v3  ;;  %v1297_v30 = vadd.f32 %v1780_v5, %v1200_v56  ;;  %v1719_v31 = vadd.f32 %v1718_v48, %v1717_v2  ;;  %v1782_v32 = vpop.f32.mrf.mxu1  ;;  %v2398_v27 = vld [vmem:[#allocation17_spill] sm:$0xff]  ;;  %v2400_v2 = vld [vmem:[#allocation18_spill] sm:$0xff] }
 0x15f   :  { %v1720_v17 = vpop.f32.mrf.mxu0  ;;  %v1783_v8 = vadd.f32 %v1782_v32, %v1781_v4  ;;  %v1603_v28 = vadd.f32 %v2398_v27, %v2397_v44 }
 0x160   :  { %1329 = vst [vmem:[%s2370_s2 + $0x50] sm:$0xff] %v1297_v30  ;;  %v1345_v18 = vadd.f32 %v1344_v1, %v1297_v30  ;;  %v1370_v19 = vmul.f32 %v1297_v30, %v1297_v30  ;;  %v1203_v20 = vadd.f32 %v1719_v31, %v1106_v6  ;;  %v1784_v55 = vpop.f32.mrf.mxu1  ;;  %v1667_v1 = vadd.f32 %v2400_v2, %v2399_v0 }
 0x161   :  { %v1721_v9 = vpop.f32.mrf.mxu0 }
 0x162   :  { %v1385_v35 = vadd.f32 %v1384_v29, %v1370_v19  ;;  %v1300_v36 = vadd.f32 %v1783_v8, %v1203_v20  ;;  %v1722_v11 = vadd.f32 %v1721_v9, %v1720_v17  ;;  %v1785_v12 = vpop.f32.mrf.mxu1  ;;  %v1122_v30 = vadd.f32 %v1667_v1, %v1603_v28 }
 0x163   :  { %v1723_v52 = vpop.f32.mrf.mxu0  ;;  %v1786_v23 = vadd.f32 %v1785_v12, %v1784_v55 }
 0x164   :  { %1330 = vst [vmem:[%s2370_s2 + $0x58] sm:$0xff] %v1300_v36  ;;  %v1346_v53 = vadd.f32 %v1345_v18, %v1300_v36  ;;  %v1371_v21 = vmul.f32 %v1300_v36, %v1300_v36  ;;  %v1208_v22 = vadd.f32 %v1722_v11, %v1111_v49  ;;  %v1787_v24 = vpop.f32.mrf.mxu1 }
 0x165   :  { %v1724_v59 = vpop.f32.mrf.mxu0 }
 0x166   :  { %v1386_v61 = vadd.f32 %v1385_v35, %v1371_v21  ;;  %v1305_v62 = vadd.f32 %v1786_v23, %v1208_v22  ;;  %v1725_v13 = vadd.f32 %v1724_v59, %v1723_v52  ;;  %v1788_v14 = vpop.f32.mrf.mxu1  ;;  %v1335_v21 = vld [vmem:[%s2371_s3] sm:$0x1] }
 0x167   :  { %v1726_v15 = vpop.f32.mrf.mxu0  ;;  %v1789_v41 = vadd.f32 %v1788_v14, %v1787_v24  ;;  %v1359_v24 = vld [vmem:[%s2372_s4] sm:$0x1] }
 0x168   :  { %1331 = vst [vmem:[%s2370_s2 + $0x60] sm:$0xff] %v1305_v62  ;;  %v1347_v16 = vadd.f32 %v1346_v53, %v1305_v62  ;;  %v1372_v25 = vmul.f32 %v1305_v62, %v1305_v62  ;;  %v1211_v26 = vadd.f32 %v1725_v13, %v1114_v60  ;;  %v1790_v42 = vpop.f32.mrf.mxu1 }
 0x169   :  { %v1727_v63 = vpop.f32.mrf.mxu0 }
 0x16a   :  { %v1387_v3 = vadd.f32 %v1386_v61, %v1372_v25  ;;  %v1308_v56 = vadd.f32 %v1789_v41, %v1211_v26  ;;  %v1728_v5 = vadd.f32 %v1727_v63, %v1726_v15  ;;  %v1791_v4 = vpop.f32.mrf.mxu1 }
 0x16b   :  { %v1729_v45 = vpop.f32.mrf.mxu0  ;;  %v1792_v48 = vadd.f32 %v1791_v4, %v1790_v42 }
 0x16c   :  { %1332 = vst [vmem:[%s2370_s2 + $0x68] sm:$0xff] %v1308_v56  ;;  %v1348_v47 = vadd.f32 %v1347_v16, %v1308_v56  ;;  %v1373_v7 = vmul.f32 %v1308_v56, %v1308_v56  ;;  %v1216_v46 = vadd.f32 %v1728_v5, %v1119_v43  ;;  %v1793_v6 = vpop.f32.mrf.mxu1 }
 0x16d   :  { %v1730_v29 = vpop.f32.mrf.mxu0 }
 0x16e   :  { %v1388_v31 = vadd.f32 %v1387_v3, %v1373_v7  ;;  %v1313_v32 = vadd.f32 %v1792_v48, %v1216_v46  ;;  %v1731_v17 = vadd.f32 %v1730_v29, %v1729_v45  ;;  %v1794_v18 = vpop.f32.mrf.mxu1 }
 0x16f   :  { %v1795_v55 = vadd.f32 %v1794_v18, %v1793_v6 }
 0x170   :  { %1333 = vst [vmem:[%s2370_s2 + $0x70] sm:$0xff] %v1313_v32  ;;  %v1349_v19 = vadd.f32 %v1348_v47, %v1313_v32  ;;  %v1374_v20 = vmul.f32 %v1313_v32, %v1313_v32  ;;  %v1219_v8 = vadd.f32 %v1731_v17, %v1122_v30 }
 0x172   :  { %v1389_v49 = vadd.f32 %v1388_v31, %v1374_v20  ;;  %v1316_v51 = vadd.f32 %v1795_v55, %v1219_v8 }
 0x174   :  { %1334 = vst [vmem:[%s2370_s2 + $0x78] sm:$0xff] %v1316_v51  ;;  %v1350_v57 = vadd.f32 %v1349_v19, %v1316_v51  ;;  %v1375_v58 = vmul.f32 %v1316_v51, %v1316_v51 }
 0x176   :  { %v1351_v9 = vrot.slane %v1350_v57, 4  ;;  %v1390_v10 = vadd.f32 %v1389_v49, %v1375_v58 }
 0x178   :  { %v1352_v33 = vadd.f32 %v1351_v9, %v1350_v57  ;;  %v1391_v34 = vrot.slane %v1390_v10, 4 }
 0x17a   :  { %v1353_v35 = vrot.slane %v1352_v33, 2  ;;  %v1392_v36 = vadd.f32 %v1391_v34, %v1390_v10 }
 0x17c   :  { %v1354_v11 = vadd.f32 %v1353_v35, %v1352_v33  ;;  %v1393_v12 = vrot.slane %v1392_v36, 2 }
 0x17e   :  { %v1355_v52 = vrot.slane %v1354_v11, 1  ;;  %v1394_v53 = vadd.f32 %v1393_v12, %v1392_v36 }
 0x180   :  { %v1356_v22 = vadd.f32 %v1355_v52, %v1354_v11  ;;  %v1395_v23 = vrot.slane %v1394_v53, 1 }
 0x182   :  { %v1357_v54 = vadd.f32 %v1356_v22, %v1335_v21  ;;  %v1396_v50 = vadd.f32 %v1395_v23, %v1394_v53 }
 0x184   :  { %1358 = vst [vmem:[%s2371_s3] sm:$0x1] %v1357_v54  ;;  %v1397_v37 = vadd.f32 %v1396_v50, %v1359_v24 }
 0x186   :  { %1398 = vst [vmem:[%s2372_s4] sm:$0x1] %v1397_v37 }
 0x187   :  { %1411 = vsyncpa [#allocation3], 1 }

// kernel: _forward.12
= control target key start
LH: loop header
LB: loop body
LE: loop exit
PB: predicated region body
PF: predicated region fallthrough
CT: control target
= control target key end

     0   :  { %s1375_s0 = inlined_call_operand.vmem [shape: f32[512,128], index: 0, kind: input, shape index: {}]   ;;  %s1376_s1 = inlined_call_operand.vmem [shape: f32[1,128], index: 1, kind: input, shape index: {}]   ;;  %s1377_s2 = inlined_call_operand.vmem [shape: f32[1,128], index: 2, kind: input, shape index: {}]   ;;  %s1378_s3 = inlined_call_operand.vmem [shape: bf16[512,128], index: 3, kind: output, shape index: {}]  }
   0x1   :  { %v14_v0 = vld [vmem:[%s1375_s0] sm:$0xff]  ;;  %v15_v1 = vld [vmem:[%s1375_s0 + $0x8] sm:$0xff]  ;;  %v16_v6 = vld [vmem:[%s1375_s0 + $0x10] sm:$0xff] }
   0x2   :  { %v958_v2 = vld [vmem:[%s1376_s1] ss:$0 sm:$0xff]  ;;  %v17_v7 = vld [vmem:[%s1375_s0 + $0x18] sm:$0xff]  ;;  %v19_v11 = vld [vmem:[%s1375_s0 + $0x28] sm:$0xff] }
   0x3   :  { %v85_v3 = vmul.f32 %v958_v2, %v14_v0  ;;  %v86_v4 = vmul.f32 %v958_v2, %v15_v1  ;;  %v965_v5 = vld [vmem:[%s1377_s2] ss:$0 sm:$0xff]  ;;  %v87_v8 = vmul.f32 %v958_v2, %v16_v6  ;;  %v88_v9 = vmul.f32 %v958_v2, %v17_v7  ;;  %v20_v12 = vld [vmem:[%s1375_s0 + $0x30] sm:$0xff]  ;;  %v21_v17 = vld [vmem:[%s1375_s0 + $0x38] sm:$0xff] }
   0x4   :  { %v18_v10 = vld [vmem:[%s1375_s0 + $0x20] sm:$0xff]  ;;  %v90_v16 = vmul.f32 %v958_v2, %v19_v11  ;;  %v91_v20 = vmul.f32 %v958_v2, %v20_v12  ;;  %v92_v21 = vmul.f32 %v958_v2, %v21_v17  ;;  %v23_v27 = vld [vmem:[%s1375_s0 + $0x48] sm:$0xff]  ;;  %v24_v32 = vld [vmem:[%s1375_s0 + $0x50] sm:$0xff] }
   0x5   :  { %v156_v13 = vadd.f32 %v965_v5, %v85_v3  ;;  %v157_v14 = vadd.f32 %v965_v5, %v86_v4  ;;  %v89_v15 = vmul.f32 %v958_v2, %v18_v10  ;;  %v158_v18 = vadd.f32 %v965_v5, %v87_v8  ;;  %v22_v22 = vld [vmem:[%s1375_s0 + $0x40] sm:$0xff]  ;;  %v25_v33 = vld [vmem:[%s1375_s0 + $0x58] sm:$0xff]  ;;  %v27_v39 = vld [vmem:[%s1375_s0 + $0x68] sm:$0xff] }
   0x6   :  { %v159_v19 = vadd.f32 %v965_v5, %v88_v9  ;;  %v161_v26 = vadd.f32 %v965_v5, %v90_v16  ;;  %v162_v30 = vadd.f32 %v965_v5, %v91_v20  ;;  %v163_v31 = vadd.f32 %v965_v5, %v92_v21  ;;  %v26_v38 = vld [vmem:[%s1375_s0 + $0x60] sm:$0xff]  ;;  %v28_v44 = vld [vmem:[%s1375_s0 + $0x70] sm:$0xff]  ;;  %v29_v49 = vld [vmem:[%s1375_s0 + $0x78] sm:$0xff] }
   0x7   :  { %v220_v23 = vmax.f32 %v156_v13, 0.0  ;;  %v221_v24 = vmax.f32 %v157_v14, 0.0  ;;  %v160_v25 = vadd.f32 %v965_v5, %v89_v15  ;;  %v222_v28 = vmax.f32 %v158_v18, 0.0  ;;  %v30_v54 = vld [vmem:[%s1375_s0 + $0x80] sm:$0xff]  ;;  %v31_v63 = vld [vmem:[%s1375_s0 + $0x88] sm:$0xff]  ;;  %v32_v6 = vld [vmem:[%s1375_s0 + $0x90] sm:$0xff] }
   0x8   :  { %v223_v29 = vmax.f32 %v159_v19, 0.0  ;;  %v225_v36 = vmax.f32 %v161_v26, 0.0  ;;  %v93_v37 = vmul.f32 %v958_v2, %v22_v22  ;;  %v226_v41 = vmax.f32 %v162_v30, 0.0  ;;  %v33_v7 = vld [vmem:[%s1375_s0 + $0x98] sm:$0xff]  ;;  %v34_v12 = vld [vmem:[%s1375_s0 + $0xa0] sm:$0xff]  ;;  %v35_v13 = vld [vmem:[%s1375_s0 + $0xa8] sm:$0xff] }
   0x9   :  { %v741_v34 = vpack.c.bf16 %v221_v24, %v220_v23  ;;  %v224_v35 = vmax.f32 %v160_v25, 0.0  ;;  %v227_v42 = vmax.f32 %v163_v31, 0.0  ;;  %v94_v43 = vmul.f32 %v958_v2, %v23_v27  ;;  %v36_v18 = vld [vmem:[%s1375_s0 + $0xb0] sm:$0xff]  ;;  %v37_v23 = vld [vmem:[%s1375_s0 + $0xb8] sm:$0xff] }
   0xa   :  { %v746_v40 = vpack.c.bf16 %v223_v29, %v222_v28  ;;  %v164_v46 = vadd.f32 %v965_v5, %v93_v37  ;;  %v95_v47 = vmul.f32 %v958_v2, %v24_v32  ;;  %v96_v48 = vmul.f32 %v958_v2, %v25_v33  ;;  %v38_v28 = vld [vmem:[%s1375_s0 + $0xc0] sm:$0xff]  ;;  %v39_v37 = vld [vmem:[%s1375_s0 + $0xc8] sm:$0xff] }
   0xb   :  { %742 = vst [vmem:[%s1378_s3] sm:$0xff] %v741_v34   ;;  %v751_v45 = vpack.c.bf16 %v225_v36, %v224_v35  ;;  %v756_v50 = vpack.c.bf16 %v227_v42, %v226_v41  ;;  %v165_v51 = vadd.f32 %v965_v5, %v94_v43  ;;  %v97_v52 = vmul.f32 %v958_v2, %v26_v38  ;;  %v40_v42 = vld [vmem:[%s1375_s0 + $0xd0] sm:$0xff]  ;;  %v41_v43 = vld [vmem:[%s1375_s0 + $0xd8] sm:$0xff] }
   0xc   :  { %898 = vst [vmem:[%s1378_s3 + $0x8] sm:$0xff] %v746_v40   ;;  %v98_v53 = vmul.f32 %v958_v2, %v27_v39  ;;  %v228_v55 = vmax.f32 %v164_v46, 0.0  ;;  %v166_v56 = vadd.f32 %v965_v5, %v95_v47  ;;  %v167_v57 = vadd.f32 %v965_v5, %v96_v48  ;;  %v42_v48 = vld [vmem:[%s1375_s0 + $0xe0] sm:$0xff] }
   0xd   :  { %899 = vst [vmem:[%s1378_s3 + $0x10] sm:$0xff] %v751_v45   ;;  %v99_v58 = vmul.f32 %v958_v2, %v28_v44  ;;  %900 = vst [vmem:[%s1378_s3 + $0x18] sm:$0xff] %v756_v50   ;;  %v229_v59 = vmax.f32 %v165_v51, 0.0  ;;  %v168_v60 = vadd.f32 %v965_v5, %v97_v52  ;;  %v100_v62 = vmul.f32 %v958_v2, %v29_v49  ;;  %v43_v49 = vld [vmem:[%s1375_s0 + $0xe8] sm:$0xff] }
   0xe   :  { %v169_v61 = vadd.f32 %v965_v5, %v98_v53  ;;  %v230_v0 = vmax.f32 %v166_v56, 0.0  ;;  %v231_v1 = vmax.f32 %v167_v57, 0.0  ;;  %v101_v4 = vmul.f32 %v958_v2, %v30_v54  ;;  %v44_v54 = vld [vmem:[%s1375_s0 + $0xf0] sm:$0xff] }
   0xf   :  { %v170_v3 = vadd.f32 %v965_v5, %v99_v58  ;;  %v761_v8 = vpack.c.bf16 %v229_v59, %v228_v55  ;;  %v232_v9 = vmax.f32 %v168_v60, 0.0  ;;  %v171_v11 = vadd.f32 %v965_v5, %v100_v62  ;;  %v45_v59 = vld [vmem:[%s1375_s0 + $0xf8] sm:$0xff] }
  0x10   :  { %v233_v10 = vmax.f32 %v169_v61, 0.0  ;;  %v766_v14 = vpack.c.bf16 %v231_v1, %v230_v0  ;;  %v102_v16 = vmul.f32 %v958_v2, %v31_v63  ;;  %v172_v17 = vadd.f32 %v965_v5, %v101_v4  ;;  %v46_v0 = vld [vmem:[%s1375_s0 + $0x100] sm:$0xff] }
  0x11   :  { %v234_v15 = vmax.f32 %v170_v3, 0.0  ;;  %901 = vst [vmem:[%s1378_s3 + $0x20] sm:$0xff] %v761_v8   ;;  %v235_v20 = vmax.f32 %v171_v11, 0.0  ;;  %v103_v21 = vmul.f32 %v958_v2, %v32_v6  ;;  %v104_v22 = vmul.f32 %v958_v2, %v33_v7  ;;  %v47_v11 = vld [vmem:[%s1375_s0 + $0x108] sm:$0xff] }
  0x12   :  { %v771_v19 = vpack.c.bf16 %v233_v10, %v232_v9  ;;  %902 = vst [vmem:[%s1378_s3 + $0x28] sm:$0xff] %v766_v14   ;;  %v173_v24 = vadd.f32 %v965_v5, %v102_v16  ;;  %v236_v25 = vmax.f32 %v172_v17, 0.0  ;;  %v105_v26 = vmul.f32 %v958_v2, %v34_v12  ;;  %v48_v16 = vld [vmem:[%s1375_s0 + $0x110] sm:$0xff]  ;;  %v49_v17 = vld [vmem:[%s1375_s0 + $0x118] sm:$0xff] }
  0x13   :  { %v106_v27 = vmul.f32 %v958_v2, %v35_v13  ;;  %v776_v29 = vpack.c.bf16 %v235_v20, %v234_v15  ;;  %v174_v30 = vadd.f32 %v965_v5, %v103_v21  ;;  %v175_v31 = vadd.f32 %v965_v5, %v104_v22  ;;  %v50_v22 = vld [vmem:[%s1375_s0 + $0x120] sm:$0xff] }
  0x14   :  { %903 = vst [vmem:[%s1378_s3 + $0x30] sm:$0xff] %v771_v19   ;;  %v107_v32 = vmul.f32 %v958_v2, %v36_v18  ;;  %v237_v33 = vmax.f32 %v173_v24, 0.0  ;;  %v176_v34 = vadd.f32 %v965_v5, %v105_v26  ;;  %v108_v36 = vmul.f32 %v958_v2, %v37_v23  ;;  %v51_v23 = vld [vmem:[%s1375_s0 + $0x128] sm:$0xff] }
  0x15   :  { %v177_v35 = vadd.f32 %v965_v5, %v106_v27  ;;  %904 = vst [vmem:[%s1378_s3 + $0x38] sm:$0xff] %v776_v29   ;;  %v238_v38 = vmax.f32 %v174_v30, 0.0  ;;  %v239_v39 = vmax.f32 %v175_v31, 0.0  ;;  %v109_v41 = vmul.f32 %v958_v2, %v38_v28  ;;  %v52_v28 = vld [vmem:[%s1375_s0 + $0x130] sm:$0xff] }
  0x16   :  { %v178_v40 = vadd.f32 %v965_v5, %v107_v32  ;;  %v781_v44 = vpack.c.bf16 %v237_v33, %v236_v25  ;;  %v240_v45 = vmax.f32 %v176_v34, 0.0  ;;  %v179_v47 = vadd.f32 %v965_v5, %v108_v36  ;;  %v53_v33 = vld [vmem:[%s1375_s0 + $0x138] sm:$0xff] }
  0x17   :  { %v241_v46 = vmax.f32 %v177_v35, 0.0  ;;  %v786_v50 = vpack.c.bf16 %v239_v39, %v238_v38  ;;  %v110_v52 = vmul.f32 %v958_v2, %v39_v37  ;;  %v180_v53 = vadd.f32 %v965_v5, %v109_v41  ;;  %v54_v38 = vld [vmem:[%s1375_s0 + $0x140] sm:$0xff] }
  0x18   :  { %v242_v51 = vmax.f32 %v178_v40, 0.0  ;;  %905 = vst [vmem:[%s1378_s3 + $0x40] sm:$0xff] %v781_v44   ;;  %v243_v56 = vmax.f32 %v179_v47, 0.0  ;;  %v111_v57 = vmul.f32 %v958_v2, %v40_v42  ;;  %v112_v58 = vmul.f32 %v958_v2, %v41_v43  ;;  %v55_v47 = vld [vmem:[%s1375_s0 + $0x148] sm:$0xff] }
  0x19   :  { %v791_v55 = vpack.c.bf16 %v241_v46, %v240_v45  ;;  %906 = vst [vmem:[%s1378_s3 + $0x48] sm:$0xff] %v786_v50   ;;  %v181_v60 = vadd.f32 %v965_v5, %v110_v52  ;;  %v244_v61 = vmax.f32 %v180_v53, 0.0  ;;  %v113_v62 = vmul.f32 %v958_v2, %v42_v48  ;;  %v56_v52 = vld [vmem:[%s1375_s0 + $0x150] sm:$0xff]  ;;  %v57_v53 = vld [vmem:[%s1375_s0 + $0x158] sm:$0xff] }
  0x1a   :  { %v114_v63 = vmul.f32 %v958_v2, %v43_v49  ;;  %v796_v1 = vpack.c.bf16 %v243_v56, %v242_v51  ;;  %v182_v3 = vadd.f32 %v965_v5, %v111_v57  ;;  %v183_v4 = vadd.f32 %v965_v5, %v112_v58  ;;  %v58_v58 = vld [vmem:[%s1375_s0 + $0x160] sm:$0xff] }
  0x1b   :  { %907 = vst [vmem:[%s1378_s3 + $0x50] sm:$0xff] %v791_v55   ;;  %v115_v6 = vmul.f32 %v958_v2, %v44_v54  ;;  %v245_v7 = vmax.f32 %v181_v60, 0.0  ;;  %v184_v8 = vadd.f32 %v965_v5, %v113_v62  ;;  %v116_v10 = vmul.f32 %v958_v2, %v45_v59  ;;  %v59_v59 = vld [vmem:[%s1375_s0 + $0x168] sm:$0xff] }
  0x1c   :  { %v185_v9 = vadd.f32 %v965_v5, %v114_v63  ;;  %908 = vst [vmem:[%s1378_s3 + $0x58] sm:$0xff] %v796_v1   ;;  %v246_v12 = vmax.f32 %v182_v3, 0.0  ;;  %v247_v13 = vmax.f32 %v183_v4, 0.0  ;;  %v117_v15 = vmul.f32 %v958_v2, %v46_v0  ;;  %v60_v0 = vld [vmem:[%s1375_s0 + $0x170] sm:$0xff] }
  0x1d   :  { %v186_v14 = vadd.f32 %v965_v5, %v115_v6  ;;  %v801_v18 = vpack.c.bf16 %v245_v7, %v244_v61  ;;  %v248_v19 = vmax.f32 %v184_v8, 0.0  ;;  %v187_v21 = vadd.f32 %v965_v5, %v116_v10  ;;  %v61_v7 = vld [vmem:[%s1375_s0 + $0x178] sm:$0xff] }
  0x1e   :  { %v249_v20 = vmax.f32 %v185_v9, 0.0  ;;  %v806_v24 = vpack.c.bf16 %v247_v13, %v246_v12  ;;  %v118_v26 = vmul.f32 %v958_v2, %v47_v11  ;;  %v188_v27 = vadd.f32 %v965_v5, %v117_v15  ;;  %v62_v12 = vld [vmem:[%s1375_s0 + $0x180] sm:$0xff] }
  0x1f   :  { %v250_v25 = vmax.f32 %v186_v14, 0.0  ;;  %909 = vst [vmem:[%s1378_s3 + $0x60] sm:$0xff] %v801_v18   ;;  %v251_v30 = vmax.f32 %v187_v21, 0.0  ;;  %v119_v31 = vmul.f32 %v958_v2, %v48_v16  ;;  %v120_v32 = vmul.f32 %v958_v2, %v49_v17  ;;  %v63_v21 = vld [vmem:[%s1375_s0 + $0x188] sm:$0xff] }
  0x20   :  { %v811_v29 = vpack.c.bf16 %v249_v20, %v248_v19  ;;  %910 = vst [vmem:[%s1378_s3 + $0x68] sm:$0xff] %v806_v24   ;;  %v189_v34 = vadd.f32 %v965_v5, %v118_v26  ;;  %v252_v35 = vmax.f32 %v188_v27, 0.0  ;;  %v121_v36 = vmul.f32 %v958_v2, %v50_v22  ;;  %v64_v26 = vld [vmem:[%s1375_s0 + $0x190] sm:$0xff]  ;;  %v65_v27 = vld [vmem:[%s1375_s0 + $0x198] sm:$0xff] }
  0x21   :  { %v122_v37 = vmul.f32 %v958_v2, %v51_v23  ;;  %v816_v39 = vpack.c.bf16 %v251_v30, %v250_v25  ;;  %v190_v40 = vadd.f32 %v965_v5, %v119_v31  ;;  %v191_v41 = vadd.f32 %v965_v5, %v120_v32  ;;  %v66_v32 = vld [vmem:[%s1375_s0 + $0x1a0] sm:$0xff] }
  0x22   :  { %911 = vst [vmem:[%s1378_s3 + $0x70] sm:$0xff] %v811_v29   ;;  %v123_v42 = vmul.f32 %v958_v2, %v52_v28  ;;  %v253_v43 = vmax.f32 %v189_v34, 0.0  ;;  %v192_v44 = vadd.f32 %v965_v5, %v121_v36  ;;  %v124_v46 = vmul.f32 %v958_v2, %v53_v33  ;;  %v67_v33 = vld [vmem:[%s1375_s0 + $0x1a8] sm:$0xff] }
  0x23   :  { %v193_v45 = vadd.f32 %v965_v5, %v122_v37  ;;  %912 = vst [vmem:[%s1378_s3 + $0x78] sm:$0xff] %v816_v39   ;;  %v254_v48 = vmax.f32 %v190_v40, 0.0  ;;  %v255_v49 = vmax.f32 %v191_v41, 0.0  ;;  %v125_v51 = vmul.f32 %v958_v2, %v54_v38  ;;  %v68_v38 = vld [vmem:[%s1375_s0 + $0x1b0] sm:$0xff] }
  0x24   :  { %v194_v50 = vadd.f32 %v965_v5, %v123_v42  ;;  %v821_v54 = vpack.c.bf16 %v253_v43, %v252_v35  ;;  %v256_v55 = vmax.f32 %v192_v44, 0.0  ;;  %v195_v57 = vadd.f32 %v965_v5, %v124_v46  ;;  %v69_v43 = vld [vmem:[%s1375_s0 + $0x1b8] sm:$0xff] }
  0x25   :  { %v257_v56 = vmax.f32 %v193_v45, 0.0  ;;  %v826_v60 = vpack.c.bf16 %v255_v49, %v254_v48  ;;  %v126_v62 = vmul.f32 %v958_v2, %v55_v47  ;;  %v196_v63 = vadd.f32 %v965_v5, %v125_v51  ;;  %v70_v48 = vld [vmem:[%s1375_s0 + $0x1c0] sm:$0xff] }
  0x26   :  { %v258_v61 = vmax.f32 %v194_v50, 0.0  ;;  %913 = vst [vmem:[%s1378_s3 + $0x80] sm:$0xff] %v821_v54   ;;  %v259_v3 = vmax.f32 %v195_v57, 0.0  ;;  %v127_v4 = vmul.f32 %v958_v2, %v56_v52  ;;  %v128_v6 = vmul.f32 %v958_v2, %v57_v53  ;;  %v71_v57 = vld [vmem:[%s1375_s0 + $0x1c8] sm:$0xff] }
  0x27   :  { %v831_v1 = vpack.c.bf16 %v257_v56, %v256_v55  ;;  %914 = vst [vmem:[%s1378_s3 + $0x88] sm:$0xff] %v826_v60   ;;  %v197_v8 = vadd.f32 %v965_v5, %v126_v62  ;;  %v260_v9 = vmax.f32 %v196_v63, 0.0  ;;  %v129_v10 = vmul.f32 %v958_v2, %v58_v58  ;;  %v72_v62 = vld [vmem:[%s1375_s0 + $0x1d0] sm:$0xff]  ;;  %v73_v63 = vld [vmem:[%s1375_s0 + $0x1d8] sm:$0xff] }
  0x28   :  { %v130_v11 = vmul.f32 %v958_v2, %v59_v59  ;;  %v836_v13 = vpack.c.bf16 %v259_v3, %v258_v61  ;;  %v198_v14 = vadd.f32 %v965_v5, %v127_v4  ;;  %v199_v15 = vadd.f32 %v965_v5, %v128_v6  ;;  %v74_v6 = vld [vmem:[%s1375_s0 + $0x1e0] sm:$0xff] }
  0x29   :  { %915 = vst [vmem:[%s1378_s3 + $0x90] sm:$0xff] %v831_v1   ;;  %v131_v16 = vmul.f32 %v958_v2, %v60_v0  ;;  %v261_v17 = vmax.f32 %v197_v8, 0.0  ;;  %v200_v18 = vadd.f32 %v965_v5, %v129_v10  ;;  %v132_v20 = vmul.f32 %v958_v2, %v61_v7  ;;  %v75_v7 = vld [vmem:[%s1375_s0 + $0x1e8] sm:$0xff] }
  0x2a   :  { %v201_v19 = vadd.f32 %v965_v5, %v130_v11  ;;  %916 = vst [vmem:[%s1378_s3 + $0x98] sm:$0xff] %v836_v13   ;;  %v262_v22 = vmax.f32 %v198_v14, 0.0  ;;  %v263_v23 = vmax.f32 %v199_v15, 0.0  ;;  %v133_v25 = vmul.f32 %v958_v2, %v62_v12  ;;  %v76_v12 = vld [vmem:[%s1375_s0 + $0x1f0] sm:$0xff] }
  0x2b   :  { %v202_v24 = vadd.f32 %v965_v5, %v131_v16  ;;  %v841_v28 = vpack.c.bf16 %v261_v17, %v260_v9  ;;  %v264_v29 = vmax.f32 %v200_v18, 0.0  ;;  %v203_v31 = vadd.f32 %v965_v5, %v132_v20  ;;  %v77_v17 = vld [vmem:[%s1375_s0 + $0x1f8] sm:$0xff] }
  0x2c   :  { %v265_v30 = vmax.f32 %v201_v19, 0.0  ;;  %v846_v34 = vpack.c.bf16 %v263_v23, %v262_v22  ;;  %v134_v36 = vmul.f32 %v958_v2, %v63_v21  ;;  %v204_v37 = vadd.f32 %v965_v5, %v133_v25 }
  0x2d   :  { %v266_v35 = vmax.f32 %v202_v24, 0.0  ;;  %917 = vst [vmem:[%s1378_s3 + $0xa0] sm:$0xff] %v841_v28   ;;  %v267_v40 = vmax.f32 %v203_v31, 0.0  ;;  %v135_v41 = vmul.f32 %v958_v2, %v64_v26  ;;  %v136_v42 = vmul.f32 %v958_v2, %v65_v27 }
  0x2e   :  { %v851_v39 = vpack.c.bf16 %v265_v30, %v264_v29  ;;  %918 = vst [vmem:[%s1378_s3 + $0xa8] sm:$0xff] %v846_v34   ;;  %v205_v44 = vadd.f32 %v965_v5, %v134_v36  ;;  %v268_v45 = vmax.f32 %v204_v37, 0.0  ;;  %v137_v46 = vmul.f32 %v958_v2, %v66_v32 }
  0x2f   :  { %v138_v47 = vmul.f32 %v958_v2, %v67_v33  ;;  %v856_v49 = vpack.c.bf16 %v267_v40, %v266_v35  ;;  %v206_v50 = vadd.f32 %v965_v5, %v135_v41  ;;  %v207_v51 = vadd.f32 %v965_v5, %v136_v42 }
  0x30   :  { %919 = vst [vmem:[%s1378_s3 + $0xb0] sm:$0xff] %v851_v39   ;;  %v139_v52 = vmul.f32 %v958_v2, %v68_v38  ;;  %v269_v53 = vmax.f32 %v205_v44, 0.0  ;;  %v208_v54 = vadd.f32 %v965_v5, %v137_v46  ;;  %v140_v56 = vmul.f32 %v958_v2, %v69_v43 }
  0x31   :  { %v209_v55 = vadd.f32 %v965_v5, %v138_v47  ;;  %920 = vst [vmem:[%s1378_s3 + $0xb8] sm:$0xff] %v856_v49   ;;  %v270_v58 = vmax.f32 %v206_v50, 0.0  ;;  %v271_v59 = vmax.f32 %v207_v51, 0.0  ;;  %v141_v61 = vmul.f32 %v958_v2, %v70_v48 }
  0x32   :  { %v210_v60 = vadd.f32 %v965_v5, %v139_v52  ;;  %v861_v0 = vpack.c.bf16 %v269_v53, %v268_v45  ;;  %v272_v1 = vmax.f32 %v208_v54, 0.0  ;;  %v211_v4 = vadd.f32 %v965_v5, %v140_v56 }
  0x33   :  { %v273_v3 = vmax.f32 %v209_v55, 0.0  ;;  %v866_v8 = vpack.c.bf16 %v271_v59, %v270_v58  ;;  %v142_v10 = vmul.f32 %v958_v2, %v71_v57  ;;  %v212_v11 = vadd.f32 %v965_v5, %v141_v61 }
  0x34   :  { %v274_v9 = vmax.f32 %v210_v60, 0.0  ;;  %921 = vst [vmem:[%s1378_s3 + $0xc0] sm:$0xff] %v861_v0   ;;  %v275_v14 = vmax.f32 %v211_v4, 0.0  ;;  %v143_v15 = vmul.f32 %v958_v2, %v72_v62  ;;  %v144_v16 = vmul.f32 %v958_v2, %v73_v63 }
  0x35   :  { %v871_v13 = vpack.c.bf16 %v273_v3, %v272_v1  ;;  %922 = vst [vmem:[%s1378_s3 + $0xc8] sm:$0xff] %v866_v8   ;;  %v213_v18 = vadd.f32 %v965_v5, %v142_v10  ;;  %v276_v19 = vmax.f32 %v212_v11, 0.0  ;;  %v145_v20 = vmul.f32 %v958_v2, %v74_v6 }
  0x36   :  { %v146_v21 = vmul.f32 %v958_v2, %v75_v7  ;;  %v876_v22 = vpack.c.bf16 %v275_v14, %v274_v9  ;;  %v214_v23 = vadd.f32 %v965_v5, %v143_v15  ;;  %v215_v24 = vadd.f32 %v965_v5, %v144_v16 }
  0x37   :  { %923 = vst [vmem:[%s1378_s3 + $0xd0] sm:$0xff] %v871_v13   ;;  %v147_v25 = vmul.f32 %v958_v2, %v76_v12  ;;  %v277_v26 = vmax.f32 %v213_v18, 0.0  ;;  %v216_v27 = vadd.f32 %v965_v5, %v145_v20  ;;  %v148_v29 = vmul.f32 %v958_v2, %v77_v17 }
  0x38   :  { %v217_v28 = vadd.f32 %v965_v5, %v146_v21  ;;  %924 = vst [vmem:[%s1378_s3 + $0xd8] sm:$0xff] %v876_v22   ;;  %v278_v30 = vmax.f32 %v214_v23, 0.0  ;;  %v279_v31 = vmax.f32 %v215_v24, 0.0 }
  0x39   :  { %v218_v32 = vadd.f32 %v965_v5, %v147_v25  ;;  %v881_v33 = vpack.c.bf16 %v277_v26, %v276_v19  ;;  %v280_v34 = vmax.f32 %v216_v27, 0.0  ;;  %v219_v36 = vadd.f32 %v965_v5, %v148_v29 }
  0x3a   :  { %v281_v35 = vmax.f32 %v217_v28, 0.0  ;;  %v886_v37 = vpack.c.bf16 %v279_v31, %v278_v30 }
  0x3b   :  { %v282_v38 = vmax.f32 %v218_v32, 0.0  ;;  %925 = vst [vmem:[%s1378_s3 + $0xe0] sm:$0xff] %v881_v33   ;;  %v283_v39 = vmax.f32 %v219_v36, 0.0 }
  0x3c   :  { %v891_v2 = vpack.c.bf16 %v281_v35, %v280_v34  ;;  %926 = vst [vmem:[%s1378_s3 + $0xe8] sm:$0xff] %v886_v37  }
  0x3d   :  { %v896_v40 = vpack.c.bf16 %v283_v39, %v282_v38 }
  0x3e   :  { %927 = vst [vmem:[%s1378_s3 + $0xf0] sm:$0xff] %v891_v2  }
  0x3f   :  { %928 = vst [vmem:[%s1378_s3 + $0xf8] sm:$0xff] %v896_v40  }

// kernel: _forward.11
= control target key start
LH: loop header
LB: loop body
LE: loop exit
PB: predicated region body
PF: predicated region fallthrough
CT: control target
= control target key end

     0   :  { %v2293_v0 = vmov 0   ;;  %s3180_s1 = inlined_call_operand.vmem [shape: bf16[512,128], index: 1, kind: input, shape index: {}]   ;;  %s3181_s0 = inlined_call_operand.vmem [shape: bf16[512,512], index: 0, kind: input, shape index: {}]   ;;  %s3182_s2 = inlined_call_operand.vmem [shape: f32[512,128], index: 2, kind: output, shape index: {0}]   ;;  %s3183_s3 = inlined_call_operand.vmem [shape: f32[1,128], index: 3, kind: output, shape index: {1}]   ;;  %s3184_s4 = inlined_call_operand.vmem [shape: f32[1,128], index: 4, kind: output, shape index: {2}]  }
   0x1   :  { %1045 = vmatprep.subr.bf16.mxu0 %v2293_v0  ;;  %1334 = vmatprep.subr.bf16.mxu1 %v2293_v0  ;;  %v2069_v1 = vld [vmem:[%s3180_s1 + $0x38] sm:$0xff]   ;;  %v2071_v3 = vld [vmem:[%s3180_s1 + $0x30] sm:$0xff]   ;;  %v2073_v5 = vld [vmem:[%s3180_s1 + $0x28] sm:$0xff]  }
   0x2   :  { %v2070_v2 = vld [vmem:[%s3180_s1 + $0xb8] sm:$0xff]   ;;  %1046 = vmatpush1.bf16.msra.mxu0 %v2069_v1  ;;  %v2072_v4 = vld [vmem:[%s3180_s1 + $0xb0] sm:$0xff]   ;;  %v2074_v6 = vld [vmem:[%s3180_s1 + $0xa8] sm:$0xff]  }
   0x3   :  { %1335 = vmatpush1.bf16.msra.mxu1 %v2070_v2  ;;  %1047 = vmatprep.subr.bf16.mxu0 %v2293_v0  ;;  %v2075_v7 = vld [vmem:[%s3180_s1 + $0x20] sm:$0xff]   ;;  %v2077_v9 = vld [vmem:[%s3180_s1 + $0x18] sm:$0xff]   ;;  %v2079_v11 = vld [vmem:[%s3180_s1 + $0x10] sm:$0xff]  }
   0x4   :  { %1336 = vmatprep.subr.bf16.mxu1 %v2293_v0  ;;  %v2076_v8 = vld [vmem:[%s3180_s1 + $0xa0] sm:$0xff]   ;;  %v2078_v10 = vld [vmem:[%s3180_s1 + $0x98] sm:$0xff]   ;;  %v2080_v12 = vld [vmem:[%s3180_s1 + $0x90] sm:$0xff]  }
   0x5   :  { %v2081_v13 = vld [vmem:[%s3180_s1 + $0x8] sm:$0xff]   ;;  %v2083_v15 = vld [vmem:[%s3180_s1] sm:$0xff]   ;;  %v2085_v17 = vld [vmem:[%s3180_s1 + $0x78] sm:$0xff]  }
   0x6   :  { %1048 = vmatpush1.bf16.msra.mxu0 %v2071_v3  ;;  %v2082_v14 = vld [vmem:[%s3180_s1 + $0x88] sm:$0xff]   ;;  %v2084_v16 = vld [vmem:[%s3180_s1 + $0x80] sm:$0xff]   ;;  %v2086_v18 = vld [vmem:[%s3180_s1 + $0xf8] sm:$0xff]  }
   0x7   :  { %1337 = vmatpush1.bf16.msra.mxu1 %v2072_v4  ;;  %1049 = vmatprep.subr.bf16.mxu0 %v2293_v0  ;;  %v2103_v19 = vld [vmem:[%s3181_s0 + $0x4] ss:$16 sps:$4 sm:$0xff]   ;;  %v2106_v21 = vld [vmem:[%s3181_s0 + $0xc] ss:$16 sps:$4 sm:$0xff]   ;;  %v2101_v35 = vld [vmem:[%s3181_s0] ss:$16 sps:$4 sm:$0xff]  }
   0x8   :  { %1338 = vmatprep.subr.bf16.mxu1 %v2293_v0  ;;  %v2087_v20 = vld [vmem:[%s3180_s1 + $0x70] sm:$0xff]   ;;  %1077 = vmatprep.mubr.bf16.mxu0 %v2103_v19  ;;  %v2089_v23 = vld [vmem:[%s3180_s1 + $0x68] sm:$0xff]   ;;  %v2091_v25 = vld [vmem:[%s3180_s1 + $0x60] sm:$0xff]  }
   0x9   :  { %v2088_v22 = vld [vmem:[%s3180_s1 + $0xf0] sm:$0xff]   ;;  %1366 = vmatprep.mubr.bf16.mxu1 %v2106_v21  ;;  %v2090_v24 = vld [vmem:[%s3180_s1 + $0xe8] sm:$0xff]   ;;  %v2092_v26 = vld [vmem:[%s3180_s1 + $0xe0] sm:$0xff]  }
   0xa   :  { %1050 = vmatpush1.bf16.msra.mxu0 %v2073_v5  ;;  %v2093_v27 = vld [vmem:[%s3180_s1 + $0x58] sm:$0xff]   ;;  %v2095_v29 = vld [vmem:[%s3180_s1 + $0x50] sm:$0xff]   ;;  %v2097_v31 = vld [vmem:[%s3180_s1 + $0x48] sm:$0xff]  }
   0xb   :  { %1339 = vmatpush1.bf16.msra.mxu1 %v2074_v6  ;;  %1051 = vmatprep.subr.bf16.mxu0 %v2293_v0  ;;  %v2094_v28 = vld [vmem:[%s3180_s1 + $0xd8] sm:$0xff]   ;;  %v2096_v30 = vld [vmem:[%s3180_s1 + $0xd0] sm:$0xff]   ;;  %v2098_v32 = vld [vmem:[%s3180_s1 + $0xc8] sm:$0xff]  }
   0xc   :  { %1340 = vmatprep.subr.bf16.mxu1 %v2293_v0  ;;  %v2099_v33 = vld [vmem:[%s3180_s1 + $0x40] sm:$0xff]   ;;  %v2104_v36 = vld [vmem:[%s3181_s0 + $0x8] ss:$16 sps:$4 sm:$0xff]   ;;  %v2109_v38 = vld [vmem:[%s3181_s0 + $0x2c] ss:$16 sps:$4 sm:$0xff]  }
   0xd   :  { %v2100_v34 = vld [vmem:[%s3180_s1 + $0xc0] sm:$0xff]   ;;  %v2112_v40 = vld [vmem:[%s3181_s0 + $0x28] ss:$16 sps:$4 sm:$0xff]   ;;  %v2115_v42 = vld [vmem:[%s3181_s0 + $0x4c] ss:$16 sps:$4 sm:$0xff]  }
   0xe   :  { %1052 = vmatpush1.bf16.msra.mxu0 %v2075_v7  ;;  %v2107_v37 = vld [vmem:[%s3181_s0 + $0x24] ss:$16 sps:$4 sm:$0xff]   ;;  %v2111_v39 = vld [vmem:[%s3181_s0 + $0x20] ss:$16 sps:$4 sm:$0xff]   ;;  %v2118_v44 = vld [vmem:[%s3181_s0 + $0x48] ss:$16 sps:$4 sm:$0xff]  }
   0xf   :  { %1341 = vmatpush1.bf16.msra.mxu1 %v2076_v8  ;;  %1053 = vmatprep.subr.bf16.mxu0 %v2293_v0  ;;  %v2113_v41 = vld [vmem:[%s3181_s0 + $0x44] ss:$16 sps:$4 sm:$0xff]   ;;  %v2117_v43 = vld [vmem:[%s3181_s0 + $0x40] ss:$16 sps:$4 sm:$0xff]   ;;  %v2121_v46 = vld [vmem:[%s3181_s0 + $0x6c] ss:$16 sps:$4 sm:$0xff]  }
  0x10   :  { %1342 = vmatprep.subr.bf16.mxu1 %v2293_v0  ;;  %v2119_v45 = vld [vmem:[%s3181_s0 + $0x64] ss:$16 sps:$4 sm:$0xff]   ;;  %v2123_v47 = vld [vmem:[%s3181_s0 + $0x60] ss:$16 sps:$4 sm:$0xff]   ;;  %v2124_v48 = vld [vmem:[%s3181_s0 + $0x68] ss:$16 sps:$4 sm:$0xff]  }
  0x11   :  { %v2125_v49 = vld [vmem:[%s3181_s0 + $0x84] ss:$16 sps:$4 sm:$0xff]   ;;  %v2127_v50 = vld [vmem:[%s3181_s0 + $0x8c] ss:$16 sps:$4 sm:$0xff]   ;;  %v2129_v51 = vld [vmem:[%s3181_s0 + $0x80] ss:$16 sps:$4 sm:$0xff]  }
  0x12   :  { %1054 = vmatpush1.bf16.msra.mxu0 %v2077_v9  ;;  %v2130_v52 = vld [vmem:[%s3181_s0 + $0x88] ss:$16 sps:$4 sm:$0xff]   ;;  %v2131_v53 = vld [vmem:[%s3181_s0 + $0xa4] ss:$16 sps:$4 sm:$0xff]   ;;  %v2133_v54 = vld [vmem:[%s3181_s0 + $0xac] ss:$16 sps:$4 sm:$0xff]  }
  0x13   :  { %1343 = vmatpush1.bf16.msra.mxu1 %v2078_v10  ;;  %1055 = vmatprep.subr.bf16.mxu0 %v2293_v0  ;;  %v2135_v55 = vld [vmem:[%s3181_s0 + $0xa0] ss:$16 sps:$4 sm:$0xff]   ;;  %v2136_v56 = vld [vmem:[%s3181_s0 + $0xa8] ss:$16 sps:$4 sm:$0xff]   ;;  %v2137_v57 = vld [vmem:[%s3181_s0 + $0xc4] ss:$16 sps:$4 sm:$0xff]  }
  0x14   :  { %1344 = vmatprep.subr.bf16.mxu1 %v2293_v0  ;;  %v2139_v58 = vld [vmem:[%s3181_s0 + $0xcc] ss:$16 sps:$4 sm:$0xff]   ;;  %v2141_v59 = vld [vmem:[%s3181_s0 + $0xc0] ss:$16 sps:$4 sm:$0xff]   ;;  %v2142_v60 = vld [vmem:[%s3181_s0 + $0xc8] ss:$16 sps:$4 sm:$0xff]  }
  0x15   :  { %v2143_v61 = vld [vmem:[%s3181_s0 + $0xe4] ss:$16 sps:$4 sm:$0xff]   ;;  %v2145_v62 = vld [vmem:[%s3181_s0 + $0xec] ss:$16 sps:$4 sm:$0xff]   ;;  %v2147_v63 = vld [vmem:[%s3181_s0 + $0xe0] ss:$16 sps:$4 sm:$0xff]  }
  0x16   :  { %1056 = vmatpush1.bf16.msra.mxu0 %v2079_v11  ;;  %v2149_v1 = vld [vmem:[%s3181_s0 + $0x104] ss:$16 sps:$4 sm:$0xff]   ;;  %v2151_v2 = vld [vmem:[%s3181_s0 + $0x10c] ss:$16 sps:$4 sm:$0xff]   ;;  %v2153_v3 = vld [vmem:[%s3181_s0 + $0x100] ss:$16 sps:$4 sm:$0xff]  }
  0x17   :  { %1345 = vmatpush1.bf16.msra.mxu1 %v2080_v12  ;;  %1057 = vmatprep.subr.bf16.mxu0 %v2293_v0  ;;  %v2154_v4 = vld [vmem:[%s3181_s0 + $0x108] ss:$16 sps:$4 sm:$0xff]   ;;  %v2155_v5 = vld [vmem:[%s3181_s0 + $0x124] ss:$16 sps:$4 sm:$0xff]   ;;  %v2157_v6 = vld [vmem:[%s3181_s0 + $0x12c] ss:$16 sps:$4 sm:$0xff]  }
  0x18   :  { %1346 = vmatprep.subr.bf16.mxu1 %v2293_v0  ;;  %v2159_v7 = vld [vmem:[%s3181_s0 + $0x120] ss:$16 sps:$4 sm:$0xff]   ;;  %v2160_v8 = vld [vmem:[%s3181_s0 + $0x128] ss:$16 sps:$4 sm:$0xff]   ;;  %v2161_v9 = vld [vmem:[%s3181_s0 + $0x144] ss:$16 sps:$4 sm:$0xff]  }
  0x19   :  { %v2163_v10 = vld [vmem:[%s3181_s0 + $0x14c] ss:$16 sps:$4 sm:$0xff]   ;;  %v2165_v11 = vld [vmem:[%s3181_s0 + $0x140] ss:$16 sps:$4 sm:$0xff]   ;;  %v2166_v12 = vld [vmem:[%s3181_s0 + $0x148] ss:$16 sps:$4 sm:$0xff]  }
  0x1a   :  { %1058 = vmatpush1.bf16.msra.mxu0 %v2081_v13  ;;  %v2167_v13 = vld [vmem:[%s3181_s0 + $0x164] ss:$16 sps:$4 sm:$0xff]   ;;  %v2177_v19 = vld [vmem:[%s3181_s0 + $0x180] ss:$16 sps:$4 sm:$0xff]  }
  0x1b   :  { %1347 = vmatpush1.bf16.msra.mxu1 %v2082_v14  ;;  %1059 = vmatprep.subr.bf16.mxu0 %v2293_v0  ;;  %v2169_v14 = vld [vmem:[%s3181_s0 + $0x16c] ss:$16 sps:$4 sm:$0xff]   ;;  %v2179_v21 = vld [vmem:[%s3181_s0 + $0x1a4] ss:$16 sps:$4 sm:$0xff]  }
  0x1c   :  { %1348 = vmatprep.subr.bf16.mxu1 %v2293_v0 }
  0x1e   :  { %1060 = vmatpush1.bf16.msra.mxu0 %v2083_v15  ;;  %v2171_v15 = vld [vmem:[%s3181_s0 + $0x160] ss:$16 sps:$4 sm:$0xff]  }
  0x1f   :  { %1349 = vmatpush1.bf16.msra.mxu1 %v2084_v16  ;;  %1061 = vmatprep.subr.bf16.mxu0 %v2293_v0  ;;  %v2172_v16 = vld [vmem:[%s3181_s0 + $0x168] ss:$16 sps:$4 sm:$0xff]  }
  0x20   :  { %1350 = vmatprep.subr.bf16.mxu1 %v2293_v0 }
  0x22   :  { %1062 = vmatpush2.bf16.msra.mxu0 %v2085_v17  ;;  %v2173_v17 = vld [vmem:[%s3181_s0 + $0x184] ss:$16 sps:$4 sm:$0xff]  }
  0x23   :  { %1351 = vmatpush2.bf16.msra.mxu1 %v2086_v18  ;;  %1063 = vmatprep.subr.bf16.mxu0 %v2293_v0  ;;  %v2175_v18 = vld [vmem:[%s3181_s0 + $0x18c] ss:$16 sps:$4 sm:$0xff]  }
  0x24   :  { %1352 = vmatprep.subr.bf16.mxu1 %v2293_v0 }
  0x26   :  { %1064 = vmatpush2.bf16.msra.mxu0 %v2087_v20  ;;  %v2178_v20 = vld [vmem:[%s3181_s0 + $0x188] ss:$16 sps:$4 sm:$0xff]  }
  0x27   :  { %1353 = vmatpush2.bf16.msra.mxu1 %v2088_v22  ;;  %1065 = vmatprep.subr.bf16.mxu0 %v2293_v0  ;;  %v2181_v22 = vld [vmem:[%s3181_s0 + $0x1ac] ss:$16 sps:$4 sm:$0xff]  }
  0x28   :  { %1354 = vmatprep.subr.bf16.mxu1 %v2293_v0 }
  0x2a   :  { %1066 = vmatpush2.bf16.msra.mxu0 %v2089_v23  ;;  %v2183_v23 = vld [vmem:[%s3181_s0 + $0x1a0] ss:$16 sps:$4 sm:$0xff]  }
  0x2b   :  { %1355 = vmatpush2.bf16.msra.mxu1 %v2090_v24  ;;  %1067 = vmatprep.subr.bf16.mxu0 %v2293_v0  ;;  %v2184_v24 = vld [vmem:[%s3181_s0 + $0x1a8] ss:$16 sps:$4 sm:$0xff]  }
  0x2c   :  { %1356 = vmatprep.subr.bf16.mxu1 %v2293_v0 }
  0x2e   :  { %1068 = vmatpush2.bf16.msra.mxu0 %v2091_v25  ;;  %v2185_v25 = vld [vmem:[%s3181_s0 + $0x1c4] ss:$16 sps:$4 sm:$0xff]  }
  0x2f   :  { %1357 = vmatpush2.bf16.msra.mxu1 %v2092_v26  ;;  %1069 = vmatprep.subr.bf16.mxu0 %v2293_v0  ;;  %v2187_v26 = vld [vmem:[%s3181_s0 + $0x1cc] ss:$16 sps:$4 sm:$0xff]  }
  0x30   :  { %1358 = vmatprep.subr.bf16.mxu1 %v2293_v0 }
  0x32   :  { %1070 = vmatpush2.bf16.msra.mxu0 %v2093_v27  ;;  %v2189_v27 = vld [vmem:[%s3181_s0 + $0x1c0] ss:$16 sps:$4 sm:$0xff]  }
  0x33   :  { %1359 = vmatpush2.bf16.msra.mxu1 %v2094_v28  ;;  %1071 = vmatprep.subr.bf16.mxu0 %v2293_v0  ;;  %v2190_v28 = vld [vmem:[%s3181_s0 + $0x1c8] ss:$16 sps:$4 sm:$0xff]  }
  0x34   :  { %1360 = vmatprep.subr.bf16.mxu1 %v2293_v0 }
  0x36   :  { %1072 = vmatpush2.bf16.msra.mxu0 %v2095_v29  ;;  %v2191_v29 = vld [vmem:[%s3181_s0 + $0x1e4] ss:$16 sps:$4 sm:$0xff]  }
  0x37   :  { %1361 = vmatpush2.bf16.msra.mxu1 %v2096_v30  ;;  %1073 = vmatprep.subr.bf16.mxu0 %v2293_v0  ;;  %v2193_v30 = vld [vmem:[%s3181_s0 + $0x1ec] ss:$16 sps:$4 sm:$0xff]  }
  0x38   :  { %1362 = vmatprep.subr.bf16.mxu1 %v2293_v0 }
  0x3a   :  { %1074 = vmatpush2.bf16.msra.mxu0 %v2097_v31  ;;  %v2195_v31 = vld [vmem:[%s3181_s0 + $0x1e0] ss:$16 sps:$4 sm:$0xff]  }
  0x3b   :  { %1363 = vmatpush2.bf16.msra.mxu1 %v2098_v32  ;;  %1075 = vmatprep.subr.bf16.mxu0 %v2293_v0  ;;  %v2196_v32 = vld [vmem:[%s3181_s0 + $0x1e8] ss:$16 sps:$4 sm:$0xff]  }
  0x3c   :  { %1364 = vmatprep.subr.bf16.mxu1 %v2293_v0  ;;  %v2148_v0 = vld [vmem:[%s3181_s0 + $0xe8] ss:$16 sps:$4 sm:$0xff]  }
  0x3e   :  { %1076 = vmatpush2.bf16.msra.mxu0 %v2099_v33  ;;  %v2197_v33 = vld [vmem:[%s3181_s0 + $0x204] ss:$16 sps:$4 sm:$0xff]  }
  0x3f   :  { %1365 = vmatpush2.bf16.msra.mxu1 %v2100_v34  ;;  %v2199_v34 = vld [vmem:[%s3181_s0 + $0x20c] ss:$16 sps:$4 sm:$0xff]  }
  0x41   :  { %1078 = vmatmul.mubr.bf16.vlgmr.msra.gmra.mxu0 %v2101_v35  ;;  %v2201_v35 = vld [vmem:[%s3181_s0 + $0x200] ss:$16 sps:$4 sm:$0xff]  }
  0x42   :  { %1367 = vmatmul.mubr.bf16.vlgmr.msra.gmra.mxu1 %v2104_v36  ;;  %1085 = vmatprep.mubr.bf16.mxu0 %v2107_v37  ;;  %v2202_v36 = vld [vmem:[%s3181_s0 + $0x208] ss:$16 sps:$4 sm:$0xff]   ;;  %v2203_v37 = vld [vmem:[%s3181_s0 + $0x224] ss:$16 sps:$4 sm:$0xff]  }
  0x43   :  { %1374 = vmatprep.mubr.bf16.mxu1 %v2109_v38  ;;  %v2205_v38 = vld [vmem:[%s3181_s0 + $0x22c] ss:$16 sps:$4 sm:$0xff]  }
  0x49   :  { %1086 = vmatmul.mubr.bf16.gmra.mxu0 %v2111_v39  ;;  %v2207_v39 = vld [vmem:[%s3181_s0 + $0x220] ss:$16 sps:$4 sm:$0xff]  }
  0x4a   :  { %1375 = vmatmul.mubr.bf16.gmra.mxu1 %v2112_v40  ;;  %1093 = vmatprep.mubr.bf16.mxu0 %v2113_v41  ;;  %v2208_v40 = vld [vmem:[%s3181_s0 + $0x228] ss:$16 sps:$4 sm:$0xff]   ;;  %v2209_v41 = vld [vmem:[%s3181_s0 + $0x244] ss:$16 sps:$4 sm:$0xff]  }
  0x4b   :  { %1382 = vmatprep.mubr.bf16.mxu1 %v2115_v42  ;;  %v2211_v42 = vld [vmem:[%s3181_s0 + $0x24c] ss:$16 sps:$4 sm:$0xff]  }
  0x51   :  { %1094 = vmatmul.mubr.bf16.gmra.mxu0 %v2117_v43  ;;  %v2213_v43 = vld [vmem:[%s3181_s0 + $0x240] ss:$16 sps:$4 sm:$0xff]  }
  0x52   :  { %1383 = vmatmul.mubr.bf16.gmra.mxu1 %v2118_v44  ;;  %1101 = vmatprep.mubr.bf16.mxu0 %v2119_v45  ;;  %v2214_v44 = vld [vmem:[%s3181_s0 + $0x248] ss:$16 sps:$4 sm:$0xff]   ;;  %v2215_v45 = vld [vmem:[%s3181_s0 + $0x264] ss:$16 sps:$4 sm:$0xff]  }
  0x53   :  { %1390 = vmatprep.mubr.bf16.mxu1 %v2121_v46  ;;  %v2217_v46 = vld [vmem:[%s3181_s0 + $0x26c] ss:$16 sps:$4 sm:$0xff]  }
  0x59   :  { %1102 = vmatmul.mubr.bf16.gmra.mxu0 %v2123_v47  ;;  %v2219_v47 = vld [vmem:[%s3181_s0 + $0x260] ss:$16 sps:$4 sm:$0xff]  }
  0x5a   :  { %1391 = vmatmul.mubr.bf16.gmra.mxu1 %v2124_v48  ;;  %1109 = vmatprep.mubr.bf16.mxu0 %v2125_v49  ;;  %v2220_v48 = vld [vmem:[%s3181_s0 + $0x268] ss:$16 sps:$4 sm:$0xff]   ;;  %v2221_v49 = vld [vmem:[%s3181_s0 + $0x284] ss:$16 sps:$4 sm:$0xff]  }
  0x5b   :  { %1398 = vmatprep.mubr.bf16.mxu1 %v2127_v50  ;;  %v2223_v50 = vld [vmem:[%s3181_s0 + $0x28c] ss:$16 sps:$4 sm:$0xff]  }
  0x61   :  { %1110 = vmatmul.mubr.bf16.gmra.mxu0 %v2129_v51  ;;  %v2225_v51 = vld [vmem:[%s3181_s0 + $0x280] ss:$16 sps:$4 sm:$0xff]  }
  0x62   :  { %1399 = vmatmul.mubr.bf16.gmra.mxu1 %v2130_v52  ;;  %1117 = vmatprep.mubr.bf16.mxu0 %v2131_v53  ;;  %v2226_v52 = vld [vmem:[%s3181_s0 + $0x288] ss:$16 sps:$4 sm:$0xff]   ;;  %v2227_v53 = vld [vmem:[%s3181_s0 + $0x2a4] ss:$16 sps:$4 sm:$0xff]  }
  0x63   :  { %1406 = vmatprep.mubr.bf16.mxu1 %v2133_v54  ;;  %v2229_v54 = vld [vmem:[%s3181_s0 + $0x2ac] ss:$16 sps:$4 sm:$0xff]  }
  0x69   :  { %1118 = vmatmul.mubr.bf16.gmra.mxu0 %v2135_v55  ;;  %v2231_v55 = vld [vmem:[%s3181_s0 + $0x2a0] ss:$16 sps:$4 sm:$0xff]  }
  0x6a   :  { %1407 = vmatmul.mubr.bf16.gmra.mxu1 %v2136_v56  ;;  %1125 = vmatprep.mubr.bf16.mxu0 %v2137_v57  ;;  %v2232_v56 = vld [vmem:[%s3181_s0 + $0x2a8] ss:$16 sps:$4 sm:$0xff]   ;;  %v2233_v57 = vld [vmem:[%s3181_s0 + $0x2c4] ss:$16 sps:$4 sm:$0xff]  }
  0x6b   :  { %1414 = vmatprep.mubr.bf16.mxu1 %v2139_v58  ;;  %v2235_v58 = vld [vmem:[%s3181_s0 + $0x2cc] ss:$16 sps:$4 sm:$0xff]  }
  0x71   :  { %1126 = vmatmul.mubr.bf16.gmra.mxu0 %v2141_v59  ;;  %v2237_v59 = vld [vmem:[%s3181_s0 + $0x2c0] ss:$16 sps:$4 sm:$0xff]  }
  0x72   :  { %1415 = vmatmul.mubr.bf16.gmra.mxu1 %v2142_v60  ;;  %1133 = vmatprep.mubr.bf16.mxu0 %v2143_v61  ;;  %v2238_v60 = vld [vmem:[%s3181_s0 + $0x2c8] ss:$16 sps:$4 sm:$0xff]   ;;  %v2239_v61 = vld [vmem:[%s3181_s0 + $0x2e4] ss:$16 sps:$4 sm:$0xff]  }
  0x73   :  { %1422 = vmatprep.mubr.bf16.mxu1 %v2145_v62  ;;  %v2241_v62 = vld [vmem:[%s3181_s0 + $0x2ec] ss:$16 sps:$4 sm:$0xff]  }
  0x79   :  { %1134 = vmatmul.mubr.bf16.gmra.mxu0 %v2147_v63  ;;  %v2243_v63 = vld [vmem:[%s3181_s0 + $0x2e0] ss:$16 sps:$4 sm:$0xff]  }
  0x7a   :  { %1423 = vmatmul.mubr.bf16.gmra.mxu1 %v2148_v0  ;;  %1141 = vmatprep.mubr.bf16.mxu0 %v2149_v1  ;;  %v2244_v0 = vld [vmem:[%s3181_s0 + $0x2e8] ss:$16 sps:$4 sm:$0xff]   ;;  %v2245_v1 = vld [vmem:[%s3181_s0 + $0x304] ss:$16 sps:$4 sm:$0xff]  }
  0x7b   :  { %1430 = vmatprep.mubr.bf16.mxu1 %v2151_v2  ;;  %v2247_v2 = vld [vmem:[%s3181_s0 + $0x30c] ss:$16 sps:$4 sm:$0xff]  }
  0x81   :  { %1142 = vmatmul.mubr.bf16.gmra.mxu0 %v2153_v3  ;;  %v2249_v3 = vld [vmem:[%s3181_s0 + $0x300] ss:$16 sps:$4 sm:$0xff]  }
  0x82   :  { %1431 = vmatmul.mubr.bf16.gmra.mxu1 %v2154_v4  ;;  %1149 = vmatprep.mubr.bf16.mxu0 %v2155_v5  ;;  %v2250_v4 = vld [vmem:[%s3181_s0 + $0x308] ss:$16 sps:$4 sm:$0xff]   ;;  %v2251_v5 = vld [vmem:[%s3181_s0 + $0x324] ss:$16 sps:$4 sm:$0xff]  }
  0x83   :  { %1438 = vmatprep.mubr.bf16.mxu1 %v2157_v6  ;;  %v2253_v6 = vld [vmem:[%s3181_s0 + $0x32c] ss:$16 sps:$4 sm:$0xff]  }
  0x89   :  { %1150 = vmatmul.mubr.bf16.gmra.mxu0 %v2159_v7 }
  0x8a   :  { %1439 = vmatmul.mubr.bf16.gmra.mxu1 %v2160_v8  ;;  %1157 = vmatprep.mubr.bf16.mxu0 %v2161_v9 }
  0x8b   :  { %1446 = vmatprep.mubr.bf16.mxu1 %v2163_v10 }
  0x91   :  { %1158 = vmatmul.mubr.bf16.gmra.mxu0 %v2165_v11 }
  0x92   :  { %1447 = vmatmul.mubr.bf16.gmra.mxu1 %v2166_v12  ;;  %1165 = vmatprep.mubr.bf16.mxu0 %v2167_v13  ;;  %v2255_v13 = vld [vmem:[%s3181_s0 + $0x320] ss:$16 sps:$4 sm:$0xff]  }
  0x93   :  { %1454 = vmatprep.mubr.bf16.mxu1 %v2169_v14 }
  0x99   :  { %1166 = vmatmul.mubr.bf16.gmra.mxu0 %v2171_v15  ;;  %v2256_v15 = vld [vmem:[%s3181_s0 + $0x328] ss:$16 sps:$4 sm:$0xff]  }
  0x9a   :  { %1455 = vmatmul.mubr.bf16.gmra.mxu1 %v2172_v16  ;;  %1173 = vmatprep.mubr.bf16.mxu0 %v2173_v17  ;;  %v2257_v16 = vld [vmem:[%s3181_s0 + $0x344] ss:$16 sps:$4 sm:$0xff]  }
  0x9b   :  { %1462 = vmatprep.mubr.bf16.mxu1 %v2175_v18 }
  0xa1   :  { %1174 = vmatmul.mubr.bf16.gmra.mxu0 %v2177_v19  ;;  %v2259_v19 = vld [vmem:[%s3181_s0 + $0x34c] ss:$16 sps:$4 sm:$0xff]  }
  0xa2   :  { %1463 = vmatmul.mubr.bf16.gmra.mxu1 %v2178_v20  ;;  %1181 = vmatprep.mubr.bf16.mxu0 %v2179_v21 }
  0xa3   :  { %1470 = vmatprep.mubr.bf16.mxu1 %v2181_v22 }
  0xa9   :  { %1182 = vmatmul.mubr.bf16.gmra.mxu0 %v2183_v23 }
  0xaa   :  { %1471 = vmatmul.mubr.bf16.gmra.mxu1 %v2184_v24  ;;  %1189 = vmatprep.mubr.bf16.mxu0 %v2185_v25 }
  0xab   :  { %1478 = vmatprep.mubr.bf16.mxu1 %v2187_v26 }
  0xb1   :  { %1190 = vmatmul.mubr.bf16.gmra.mxu0 %v2189_v27 }
  0xb2   :  { %1479 = vmatmul.mubr.bf16.gmra.mxu1 %v2190_v28  ;;  %1197 = vmatprep.mubr.bf16.mxu0 %v2191_v29 }
  0xb3   :  { %1486 = vmatprep.mubr.bf16.mxu1 %v2193_v30 }
  0xb9   :  { %1198 = vmatmul.mubr.bf16.gmra.mxu0 %v2195_v31 }
  0xba   :  { %1487 = vmatmul.mubr.bf16.gmra.mxu1 %v2196_v32  ;;  %1205 = vmatprep.mubr.bf16.mxu0 %v2197_v33  ;;  %v2261_v33 = vld [vmem:[%s3181_s0 + $0x340] ss:$16 sps:$4 sm:$0xff]  }
  0xbb   :  { %1494 = vmatprep.mubr.bf16.mxu1 %v2199_v34 }
  0xc1   :  { %1206 = vmatmul.mubr.bf16.gmra.mxu0 %v2201_v35  ;;  %v2262_v35 = vld [vmem:[%s3181_s0 + $0x348] ss:$16 sps:$4 sm:$0xff]  }
  0xc2   :  { %1495 = vmatmul.mubr.bf16.gmra.mxu1 %v2202_v36  ;;  %1213 = vmatprep.mubr.bf16.mxu0 %v2203_v37  ;;  %v2263_v36 = vld [vmem:[%s3181_s0 + $0x364] ss:$16 sps:$4 sm:$0xff]  }
  0xc3   :  { %1502 = vmatprep.mubr.bf16.mxu1 %v2205_v38 }
  0xc9   :  { %1214 = vmatmul.mubr.bf16.gmra.mxu0 %v2207_v39 }
  0xca   :  { %1503 = vmatmul.mubr.bf16.gmra.mxu1 %v2208_v40  ;;  %1221 = vmatprep.mubr.bf16.mxu0 %v2209_v41  ;;  %v2265_v40 = vld [vmem:[%s3181_s0 + $0x36c] ss:$16 sps:$4 sm:$0xff]  }
  0xcb   :  { %1510 = vmatprep.mubr.bf16.mxu1 %v2211_v42 }
  0xd1   :  { %1222 = vmatmul.mubr.bf16.gmra.mxu0 %v2213_v43 }
  0xd2   :  { %1511 = vmatmul.mubr.bf16.gmra.mxu1 %v2214_v44  ;;  %1229 = vmatprep.mubr.bf16.mxu0 %v2215_v45 }
  0xd3   :  { %1518 = vmatprep.mubr.bf16.mxu1 %v2217_v46 }
  0xd9   :  { %1230 = vmatmul.mubr.bf16.gmra.mxu0 %v2219_v47 }
  0xda   :  { %1519 = vmatmul.mubr.bf16.gmra.mxu1 %v2220_v48  ;;  %1237 = vmatprep.mubr.bf16.mxu0 %v2221_v49 }
  0xdb   :  { %1526 = vmatprep.mubr.bf16.mxu1 %v2223_v50 }
  0xe1   :  { %1238 = vmatmul.mubr.bf16.gmra.mxu0 %v2225_v51 }
  0xe2   :  { %1527 = vmatmul.mubr.bf16.gmra.mxu1 %v2226_v52  ;;  %1245 = vmatprep.mubr.bf16.mxu0 %v2227_v53  ;;  %v2267_v53 = vld [vmem:[%s3181_s0 + $0x360] ss:$16 sps:$4 sm:$0xff]  }
  0xe3   :  { %1534 = vmatprep.mubr.bf16.mxu1 %v2229_v54 }
  0xe9   :  { %1246 = vmatmul.mubr.bf16.gmra.mxu0 %v2231_v55  ;;  %v2268_v55 = vld [vmem:[%s3181_s0 + $0x368] ss:$16 sps:$4 sm:$0xff]  }
  0xea   :  { %1535 = vmatmul.mubr.bf16.gmra.mxu1 %v2232_v56  ;;  %1253 = vmatprep.mubr.bf16.mxu0 %v2233_v57  ;;  %v2271_v56 = vld [vmem:[%s3181_s0 + $0x384] ss:$16 sps:$4 sm:$0xff]  }
  0xeb   :  { %1542 = vmatprep.mubr.bf16.mxu1 %v2235_v58 }
  0xf1   :  { %1254 = vmatmul.mubr.bf16.gmra.mxu0 %v2237_v59 }
  0xf2   :  { %1543 = vmatmul.mubr.bf16.gmra.mxu1 %v2238_v60  ;;  %1261 = vmatprep.mubr.bf16.mxu0 %v2239_v61  ;;  %v2274_v60 = vld [vmem:[%s3181_s0 + $0x38c] ss:$16 sps:$4 sm:$0xff]  }
  0xf3   :  { %1550 = vmatprep.mubr.bf16.mxu1 %v2241_v62 }
  0xf9   :  { %1262 = vmatmul.mubr.bf16.gmra.mxu0 %v2243_v63 }
  0xfa   :  { %1551 = vmatmul.mubr.bf16.gmra.mxu1 %v2244_v0  ;;  %1269 = vmatprep.mubr.bf16.mxu0 %v2245_v1 }
  0xfb   :  { %1558 = vmatprep.mubr.bf16.mxu1 %v2247_v2 }
 0x101   :  { %v1079_v7 = vpop.f32.mrf.mxu0  ;;  %1270 = vmatmul.mubr.bf16.gmra.mxu0 %v2249_v3 }
 0x102   :  { %v1368_v8 = vpop.f32.mrf.mxu1  ;;  %1559 = vmatmul.mubr.bf16.gmra.mxu1 %v2250_v4  ;;  %1277 = vmatprep.mubr.bf16.mxu0 %v2251_v5 }
 0x103   :  { %v1369_v9 = vadd.f32 %v1368_v8, %v1079_v7  ;;  %v1081_v10 = vpop.f32.mrf.mxu0  ;;  %1566 = vmatprep.mubr.bf16.mxu1 %v2253_v6 }
 0x104   :  { %v1370_v11 = vpop.f32.mrf.mxu1 }
 0x105   :  { %1623 = vst [vmem:[%s3182_s2] sm:$0xff] %v1369_v9  ;;  %v1082_v12 = vpop.f32.mrf.mxu0  ;;  %v1760_v21 = vmul.f32 %v1369_v9, %v1369_v9  ;;  %v2272_v11 = vld [vmem:[%s3181_s0 + $0x388] ss:$16 sps:$4 sm:$0xff]  }
 0x106   :  { %v1371_v14 = vpop.f32.mrf.mxu1 }
 0x107   :  { %v1372_v17 = vadd.f32 %v1371_v14, %v1082_v12  ;;  %v1084_v18 = vpop.f32.mrf.mxu0  ;;  %v2277_v12 = vld [vmem:[%s3181_s0 + $0x3a4] ss:$16 sps:$4 sm:$0xff]  }
 0x108   :  { %v1373_v20 = vpop.f32.mrf.mxu1 }
 0x109   :  { %1624 = vst [vmem:[%s3182_s2 + $0x8] sm:$0xff] %v1372_v17  ;;  %v1688_v22 = vadd.f32 %v1372_v17, %v1369_v9  ;;  %v1761_v23 = vmul.f32 %v1372_v17, %v1372_v17  ;;  %v1087_v24 = vpop.f32.mrf.mxu0  ;;  %1278 = vmatmul.mubr.bf16.gmra.mxu0 %v2255_v13  ;;  %v2269_v9 = vld [vmem:[%s3181_s0 + $0x380] ss:$16 sps:$4 sm:$0xff]  }
 0x10a   :  { %v1376_v25 = vpop.f32.mrf.mxu1  ;;  %1567 = vmatmul.mubr.bf16.gmra.mxu1 %v2256_v15  ;;  %1285 = vmatprep.mubr.bf16.mxu0 %v2257_v16  ;;  %v2280_v16 = vld [vmem:[%s3181_s0 + $0x3ac] ss:$16 sps:$4 sm:$0xff]  }
 0x10b   :  { %v1824_v26 = vadd.f32 %v1761_v23, %v1760_v21  ;;  %v1377_v27 = vadd.f32 %v1376_v25, %v1087_v24  ;;  %v1089_v28 = vpop.f32.mrf.mxu0  ;;  %1574 = vmatprep.mubr.bf16.mxu1 %v2259_v19 }
 0x10c   :  { %v1378_v29 = vpop.f32.mrf.mxu1 }
 0x10d   :  { %1625 = vst [vmem:[%s3182_s2 + $0x10] sm:$0xff] %v1377_v27  ;;  %v1689_v30 = vadd.f32 %v1688_v22, %v1377_v27  ;;  %v1762_v31 = vmul.f32 %v1377_v27, %v1377_v27  ;;  %v1090_v32 = vpop.f32.mrf.mxu0  ;;  %v2275_v29 = vld [vmem:[%s3181_s0 + $0x3a0] ss:$16 sps:$4 sm:$0xff]  }
 0x10e   :  { %v1379_v34 = vpop.f32.mrf.mxu1 }
 0x10f   :  { %v1825_v37 = vadd.f32 %v1824_v26, %v1762_v31  ;;  %v1380_v38 = vadd.f32 %v1379_v34, %v1090_v32  ;;  %v1092_v39 = vpop.f32.mrf.mxu0  ;;  %v2278_v31 = vld [vmem:[%s3181_s0 + $0x3a8] ss:$16 sps:$4 sm:$0xff]   ;;  %v2283_v32 = vld [vmem:[%s3181_s0 + $0x3c4] ss:$16 sps:$4 sm:$0xff]  }
 0x110   :  { %v1381_v41 = vpop.f32.mrf.mxu1 }
 0x111   :  { %1626 = vst [vmem:[%s3182_s2 + $0x18] sm:$0xff] %v1380_v38  ;;  %v1690_v42 = vadd.f32 %v1689_v30, %v1380_v38  ;;  %v1763_v43 = vmul.f32 %v1380_v38, %v1380_v38  ;;  %v1095_v44 = vpop.f32.mrf.mxu0  ;;  %1286 = vmatmul.mubr.bf16.gmra.mxu0 %v2261_v33 }
 0x112   :  { %v1384_v45 = vpop.f32.mrf.mxu1  ;;  %1575 = vmatmul.mubr.bf16.gmra.mxu1 %v2262_v35  ;;  %1293 = vmatprep.mubr.bf16.mxu0 %v2263_v36  ;;  %v2286_v36 = vld [vmem:[%s3181_s0 + $0x3cc] ss:$16 sps:$4 sm:$0xff]  }
 0x113   :  { %v1826_v46 = vadd.f32 %v1825_v37, %v1763_v43  ;;  %v1385_v47 = vadd.f32 %v1384_v45, %v1095_v44  ;;  %v1097_v48 = vpop.f32.mrf.mxu0  ;;  %1582 = vmatprep.mubr.bf16.mxu1 %v2265_v40 }
 0x114   :  { %v1386_v49 = vpop.f32.mrf.mxu1 }
 0x115   :  { %1627 = vst [vmem:[%s3182_s2 + $0x20] sm:$0xff] %v1385_v47  ;;  %v1691_v50 = vadd.f32 %v1690_v42, %v1385_v47  ;;  %v1764_v51 = vmul.f32 %v1385_v47, %v1385_v47  ;;  %v1098_v52 = vpop.f32.mrf.mxu0  ;;  %v2281_v49 = vld [vmem:[%s3181_s0 + $0x3c0] ss:$16 sps:$4 sm:$0xff]  }
 0x116   :  { %v1387_v54 = vpop.f32.mrf.mxu1 }
 0x117   :  { %v1827_v57 = vadd.f32 %v1826_v46, %v1764_v51  ;;  %v1388_v58 = vadd.f32 %v1387_v54, %v1098_v52  ;;  %v1100_v59 = vpop.f32.mrf.mxu0  ;;  %v2284_v51 = vld [vmem:[%s3181_s0 + $0x3c8] ss:$16 sps:$4 sm:$0xff]   ;;  %v2289_v52 = vld [vmem:[%s3181_s0 + $0x3e4] ss:$16 sps:$4 sm:$0xff]  }
 0x118   :  { %v1389_v61 = vpop.f32.mrf.mxu1 }
 0x119   :  { %1628 = vst [vmem:[%s3182_s2 + $0x28] sm:$0xff] %v1388_v58  ;;  %v1692_v62 = vadd.f32 %v1691_v50, %v1388_v58  ;;  %v1765_v63 = vmul.f32 %v1388_v58, %v1388_v58  ;;  %v1103_v0 = vpop.f32.mrf.mxu0  ;;  %1294 = vmatmul.mubr.bf16.gmra.mxu0 %v2267_v53 }
 0x11a   :  { %v1392_v1 = vpop.f32.mrf.mxu1  ;;  %1583 = vmatmul.mubr.bf16.gmra.mxu1 %v2268_v55  ;;  %1301 = vmatprep.mubr.bf16.mxu0 %v2271_v56  ;;  %v2292_v56 = vld [vmem:[%s3181_s0 + $0x3ec] ss:$16 sps:$4 sm:$0xff]  }
 0x11b   :  { %v1828_v2 = vadd.f32 %v1827_v57, %v1765_v63  ;;  %v1393_v3 = vadd.f32 %v1392_v1, %v1103_v0  ;;  %v1105_v4 = vpop.f32.mrf.mxu0  ;;  %1590 = vmatprep.mubr.bf16.mxu1 %v2274_v60 }
 0x11c   :  { %v1394_v5 = vpop.f32.mrf.mxu1 }
 0x11d   :  { %1629 = vst [vmem:[%s3182_s2 + $0x30] sm:$0xff] %v1393_v3  ;;  %v1693_v6 = vadd.f32 %v1692_v62, %v1393_v3  ;;  %v1766_v7 = vmul.f32 %v1393_v3, %v1393_v3  ;;  %v1106_v8 = vpop.f32.mrf.mxu0  ;;  %v2287_v5 = vld [vmem:[%s3181_s0 + $0x3e0] ss:$16 sps:$4 sm:$0xff]  }
 0x11e   :  { %v1395_v10 = vpop.f32.mrf.mxu1 }
 0x11f   :  { %v1829_v13 = vadd.f32 %v1828_v2, %v1766_v7  ;;  %v1396_v14 = vadd.f32 %v1395_v10, %v1106_v8  ;;  %v1108_v15 = vpop.f32.mrf.mxu0  ;;  %v2290_v7 = vld [vmem:[%s3181_s0 + $0x3e8] ss:$16 sps:$4 sm:$0xff]  }
 0x120   :  { %v1397_v17 = vpop.f32.mrf.mxu1 }
 0x121   :  { %1630 = vst [vmem:[%s3182_s2 + $0x38] sm:$0xff] %v1396_v14  ;;  %v1694_v18 = vadd.f32 %v1693_v6, %v1396_v14  ;;  %v1767_v19 = vmul.f32 %v1396_v14, %v1396_v14  ;;  %v1111_v20 = vpop.f32.mrf.mxu0  ;;  %1302 = vmatmul.mubr.bf16.gmra.mxu0 %v2269_v9 }
 0x122   :  { %v1400_v21 = vpop.f32.mrf.mxu1  ;;  %1591 = vmatmul.mubr.bf16.gmra.mxu1 %v2272_v11  ;;  %1309 = vmatprep.mubr.bf16.mxu0 %v2277_v12 }
 0x123   :  { %v1830_v22 = vadd.f32 %v1829_v13, %v1767_v19  ;;  %v1401_v23 = vadd.f32 %v1400_v21, %v1111_v20  ;;  %v1113_v24 = vpop.f32.mrf.mxu0  ;;  %1598 = vmatprep.mubr.bf16.mxu1 %v2280_v16 }
 0x124   :  { %v1402_v25 = vpop.f32.mrf.mxu1 }
 0x125   :  { %1631 = vst [vmem:[%s3182_s2 + $0x40] sm:$0xff] %v1401_v23  ;;  %v1695_v26 = vadd.f32 %v1694_v18, %v1401_v23  ;;  %v1768_v27 = vmul.f32 %v1401_v23, %v1401_v23  ;;  %v1114_v28 = vpop.f32.mrf.mxu0 }
 0x126   :  { %v1403_v30 = vpop.f32.mrf.mxu1 }
 0x127   :  { %v1831_v33 = vadd.f32 %v1830_v22, %v1768_v27  ;;  %v1404_v34 = vadd.f32 %v1403_v30, %v1114_v28  ;;  %v1116_v35 = vpop.f32.mrf.mxu0 }
 0x128   :  { %v1405_v37 = vpop.f32.mrf.mxu1 }
 0x129   :  { %1632 = vst [vmem:[%s3182_s2 + $0x48] sm:$0xff] %v1404_v34  ;;  %v1696_v38 = vadd.f32 %v1695_v26, %v1404_v34  ;;  %v1769_v39 = vmul.f32 %v1404_v34, %v1404_v34  ;;  %v1119_v40 = vpop.f32.mrf.mxu0  ;;  %1310 = vmatmul.mubr.bf16.gmra.mxu0 %v2275_v29 }
 0x12a   :  { %v1408_v41 = vpop.f32.mrf.mxu1  ;;  %1599 = vmatmul.mubr.bf16.gmra.mxu1 %v2278_v31  ;;  %1317 = vmatprep.mubr.bf16.mxu0 %v2283_v32 }
 0x12b   :  { %v1832_v42 = vadd.f32 %v1831_v33, %v1769_v39  ;;  %v1409_v43 = vadd.f32 %v1408_v41, %v1119_v40  ;;  %v1121_v44 = vpop.f32.mrf.mxu0  ;;  %1606 = vmatprep.mubr.bf16.mxu1 %v2286_v36 }
 0x12c   :  { %v1410_v45 = vpop.f32.mrf.mxu1 }
 0x12d   :  { %1633 = vst [vmem:[%s3182_s2 + $0x50] sm:$0xff] %v1409_v43  ;;  %v1697_v46 = vadd.f32 %v1696_v38, %v1409_v43  ;;  %v1770_v47 = vmul.f32 %v1409_v43, %v1409_v43  ;;  %v1122_v48 = vpop.f32.mrf.mxu0 }
 0x12e   :  { %v1411_v50 = vpop.f32.mrf.mxu1 }
 0x12f   :  { %v1833_v53 = vadd.f32 %v1832_v42, %v1770_v47  ;;  %v1412_v54 = vadd.f32 %v1411_v50, %v1122_v48  ;;  %v1124_v55 = vpop.f32.mrf.mxu0 }
 0x130   :  { %v1413_v57 = vpop.f32.mrf.mxu1 }
 0x131   :  { %1634 = vst [vmem:[%s3182_s2 + $0x58] sm:$0xff] %v1412_v54  ;;  %v1698_v58 = vadd.f32 %v1697_v46, %v1412_v54  ;;  %v1771_v59 = vmul.f32 %v1412_v54, %v1412_v54  ;;  %v1127_v60 = vpop.f32.mrf.mxu0  ;;  %1318 = vmatmul.mubr.bf16.gmra.mxu0 %v2281_v49 }
 0x132   :  { %v1416_v61 = vpop.f32.mrf.mxu1  ;;  %1607 = vmatmul.mubr.bf16.gmra.mxu1 %v2284_v51  ;;  %1325 = vmatprep.mubr.bf16.mxu0 %v2289_v52 }
 0x133   :  { %v1834_v62 = vadd.f32 %v1833_v53, %v1771_v59  ;;  %v1417_v63 = vadd.f32 %v1416_v61, %v1127_v60  ;;  %v1129_v0 = vpop.f32.mrf.mxu0  ;;  %1614 = vmatprep.mubr.bf16.mxu1 %v2292_v56 }
 0x134   :  { %v1418_v1 = vpop.f32.mrf.mxu1 }
 0x135   :  { %1635 = vst [vmem:[%s3182_s2 + $0x60] sm:$0xff] %v1417_v63  ;;  %v1699_v2 = vadd.f32 %v1698_v58, %v1417_v63  ;;  %v1772_v3 = vmul.f32 %v1417_v63, %v1417_v63  ;;  %v1130_v4 = vpop.f32.mrf.mxu0 }
 0x136   :  { %v1419_v6 = vpop.f32.mrf.mxu1 }
 0x137   :  { %v1835_v8 = vadd.f32 %v1834_v62, %v1772_v3  ;;  %v1420_v9 = vadd.f32 %v1419_v6, %v1130_v4  ;;  %v1132_v10 = vpop.f32.mrf.mxu0 }
 0x138   :  { %v1421_v11 = vpop.f32.mrf.mxu1 }
 0x139   :  { %1636 = vst [vmem:[%s3182_s2 + $0x68] sm:$0xff] %v1420_v9  ;;  %v1700_v12 = vadd.f32 %v1699_v2, %v1420_v9  ;;  %v1773_v13 = vmul.f32 %v1420_v9, %v1420_v9  ;;  %v1135_v14 = vpop.f32.mrf.mxu0  ;;  %1326 = vmatmul.mubr.bf16.gmra.mxu0 %v2287_v5 }
 0x13a   :  { %v1424_v15 = vpop.f32.mrf.mxu1  ;;  %1615 = vmatmul.mubr.bf16.gmra.mxu1 %v2290_v7 }
 0x13b   :  { %v1836_v16 = vadd.f32 %v1835_v8, %v1773_v13  ;;  %v1425_v17 = vadd.f32 %v1424_v15, %v1135_v14  ;;  %v1137_v18 = vpop.f32.mrf.mxu0 }
 0x13c   :  { %v1426_v19 = vpop.f32.mrf.mxu1 }
 0x13d   :  { %1637 = vst [vmem:[%s3182_s2 + $0x70] sm:$0xff] %v1425_v17  ;;  %v1701_v20 = vadd.f32 %v1700_v12, %v1425_v17  ;;  %v1774_v21 = vmul.f32 %v1425_v17, %v1425_v17  ;;  %v1138_v22 = vpop.f32.mrf.mxu0 }
 0x13e   :  { %v1427_v23 = vpop.f32.mrf.mxu1 }
 0x13f   :  { %v1837_v24 = vadd.f32 %v1836_v16, %v1774_v21  ;;  %v1428_v25 = vadd.f32 %v1427_v23, %v1138_v22  ;;  %v1140_v26 = vpop.f32.mrf.mxu0 }
 0x140   :  { %v1429_v27 = vpop.f32.mrf.mxu1 }
 0x141   :  { %1638 = vst [vmem:[%s3182_s2 + $0x78] sm:$0xff] %v1428_v25  ;;  %v1702_v28 = vadd.f32 %v1701_v20, %v1428_v25  ;;  %v1775_v29 = vmul.f32 %v1428_v25, %v1428_v25  ;;  %v1143_v30 = vpop.f32.mrf.mxu0 }
 0x142   :  { %v1432_v31 = vpop.f32.mrf.mxu1 }
 0x143   :  { %v1838_v32 = vadd.f32 %v1837_v24, %v1775_v29  ;;  %v1433_v33 = vadd.f32 %v1432_v31, %v1143_v30  ;;  %v1145_v34 = vpop.f32.mrf.mxu0 }
 0x144   :  { %v1434_v35 = vpop.f32.mrf.mxu1 }
 0x145   :  { %1639 = vst [vmem:[%s3182_s2 + $0x80] sm:$0xff] %v1433_v33  ;;  %v1703_v36 = vadd.f32 %v1702_v28, %v1433_v33  ;;  %v1776_v37 = vmul.f32 %v1433_v33, %v1433_v33  ;;  %v1146_v38 = vpop.f32.mrf.mxu0 }
 0x146   :  { %v1435_v39 = vpop.f32.mrf.mxu1 }
 0x147   :  { %v1839_v40 = vadd.f32 %v1838_v32, %v1776_v37  ;;  %v1436_v41 = vadd.f32 %v1435_v39, %v1146_v38  ;;  %v1148_v42 = vpop.f32.mrf.mxu0 }
 0x148   :  { %v1437_v43 = vpop.f32.mrf.mxu1 }
 0x149   :  { %1640 = vst [vmem:[%s3182_s2 + $0x88] sm:$0xff] %v1436_v41  ;;  %v1704_v44 = vadd.f32 %v1703_v36, %v1436_v41  ;;  %v1777_v45 = vmul.f32 %v1436_v41, %v1436_v41  ;;  %v1151_v46 = vpop.f32.mrf.mxu0 }
 0x14a   :  { %v1440_v47 = vpop.f32.mrf.mxu1 }
 0x14b   :  { %v1840_v48 = vadd.f32 %v1839_v40, %v1777_v45  ;;  %v1441_v49 = vadd.f32 %v1440_v47, %v1151_v46  ;;  %v1153_v50 = vpop.f32.mrf.mxu0 }
 0x14c   :  { %v1442_v51 = vpop.f32.mrf.mxu1 }
 0x14d   :  { %1641 = vst [vmem:[%s3182_s2 + $0x90] sm:$0xff] %v1441_v49  ;;  %v1705_v52 = vadd.f32 %v1704_v44, %v1441_v49  ;;  %v1778_v53 = vmul.f32 %v1441_v49, %v1441_v49  ;;  %v1154_v54 = vpop.f32.mrf.mxu0 }
 0x14e   :  { %v1443_v55 = vpop.f32.mrf.mxu1 }
 0x14f   :  { %v1841_v56 = vadd.f32 %v1840_v48, %v1778_v53  ;;  %v1444_v57 = vadd.f32 %v1443_v55, %v1154_v54  ;;  %v1156_v58 = vpop.f32.mrf.mxu0 }
 0x150   :  { %v1445_v59 = vpop.f32.mrf.mxu1 }
 0x151   :  { %1642 = vst [vmem:[%s3182_s2 + $0x98] sm:$0xff] %v1444_v57  ;;  %v1706_v60 = vadd.f32 %v1705_v52, %v1444_v57  ;;  %v1779_v61 = vmul.f32 %v1444_v57, %v1444_v57  ;;  %v1159_v62 = vpop.f32.mrf.mxu0 }
 0x152   :  { %v1448_v63 = vpop.f32.mrf.mxu1 }
 0x153   :  { %v1842_v0 = vadd.f32 %v1841_v56, %v1779_v61  ;;  %v1449_v1 = vadd.f32 %v1448_v63, %v1159_v62  ;;  %v1161_v2 = vpop.f32.mrf.mxu0 }
 0x154   :  { %v1450_v3 = vpop.f32.mrf.mxu1 }
 0x155   :  { %1643 = vst [vmem:[%s3182_s2 + $0xa0] sm:$0xff] %v1449_v1  ;;  %v1707_v4 = vadd.f32 %v1706_v60, %v1449_v1  ;;  %v1780_v5 = vmul.f32 %v1449_v1, %v1449_v1  ;;  %v1162_v6 = vpop.f32.mrf.mxu0 }
 0x156   :  { %v1451_v7 = vpop.f32.mrf.mxu1 }
 0x157   :  { %v1843_v8 = vadd.f32 %v1842_v0, %v1780_v5  ;;  %v1452_v9 = vadd.f32 %v1451_v7, %v1162_v6  ;;  %v1164_v10 = vpop.f32.mrf.mxu0 }
 0x158   :  { %v1453_v11 = vpop.f32.mrf.mxu1 }
 0x159   :  { %1644 = vst [vmem:[%s3182_s2 + $0xa8] sm:$0xff] %v1452_v9  ;;  %v1708_v12 = vadd.f32 %v1707_v4, %v1452_v9  ;;  %v1781_v13 = vmul.f32 %v1452_v9, %v1452_v9  ;;  %v1167_v14 = vpop.f32.mrf.mxu0 }
 0x15a   :  { %v1456_v15 = vpop.f32.mrf.mxu1 }
 0x15b   :  { %v1844_v16 = vadd.f32 %v1843_v8, %v1781_v13  ;;  %v1457_v17 = vadd.f32 %v1456_v15, %v1167_v14  ;;  %v1169_v18 = vpop.f32.mrf.mxu0 }
 0x15c   :  { %v1458_v19 = vpop.f32.mrf.mxu1 }
 0x15d   :  { %1645 = vst [vmem:[%s3182_s2 + $0xb0] sm:$0xff] %v1457_v17  ;;  %v1709_v20 = vadd.f32 %v1708_v12, %v1457_v17  ;;  %v1782_v21 = vmul.f32 %v1457_v17, %v1457_v17  ;;  %v1170_v22 = vpop.f32.mrf.mxu0 }
 0x15e   :  { %v1459_v23 = vpop.f32.mrf.mxu1 }
 0x15f   :  { %v1845_v24 = vadd.f32 %v1844_v16, %v1782_v21  ;;  %v1460_v25 = vadd.f32 %v1459_v23, %v1170_v22  ;;  %v1172_v26 = vpop.f32.mrf.mxu0 }
 0x160   :  { %v1461_v27 = vpop.f32.mrf.mxu1 }
 0x161   :  { %1646 = vst [vmem:[%s3182_s2 + $0xb8] sm:$0xff] %v1460_v25  ;;  %v1710_v28 = vadd.f32 %v1709_v20, %v1460_v25  ;;  %v1783_v29 = vmul.f32 %v1460_v25, %v1460_v25  ;;  %v1175_v30 = vpop.f32.mrf.mxu0 }
 0x162   :  { %v1464_v31 = vpop.f32.mrf.mxu1 }
 0x163   :  { %v1846_v32 = vadd.f32 %v1845_v24, %v1783_v29  ;;  %v1465_v33 = vadd.f32 %v1464_v31, %v1175_v30  ;;  %v1177_v34 = vpop.f32.mrf.mxu0 }
 0x164   :  { %v1466_v35 = vpop.f32.mrf.mxu1 }
 0x165   :  { %1647 = vst [vmem:[%s3182_s2 + $0xc0] sm:$0xff] %v1465_v33  ;;  %v1711_v36 = vadd.f32 %v1710_v28, %v1465_v33  ;;  %v1784_v37 = vmul.f32 %v1465_v33, %v1465_v33  ;;  %v1178_v38 = vpop.f32.mrf.mxu0  ;;  %v2294_v28 = vmov 0.0  }
 0x166   :  { %v1467_v39 = vpop.f32.mrf.mxu1  ;;  %19 = vst [vmem:[%s3183_s3] sm:$0x1] %v2294_v28  ;;  %20 = vst [vmem:[%s3184_s4] sm:$0x1] %v2294_v28 }
 0x167   :  { %v1847_v40 = vadd.f32 %v1846_v32, %v1784_v37  ;;  %v1468_v41 = vadd.f32 %v1467_v39, %v1178_v38  ;;  %v1180_v42 = vpop.f32.mrf.mxu0 }
 0x168   :  { %v1469_v43 = vpop.f32.mrf.mxu1 }
 0x169   :  { %1648 = vst [vmem:[%s3182_s2 + $0xc8] sm:$0xff] %v1468_v41  ;;  %v1712_v44 = vadd.f32 %v1711_v36, %v1468_v41  ;;  %v1785_v45 = vmul.f32 %v1468_v41, %v1468_v41  ;;  %v1183_v46 = vpop.f32.mrf.mxu0 }
 0x16a   :  { %v1472_v47 = vpop.f32.mrf.mxu1 }
 0x16b   :  { %v1848_v48 = vadd.f32 %v1847_v40, %v1785_v45  ;;  %v1473_v49 = vadd.f32 %v1472_v47, %v1183_v46  ;;  %v1185_v50 = vpop.f32.mrf.mxu0 }
 0x16c   :  { %v1474_v51 = vpop.f32.mrf.mxu1 }
 0x16d   :  { %1649 = vst [vmem:[%s3182_s2 + $0xd0] sm:$0xff] %v1473_v49  ;;  %v1713_v52 = vadd.f32 %v1712_v44, %v1473_v49  ;;  %v1786_v53 = vmul.f32 %v1473_v49, %v1473_v49  ;;  %v1186_v54 = vpop.f32.mrf.mxu0 }
 0x16e   :  { %v1475_v55 = vpop.f32.mrf.mxu1 }
 0x16f   :  { %v1849_v56 = vadd.f32 %v1848_v48, %v1786_v53  ;;  %v1476_v57 = vadd.f32 %v1475_v55, %v1186_v54  ;;  %v1188_v58 = vpop.f32.mrf.mxu0 }
 0x170   :  { %v1477_v59 = vpop.f32.mrf.mxu1 }
 0x171   :  { %1650 = vst [vmem:[%s3182_s2 + $0xd8] sm:$0xff] %v1476_v57  ;;  %v1714_v60 = vadd.f32 %v1713_v52, %v1476_v57  ;;  %v1787_v61 = vmul.f32 %v1476_v57, %v1476_v57  ;;  %v1191_v62 = vpop.f32.mrf.mxu0 }
 0x172   :  { %v1480_v63 = vpop.f32.mrf.mxu1 }
 0x173   :  { %v1850_v0 = vadd.f32 %v1849_v56, %v1787_v61  ;;  %v1481_v1 = vadd.f32 %v1480_v63, %v1191_v62  ;;  %v1193_v2 = vpop.f32.mrf.mxu0 }
 0x174   :  { %v1482_v3 = vpop.f32.mrf.mxu1 }
 0x175   :  { %1651 = vst [vmem:[%s3182_s2 + $0xe0] sm:$0xff] %v1481_v1  ;;  %v1715_v4 = vadd.f32 %v1714_v60, %v1481_v1  ;;  %v1788_v5 = vmul.f32 %v1481_v1, %v1481_v1  ;;  %v1194_v6 = vpop.f32.mrf.mxu0 }
 0x176   :  { %v1483_v7 = vpop.f32.mrf.mxu1 }
 0x177   :  { %v1851_v8 = vadd.f32 %v1850_v0, %v1788_v5  ;;  %v1484_v9 = vadd.f32 %v1483_v7, %v1194_v6  ;;  %v1196_v10 = vpop.f32.mrf.mxu0 }
 0x178   :  { %v1485_v11 = vpop.f32.mrf.mxu1 }
 0x179   :  { %1652 = vst [vmem:[%s3182_s2 + $0xe8] sm:$0xff] %v1484_v9  ;;  %v1716_v12 = vadd.f32 %v1715_v4, %v1484_v9  ;;  %v1789_v13 = vmul.f32 %v1484_v9, %v1484_v9  ;;  %v1199_v14 = vpop.f32.mrf.mxu0 }
 0x17a   :  { %v1488_v15 = vpop.f32.mrf.mxu1 }
 0x17b   :  { %v1852_v16 = vadd.f32 %v1851_v8, %v1789_v13  ;;  %v1489_v17 = vadd.f32 %v1488_v15, %v1199_v14  ;;  %v1201_v18 = vpop.f32.mrf.mxu0 }
 0x17c   :  { %v1490_v19 = vpop.f32.mrf.mxu1 }
 0x17d   :  { %1653 = vst [vmem:[%s3182_s2 + $0xf0] sm:$0xff] %v1489_v17  ;;  %v1717_v20 = vadd.f32 %v1716_v12, %v1489_v17  ;;  %v1790_v21 = vmul.f32 %v1489_v17, %v1489_v17  ;;  %v1202_v22 = vpop.f32.mrf.mxu0 }
 0x17e   :  { %v1491_v23 = vpop.f32.mrf.mxu1 }
 0x17f   :  { %v1853_v24 = vadd.f32 %v1852_v16, %v1790_v21  ;;  %v1492_v25 = vadd.f32 %v1491_v23, %v1202_v22  ;;  %v1204_v26 = vpop.f32.mrf.mxu0 }
 0x180   :  { %v1493_v27 = vpop.f32.mrf.mxu1 }
 0x181   :  { %1654 = vst [vmem:[%s3182_s2 + $0xf8] sm:$0xff] %v1492_v25  ;;  %v2934_v29 = vadd.f32 %v1717_v20, %v1492_v25  ;;  %v1791_v30 = vmul.f32 %v1492_v25, %v1492_v25  ;;  %v1207_v31 = vpop.f32.mrf.mxu0 }
 0x182   :  { %v1496_v32 = vpop.f32.mrf.mxu1 }
 0x183   :  { %v2936_v33 = vadd.f32 %v1853_v24, %v1791_v30  ;;  %v2938_v34 = vadd.f32 %v1496_v32, %v1207_v31  ;;  %v1209_v35 = vpop.f32.mrf.mxu0 }
 0x184   :  { %v1498_v36 = vpop.f32.mrf.mxu1 }
 0x185   :  { %1655 = vst [vmem:[%s3182_s2 + $0x100] sm:$0xff] %v2938_v34  ;;  %v1210_v37 = vpop.f32.mrf.mxu0 }
 0x186   :  { %v1499_v38 = vpop.f32.mrf.mxu1 }
 0x187   :  { %v2944_v39 = vadd.f32 %v1499_v38, %v1210_v37  ;;  %v1212_v40 = vpop.f32.mrf.mxu0 }
 0x188   :  { %v1501_v41 = vpop.f32.mrf.mxu1 }
 0x189   :  { %1656 = vst [vmem:[%s3182_s2 + $0x108] sm:$0xff] %v2944_v39  ;;  %v1215_v42 = vpop.f32.mrf.mxu0 }
 0x18a   :  { %v1504_v43 = vpop.f32.mrf.mxu1 }
 0x18b   :  { %v2950_v44 = vadd.f32 %v1504_v43, %v1215_v42  ;;  %v1217_v45 = vpop.f32.mrf.mxu0 }
 0x18c   :  { %v1506_v46 = vpop.f32.mrf.mxu1 }
 0x18d   :  { %1657 = vst [vmem:[%s3182_s2 + $0x110] sm:$0xff] %v2950_v44  ;;  %v1218_v47 = vpop.f32.mrf.mxu0 }
 0x18e   :  { %v1507_v48 = vpop.f32.mrf.mxu1 }
 0x18f   :  { %v2956_v49 = vadd.f32 %v1507_v48, %v1218_v47  ;;  %v1220_v50 = vpop.f32.mrf.mxu0 }
 0x190   :  { %v1509_v51 = vpop.f32.mrf.mxu1 }
 0x191   :  { %1658 = vst [vmem:[%s3182_s2 + $0x118] sm:$0xff] %v2956_v49  ;;  %v1223_v52 = vpop.f32.mrf.mxu0 }
 0x192   :  { %v1512_v53 = vpop.f32.mrf.mxu1 }
 0x193   :  { %v2962_v54 = vadd.f32 %v1512_v53, %v1223_v52  ;;  %v1225_v55 = vpop.f32.mrf.mxu0 }
 0x194   :  { %v1514_v56 = vpop.f32.mrf.mxu1  ;;  %v1792_v55 = vmul.f32 %v2938_v34, %v2938_v34 }
 0x195   :  { %1659 = vst [vmem:[%s3182_s2 + $0x120] sm:$0xff] %v2962_v54  ;;  %v1226_v57 = vpop.f32.mrf.mxu0 }
 0x196   :  { %v1515_v58 = vpop.f32.mrf.mxu1 }
 0x197   :  { %v2968_v59 = vadd.f32 %v1515_v58, %v1226_v57  ;;  %v1228_v60 = vpop.f32.mrf.mxu0  ;;  %v1719_v58 = vadd.f32 %v2934_v29, %v2938_v34 }
 0x198   :  { %v1517_v61 = vpop.f32.mrf.mxu1  ;;  %v1793_v60 = vmul.f32 %v2944_v39, %v2944_v39 }
 0x199   :  { %1660 = vst [vmem:[%s3182_s2 + $0x128] sm:$0xff] %v2968_v59  ;;  %v1231_v62 = vpop.f32.mrf.mxu0 }
 0x19a   :  { %v1520_v63 = vpop.f32.mrf.mxu1 }
 0x19b   :  { %v2974_v0 = vadd.f32 %v1520_v63, %v1231_v62  ;;  %v1233_v1 = vpop.f32.mrf.mxu0 }
 0x19c   :  { %v1522_v2 = vpop.f32.mrf.mxu1  ;;  %v1855_v1 = vadd.f32 %v2936_v33, %v1792_v55 }
 0x19d   :  { %1661 = vst [vmem:[%s3182_s2 + $0x130] sm:$0xff] %v2974_v0  ;;  %v1234_v3 = vpop.f32.mrf.mxu0  ;;  %v1720_v2 = vadd.f32 %v1719_v58, %v2944_v39 }
 0x19e   :  { %v1523_v4 = vpop.f32.mrf.mxu1 }
 0x19f   :  { %v2980_v5 = vadd.f32 %v1523_v4, %v1234_v3  ;;  %v1236_v6 = vpop.f32.mrf.mxu0  ;;  %v1794_v3 = vmul.f32 %v2950_v44, %v2950_v44  ;;  %v1856_v4 = vadd.f32 %v1855_v1, %v1793_v60 }
 0x1a0   :  { %v1525_v7 = vpop.f32.mrf.mxu1  ;;  %v1721_v6 = vadd.f32 %v1720_v2, %v2950_v44 }
 0x1a1   :  { %1662 = vst [vmem:[%s3182_s2 + $0x138] sm:$0xff] %v2980_v5  ;;  %v1239_v8 = vpop.f32.mrf.mxu0  ;;  %v1795_v7 = vmul.f32 %v2956_v49, %v2956_v49 }
 0x1a2   :  { %v1528_v9 = vpop.f32.mrf.mxu1 }
 0x1a3   :  { %v2986_v10 = vadd.f32 %v1528_v9, %v1239_v8  ;;  %v1241_v11 = vpop.f32.mrf.mxu0  ;;  %v1857_v9 = vadd.f32 %v1856_v4, %v1794_v3 }
 0x1a4   :  { %v1530_v12 = vpop.f32.mrf.mxu1  ;;  %v1722_v11 = vadd.f32 %v1721_v6, %v2956_v49 }
 0x1a5   :  { %1663 = vst [vmem:[%s3182_s2 + $0x140] sm:$0xff] %v2986_v10  ;;  %v1242_v13 = vpop.f32.mrf.mxu0  ;;  %v1796_v12 = vmul.f32 %v2962_v54, %v2962_v54 }
 0x1a6   :  { %v1531_v14 = vpop.f32.mrf.mxu1 }
 0x1a7   :  { %v2992_v15 = vadd.f32 %v1531_v14, %v1242_v13  ;;  %v1244_v16 = vpop.f32.mrf.mxu0  ;;  %v1858_v14 = vadd.f32 %v1857_v9, %v1795_v7 }
 0x1a8   :  { %v1533_v17 = vpop.f32.mrf.mxu1  ;;  %v1723_v16 = vadd.f32 %v1722_v11, %v2962_v54 }
 0x1a9   :  { %1664 = vst [vmem:[%s3182_s2 + $0x148] sm:$0xff] %v2992_v15  ;;  %v1247_v18 = vpop.f32.mrf.mxu0  ;;  %v1797_v17 = vmul.f32 %v2968_v59, %v2968_v59 }
 0x1aa   :  { %v1536_v19 = vpop.f32.mrf.mxu1 }
 0x1ab   :  { %v2998_v20 = vadd.f32 %v1536_v19, %v1247_v18  ;;  %v1249_v21 = vpop.f32.mrf.mxu0 }
 0x1ac   :  { %v1538_v22 = vpop.f32.mrf.mxu1  ;;  %v1859_v21 = vadd.f32 %v1858_v14, %v1796_v12 }
 0x1ad   :  { %1665 = vst [vmem:[%s3182_s2 + $0x150] sm:$0xff] %v2998_v20  ;;  %v1250_v23 = vpop.f32.mrf.mxu0  ;;  %v1724_v22 = vadd.f32 %v1723_v16, %v2968_v59 }
 0x1ae   :  { %v1539_v24 = vpop.f32.mrf.mxu1 }
 0x1af   :  { %v3004_v25 = vadd.f32 %v1539_v24, %v1250_v23  ;;  %v1252_v26 = vpop.f32.mrf.mxu0  ;;  %v1798_v23 = vmul.f32 %v2974_v0, %v2974_v0 }
 0x1b0   :  { %v1541_v27 = vpop.f32.mrf.mxu1  ;;  %v1860_v26 = vadd.f32 %v1859_v21, %v1797_v17 }
 0x1b1   :  { %1666 = vst [vmem:[%s3182_s2 + $0x158] sm:$0xff] %v3004_v25  ;;  %v1255_v28 = vpop.f32.mrf.mxu0  ;;  %v1725_v27 = vadd.f32 %v1724_v22, %v2974_v0 }
 0x1b2   :  { %v1544_v30 = vpop.f32.mrf.mxu1 }
 0x1b3   :  { %v3010_v31 = vadd.f32 %v1544_v30, %v1255_v28  ;;  %v1257_v32 = vpop.f32.mrf.mxu0  ;;  %v1799_v28 = vmul.f32 %v2980_v5, %v2980_v5 }
 0x1b4   :  { %v1546_v35 = vpop.f32.mrf.mxu1 }
 0x1b5   :  { %1667 = vst [vmem:[%s3182_s2 + $0x160] sm:$0xff] %v3010_v31  ;;  %v1258_v36 = vpop.f32.mrf.mxu0  ;;  %v1861_v35 = vadd.f32 %v1860_v26, %v1798_v23  ;;  %v1804_v1 = vmul.f32 %v3010_v31, %v3010_v31 }
 0x1b6   :  { %v1547_v37 = vpop.f32.mrf.mxu1 }
 0x1b7   :  { %v3016_v38 = vadd.f32 %v1547_v37, %v1258_v36  ;;  %v1260_v40 = vpop.f32.mrf.mxu0  ;;  %v1726_v36 = vadd.f32 %v1725_v27, %v2980_v5  ;;  %v1800_v37 = vmul.f32 %v2986_v10, %v2986_v10 }
 0x1b8   :  { %v1549_v41 = vpop.f32.mrf.mxu1 }
 0x1b9   :  { %1668 = vst [vmem:[%s3182_s2 + $0x168] sm:$0xff] %v3016_v38  ;;  %v1263_v42 = vpop.f32.mrf.mxu0  ;;  %v1862_v41 = vadd.f32 %v1861_v35, %v1799_v28 }
 0x1ba   :  { %v1552_v43 = vpop.f32.mrf.mxu1 }
 0x1bb   :  { %v3022_v45 = vadd.f32 %v1552_v43, %v1263_v42  ;;  %v1265_v46 = vpop.f32.mrf.mxu0  ;;  %v1727_v42 = vadd.f32 %v1726_v36, %v2986_v10  ;;  %v1801_v43 = vmul.f32 %v2992_v15, %v2992_v15 }
 0x1bc   :  { %v1554_v47 = vpop.f32.mrf.mxu1 }
 0x1bd   :  { %1669 = vst [vmem:[%s3182_s2 + $0x170] sm:$0xff] %v3022_v45  ;;  %v1266_v48 = vpop.f32.mrf.mxu0 }
 0x1be   :  { %v1555_v50 = vpop.f32.mrf.mxu1 }
 0x1bf   :  { %v3028_v51 = vadd.f32 %v1555_v50, %v1266_v48  ;;  %v1268_v52 = vpop.f32.mrf.mxu0  ;;  %v1863_v48 = vadd.f32 %v1862_v41, %v1800_v37  ;;  %v1728_v50 = vadd.f32 %v1727_v42, %v2992_v15 }
 0x1c0   :  { %v1557_v53 = vpop.f32.mrf.mxu1  ;;  %v1802_v52 = vmul.f32 %v2998_v20, %v2998_v20 }
 0x1c1   :  { %1670 = vst [vmem:[%s3182_s2 + $0x178] sm:$0xff] %v3028_v51  ;;  %v1271_v56 = vpop.f32.mrf.mxu0  ;;  %v1864_v55 = vadd.f32 %v1863_v48, %v1801_v43 }
 0x1c2   :  { %v1560_v57 = vpop.f32.mrf.mxu1 }
 0x1c3   :  { %v3040_v61 = vadd.f32 %v1560_v57, %v1271_v56  ;;  %v1273_v62 = vpop.f32.mrf.mxu0  ;;  %v1729_v56 = vadd.f32 %v1728_v50, %v2998_v20  ;;  %v1803_v57 = vmul.f32 %v3004_v25, %v3004_v25 }
 0x1c4   :  { %v1562_v63 = vpop.f32.mrf.mxu1  ;;  %v1865_v62 = vadd.f32 %v1864_v55, %v1802_v52 }
 0x1c5   :  { %1671 = vst [vmem:[%s3182_s2 + $0x180] sm:$0xff] %v3040_v61  ;;  %v1274_v29 = vpop.f32.mrf.mxu0  ;;  %v1730_v63 = vadd.f32 %v1729_v56, %v3004_v25 }
 0x1c6   :  { %v1563_v34 = vpop.f32.mrf.mxu1  ;;  %v1866_v3 = vadd.f32 %v1865_v62, %v1803_v57 }
 0x1c7   :  { %v3053_v8 = vadd.f32 %v1563_v34, %v1274_v29  ;;  %v1276_v33 = vpop.f32.mrf.mxu0  ;;  %v1731_v29 = vadd.f32 %v1730_v63, %v3010_v31  ;;  %v1805_v34 = vmul.f32 %v3016_v38, %v3016_v38 }
 0x1c8   :  { %v1565_v39 = vpop.f32.mrf.mxu1  ;;  %v1867_v25 = vadd.f32 %v1866_v3, %v1804_v1 }
 0x1c9   :  { %1672 = vst [vmem:[%s3182_s2 + $0x188] sm:$0xff] %v3053_v8  ;;  %v1279_v13 = vpop.f32.mrf.mxu0  ;;  %v1732_v33 = vadd.f32 %v1731_v29, %v3016_v38  ;;  %v1806_v39 = vmul.f32 %v3022_v45, %v3022_v45  ;;  %v1809_v23 = vmul.f32 %v3053_v8, %v3053_v8 }
 0x1ca   :  { %v1568_v44 = vpop.f32.mrf.mxu1  ;;  %v1868_v12 = vadd.f32 %v1867_v25, %v1805_v34 }
 0x1cb   :  { %v3065_v18 = vadd.f32 %v1568_v44, %v1279_v13  ;;  %v1281_v19 = vpop.f32.mrf.mxu0  ;;  %v1733_v31 = vadd.f32 %v1732_v33, %v3022_v45  ;;  %v1807_v13 = vmul.f32 %v3028_v51, %v3028_v51 }
 0x1cc   :  { %v1570_v49 = vpop.f32.mrf.mxu1  ;;  %v1869_v17 = vadd.f32 %v1868_v12, %v1806_v39  ;;  %v1808_v19 = vmul.f32 %v3040_v61, %v3040_v61 }
 0x1cd   :  { %1673 = vst [vmem:[%s3182_s2 + $0x190] sm:$0xff] %v3065_v18  ;;  %v1282_v24 = vpop.f32.mrf.mxu0  ;;  %v1734_v38 = vadd.f32 %v1733_v31, %v3028_v51  ;;  %v1810_v28 = vmul.f32 %v3065_v18, %v3065_v18 }
 0x1ce   :  { %v1571_v54 = vpop.f32.mrf.mxu1  ;;  %v1870_v22 = vadd.f32 %v1869_v17, %v1807_v13 }
 0x1cf   :  { %v3077_v30 = vadd.f32 %v1571_v54, %v1282_v24  ;;  %v1284_v32 = vpop.f32.mrf.mxu0  ;;  %v1735_v45 = vadd.f32 %v1734_v38, %v3040_v61 }
 0x1d0   :  { %v1573_v59 = vpop.f32.mrf.mxu1  ;;  %v1871_v27 = vadd.f32 %v1870_v22, %v1808_v19 }
 0x1d1   :  { %1674 = vst [vmem:[%s3182_s2 + $0x198] sm:$0xff] %v3077_v30  ;;  %v1287_v40 = vpop.f32.mrf.mxu0  ;;  %v1736_v51 = vadd.f32 %v1735_v45, %v3053_v8  ;;  %v1811_v36 = vmul.f32 %v3077_v30, %v3077_v30 }
 0x1d2   :  { %v1576_v0 = vpop.f32.mrf.mxu1  ;;  %v1872_v35 = vadd.f32 %v1871_v27, %v1809_v23 }
 0x1d3   :  { %v3089_v46 = vadd.f32 %v1576_v0, %v1287_v40  ;;  %v1289_v47 = vpop.f32.mrf.mxu0  ;;  %v1737_v61 = vadd.f32 %v1736_v51, %v3065_v18 }
 0x1d4   :  { %v1578_v5 = vpop.f32.mrf.mxu1  ;;  %v1873_v41 = vadd.f32 %v1872_v35, %v1810_v28 }
 0x1d5   :  { %1675 = vst [vmem:[%s3182_s2 + $0x1a0] sm:$0xff] %v3089_v46  ;;  %v1290_v53 = vpop.f32.mrf.mxu0  ;;  %v1738_v8 = vadd.f32 %v1737_v61, %v3077_v30  ;;  %v1812_v42 = vmul.f32 %v3089_v46, %v3089_v46 }
 0x1d6   :  { %v1579_v10 = vpop.f32.mrf.mxu1  ;;  %v1874_v5 = vadd.f32 %v1873_v41, %v1811_v36 }
 0x1d7   :  { %v3101_v58 = vadd.f32 %v1579_v10, %v1290_v53  ;;  %v1292_v60 = vpop.f32.mrf.mxu0  ;;  %v1739_v18 = vadd.f32 %v1738_v8, %v3089_v46 }
 0x1d8   :  { %v1581_v15 = vpop.f32.mrf.mxu1  ;;  %v1875_v10 = vadd.f32 %v1874_v5, %v1812_v42 }
 0x1d9   :  { %1676 = vst [vmem:[%s3182_s2 + $0x1a8] sm:$0xff] %v3101_v58  ;;  %v1295_v2 = vpop.f32.mrf.mxu0  ;;  %v1813_v48 = vmul.f32 %v3101_v58, %v3101_v58  ;;  %v1740_v30 = vadd.f32 %v1739_v18, %v3101_v58 }
 0x1da   :  { %v1584_v20 = vpop.f32.mrf.mxu1 }
 0x1db   :  { %v1585_v4 = vadd.f32 %v1584_v20, %v1295_v2  ;;  %v1297_v6 = vpop.f32.mrf.mxu0  ;;  %v1876_v60 = vadd.f32 %v1875_v10, %v1813_v48 }
 0x1dc   :  { %v1586_v7 = vpop.f32.mrf.mxu1 }
 0x1dd   :  { %1677 = vst [vmem:[%s3182_s2 + $0x1b0] sm:$0xff] %v1585_v4  ;;  %v1298_v9 = vpop.f32.mrf.mxu0  ;;  %v1814_v55 = vmul.f32 %v1585_v4, %v1585_v4  ;;  %v1741_v15 = vadd.f32 %v1740_v30, %v1585_v4 }
 0x1de   :  { %v1587_v11 = vpop.f32.mrf.mxu1 }
 0x1df   :  { %v1588_v44 = vadd.f32 %v1587_v11, %v1298_v9  ;;  %v1300_v14 = vpop.f32.mrf.mxu0  ;;  %v1877_v2 = vadd.f32 %v1876_v60, %v1814_v55 }
 0x1e0   :  { %v1589_v16 = vpop.f32.mrf.mxu1 }
 0x1e1   :  { %1678 = vst [vmem:[%s3182_s2 + $0x1b8] sm:$0xff] %v1588_v44  ;;  %v1303_v49 = vpop.f32.mrf.mxu0  ;;  %v1815_v62 = vmul.f32 %v1588_v44, %v1588_v44  ;;  %v1742_v20 = vadd.f32 %v1741_v15, %v1588_v44  ;;  %v1759_v15 = vld [vmem:[%s3184_s4] sm:$0x1] }
 0x1e2   :  { %v1592_v21 = vpop.f32.mrf.mxu1 }
 0x1e3   :  { %v1593_v24 = vadd.f32 %v1592_v21, %v1303_v49  ;;  %v1305_v54 = vpop.f32.mrf.mxu0  ;;  %v1878_v34 = vadd.f32 %v1877_v2, %v1815_v62 }
 0x1e4   :  { %v1594_v26 = vpop.f32.mrf.mxu1 }
 0x1e5   :  { %1679 = vst [vmem:[%s3182_s2 + $0x1c0] sm:$0xff] %v1593_v24  ;;  %v1306_v32 = vpop.f32.mrf.mxu0  ;;  %v1816_v3 = vmul.f32 %v1593_v24, %v1593_v24  ;;  %v1743_v6 = vadd.f32 %v1742_v20, %v1593_v24 }
 0x1e6   :  { %v1595_v59 = vpop.f32.mrf.mxu1 }
 0x1e7   :  { %v1596_v37 = vadd.f32 %v1595_v59, %v1306_v32  ;;  %v1308_v40 = vpop.f32.mrf.mxu0  ;;  %v1879_v4 = vadd.f32 %v1878_v34, %v1816_v3 }
 0x1e8   :  { %v1597_v0 = vpop.f32.mrf.mxu1 }
 0x1e9   :  { %1680 = vst [vmem:[%s3182_s2 + $0x1c8] sm:$0xff] %v1596_v37  ;;  %v1311_v43 = vpop.f32.mrf.mxu0  ;;  %v1817_v7 = vmul.f32 %v1596_v37, %v1596_v37  ;;  %v1744_v9 = vadd.f32 %v1743_v6, %v1596_v37 }
 0x1ea   :  { %v1600_v47 = vpop.f32.mrf.mxu1 }
 0x1eb   :  { %v1601_v50 = vadd.f32 %v1600_v47, %v1311_v43  ;;  %v1313_v52 = vpop.f32.mrf.mxu0  ;;  %v1880_v13 = vadd.f32 %v1879_v4, %v1817_v7 }
 0x1ec   :  { %v1602_v53 = vpop.f32.mrf.mxu1 }
 0x1ed   :  { %1681 = vst [vmem:[%s3182_s2 + $0x1d0] sm:$0xff] %v1601_v50  ;;  %v1314_v56 = vpop.f32.mrf.mxu0  ;;  %v1818_v11 = vmul.f32 %v1601_v50, %v1601_v50  ;;  %v1745_v44 = vadd.f32 %v1744_v9, %v1601_v50 }
 0x1ee   :  { %v1603_v57 = vpop.f32.mrf.mxu1 }
 0x1ef   :  { %v1604_v46 = vadd.f32 %v1603_v57, %v1314_v56  ;;  %v1316_v63 = vpop.f32.mrf.mxu0  ;;  %v1881_v19 = vadd.f32 %v1880_v13, %v1818_v11  ;;  %v1687_v56 = vld [vmem:[%s3183_s3] sm:$0x1] }
 0x1f0   :  { %v1605_v1 = vpop.f32.mrf.mxu1 }
 0x1f1   :  { %1682 = vst [vmem:[%s3182_s2 + $0x1d8] sm:$0xff] %v1604_v46  ;;  %v1319_v58 = vpop.f32.mrf.mxu0  ;;  %v1819_v14 = vmul.f32 %v1604_v46, %v1604_v46  ;;  %v1746_v49 = vadd.f32 %v1745_v44, %v1604_v46 }
 0x1f2   :  { %v1608_v29 = vpop.f32.mrf.mxu1 }
 0x1f3   :  { %v1609_v25 = vadd.f32 %v1608_v29, %v1319_v58  ;;  %v1321_v33 = vpop.f32.mrf.mxu0  ;;  %v1882_v23 = vadd.f32 %v1881_v19, %v1819_v14 }
 0x1f4   :  { %v1610_v39 = vpop.f32.mrf.mxu1 }
 0x1f5   :  { %1683 = vst [vmem:[%s3182_s2 + $0x1e0] sm:$0xff] %v1609_v25  ;;  %v1322_v12 = vpop.f32.mrf.mxu0  ;;  %v1820_v21 = vmul.f32 %v1609_v25, %v1609_v25  ;;  %v1747_v24 = vadd.f32 %v1746_v49, %v1609_v25 }
 0x1f6   :  { %v1611_v31 = vpop.f32.mrf.mxu1 }
 0x1f7   :  { %v1612_v16 = vadd.f32 %v1611_v31, %v1322_v12  ;;  %v1324_v17 = vpop.f32.mrf.mxu0  ;;  %v1883_v28 = vadd.f32 %v1882_v23, %v1820_v21 }
 0x1f8   :  { %v1613_v38 = vpop.f32.mrf.mxu1 }
 0x1f9   :  { %1684 = vst [vmem:[%s3182_s2 + $0x1e8] sm:$0xff] %v1612_v16  ;;  %v1327_v22 = vpop.f32.mrf.mxu0  ;;  %v1821_v54 = vmul.f32 %v1612_v16, %v1612_v16  ;;  %v1748_v32 = vadd.f32 %v1747_v24, %v1612_v16 }
 0x1fa   :  { %v1616_v45 = vpop.f32.mrf.mxu1 }
 0x1fb   :  { %v1617_v26 = vadd.f32 %v1616_v45, %v1327_v22  ;;  %v1329_v27 = vpop.f32.mrf.mxu0  ;;  %v1884_v36 = vadd.f32 %v1883_v28, %v1821_v54 }
 0x1fc   :  { %v1618_v51 = vpop.f32.mrf.mxu1 }
 0x1fd   :  { %1685 = vst [vmem:[%s3182_s2 + $0x1f0] sm:$0xff] %v1617_v26  ;;  %v1822_v59 = vmul.f32 %v1617_v26, %v1617_v26  ;;  %v1330_v35 = vpop.f32.mrf.mxu0  ;;  %v1749_v37 = vadd.f32 %v1748_v32, %v1617_v26 }
 0x1fe   :  { %v1619_v61 = vpop.f32.mrf.mxu1 }
 0x1ff   :  { %v1620_v40 = vadd.f32 %v1619_v61, %v1330_v35  ;;  %v1332_v0 = vpop.f32.mrf.mxu0  ;;  %v1885_v8 = vadd.f32 %v1884_v36, %v1822_v59 }
 0x200   :  { %v1621_v41 = vpop.f32.mrf.mxu1 }
 0x201   :  { %1686 = vst [vmem:[%s3182_s2 + $0x1f8] sm:$0xff] %v1620_v40  ;;  %v1750_v42 = vadd.f32 %v1749_v37, %v1620_v40  ;;  %v1823_v43 = vmul.f32 %v1620_v40, %v1620_v40 }
 0x203   :  { %v1751_v47 = vrot.slane %v1750_v42, 4  ;;  %v1886_v5 = vadd.f32 %v1885_v8, %v1823_v43 }
 0x205   :  { %v1752_v18 = vadd.f32 %v1751_v47, %v1750_v42  ;;  %v1887_v48 = vrot.slane %v1886_v5, 4 }
 0x207   :  { %v1753_v50 = vrot.slane %v1752_v18, 2  ;;  %v1888_v52 = vadd.f32 %v1887_v48, %v1886_v5 }
 0x209   :  { %v1754_v53 = vadd.f32 %v1753_v50, %v1752_v18  ;;  %v1889_v10 = vrot.slane %v1888_v52, 2 }
 0x20b   :  { %v1755_v30 = vrot.slane %v1754_v53, 1  ;;  %v1890_v55 = vadd.f32 %v1889_v10, %v1888_v52 }
 0x20d   :  { %v1756_v57 = vadd.f32 %v1755_v30, %v1754_v53  ;;  %v1891_v60 = vrot.slane %v1890_v55, 1 }
 0x20f   :  { %v1757_v62 = vadd.f32 %v1756_v57, %v1687_v56  ;;  %v1892_v46 = vadd.f32 %v1891_v60, %v1890_v55 }
 0x211   :  { %1758 = vst [vmem:[%s3183_s3] sm:$0x1] %v1757_v62  ;;  %v1893_v63 = vadd.f32 %v1892_v46, %v1759_v15 }
 0x213   :  { %1894 = vst [vmem:[%s3184_s4] sm:$0x1] %v1893_v63 }

// kernel: _forward.13
= control target key start
LH: loop header
LB: loop body
LE: loop exit
PB: predicated region body
PF: predicated region fallthrough
CT: control target
= control target key end

     0   :  { %s1534_s9 = smov 0   ;;  %s1770_s0 = inlined_call_operand.vmem [shape: bf16[2048,256], index: 0, kind: input, shape index: {}]   ;;  %s1771_s1 = inlined_call_operand.vmem [shape: bf16[256,128], index: 1, kind: input, shape index: {}]   ;;  %s1772_s2 = inlined_call_operand.vmem [shape: f32[2048,128], index: 2, kind: output, shape index: {}]  }
   0x1 LB: > { %s1136_s10 = sadd.s32 4294967295, %s1516_s9   ;;  %p1140_p0 = scmp.ge.s32.totalorder %s1516_s9, 1  ;;  %s1516_s9 = sphi %s1534_s9, %s12_s9  }
   0x2   : > { %p114_p1 = scmp.lt.s32.totalorder %s1516_s9, 5 }
   0x4   : > { %p115_p2 = pnand %p1140_p0, %p114_p1 }
   0x5   : > { %s1141_s13 = sshll.u32 (!%p115_p2), %s1136_s10, 6 }
   0x6   : > { %118 = sbr.rel (%p115_p2) target bundleno = 409 (0x199), region = 28  ;;  %p138_p3 = scmp.lt.s32.totalorder (!%p115_p2), %s1141_s13, 255 }
   0xb   : > { %v1270_v0 = vld [vmem:[%s1771_s1 + $0x38] sm:$0xff]   ;;  %v1518_v1 = vmov 0   ;;  %v1271_v2 = vld [vmem:[%s1771_s1 + $0x30] sm:$0xff]   ;;  %v1272_v3 = vld [vmem:[%s1771_s1 + $0x28] sm:$0xff]   ;;  %s1774_s13 = smov (!%p138_p3, %s1141_s13), 255 }
   0xc   : > { %663 = vmatprep.subr.bf16.mxu0 %v1518_v1  ;;  %1229 = vmatprep.subr.bf16.mxu1 %v1518_v1  ;;  %v1273_v4 = vld [vmem:[%s1771_s1 + $0x20] sm:$0xff]   ;;  %s1228_s20 = sshll.u32 %s1774_s13, 3  ;;  %v1274_v5 = vld [vmem:[%s1771_s1 + $0x18] sm:$0xff]   ;;  %v1275_v7 = vld [vmem:[%s1771_s1 + $0x10] sm:$0xff]  }
   0xd   : > { %664 = vmatpush1.bf16.msra.mxu0 %v1270_v0  ;;  %1245 = vmatpush1.bf16.msra.mxu1 %v1270_v0  ;;  %s1573_s25 = scalar_lea.vmem %s1770_s0, %s1228_s20  ;;  %v1276_v9 = vld [vmem:[%s1771_s1 + $0x8] sm:$0xff]   ;;  %v1277_v10 = vld [vmem:[%s1771_s1] sm:$0xff]   ;;  %v1278_v11 = vld [vmem:[%s1771_s1 + $0x78] sm:$0xff]  }
   0xe   : > { %665 = vmatprep.subr.bf16.mxu0 %v1518_v1  ;;  %1230 = vmatprep.subr.bf16.mxu1 %v1518_v1  ;;  %v1288_v6 = vld [vmem:[%s1573_s25 + $0x4] ss:$8 sps:$4 sm:$0xff]   ;;  %v1279_v12 = vld [vmem:[%s1771_s1 + $0x70] sm:$0xff]   ;;  %v1282_v15 = vld [vmem:[%s1771_s1 + $0x58] sm:$0xff]  }
   0xf   : > { %v1291_v8 = vld [vmem:[%s1573_s25 + $0x104] ss:$8 sps:$4 sm:$0xff]   ;;  %695 = vmatprep.mubr.bf16.mxu0 %v1288_v6  ;;  %v1283_v16 = vld [vmem:[%s1771_s1 + $0x50] sm:$0xff]   ;;  %v1286_v19 = vld [vmem:[%s1573_s25] ss:$8 sps:$4 sm:$0xff]  }
  0x10   : > { %823 = vmatprep.mubr.bf16.mxu1 %v1291_v8  ;;  %v1280_v13 = vld [vmem:[%s1771_s1 + $0x68] sm:$0xff]   ;;  %v1281_v14 = vld [vmem:[%s1771_s1 + $0x60] sm:$0xff]   ;;  %v1292_v21 = vld [vmem:[%s1573_s25 + $0x14] ss:$8 sps:$4 sm:$0xff]  }
  0x11   : > { %666 = vmatpush1.bf16.msra.mxu0 %v1271_v2  ;;  %1246 = vmatpush1.bf16.msra.mxu1 %v1271_v2  ;;  %v1284_v17 = vld [vmem:[%s1771_s1 + $0x48] sm:$0xff]   ;;  %v1285_v18 = vld [vmem:[%s1771_s1 + $0x40] sm:$0xff]   ;;  %v1294_v22 = vld [vmem:[%s1573_s25 + $0x114] ss:$8 sps:$4 sm:$0xff]  }
  0x12   : > { %667 = vmatprep.subr.bf16.mxu0 %v1518_v1  ;;  %1231 = vmatprep.subr.bf16.mxu1 %v1518_v1  ;;  %v1289_v20 = vld [vmem:[%s1573_s25 + $0x100] ss:$8 sps:$4 sm:$0xff]   ;;  %v1296_v23 = vld [vmem:[%s1573_s25 + $0x10] ss:$8 sps:$4 sm:$0xff]   ;;  %v1298_v25 = vld [vmem:[%s1573_s25 + $0x24] ss:$8 sps:$4 sm:$0xff]  }
  0x13   : > { %v1297_v24 = vld [vmem:[%s1573_s25 + $0x110] ss:$8 sps:$4 sm:$0xff]   ;;  %v1300_v26 = vld [vmem:[%s1573_s25 + $0x124] ss:$8 sps:$4 sm:$0xff]   ;;  %v1302_v27 = vld [vmem:[%s1573_s25 + $0x20] ss:$8 sps:$4 sm:$0xff]  }
  0x14   : > { %v1303_v28 = vld [vmem:[%s1573_s25 + $0x120] ss:$8 sps:$4 sm:$0xff]   ;;  %v1304_v29 = vld [vmem:[%s1573_s25 + $0x34] ss:$8 sps:$4 sm:$0xff]   ;;  %v1308_v31 = vld [vmem:[%s1573_s25 + $0x30] ss:$8 sps:$4 sm:$0xff]  }
  0x15   : > { %668 = vmatpush1.bf16.msra.mxu0 %v1272_v3  ;;  %1247 = vmatpush1.bf16.msra.mxu1 %v1272_v3  ;;  %v1306_v30 = vld [vmem:[%s1573_s25 + $0x134] ss:$8 sps:$4 sm:$0xff]   ;;  %v1309_v32 = vld [vmem:[%s1573_s25 + $0x130] ss:$8 sps:$4 sm:$0xff]   ;;  %v1310_v33 = vld [vmem:[%s1573_s25 + $0x44] ss:$8 sps:$4 sm:$0xff]  }
  0x16   : > { %669 = vmatprep.subr.bf16.mxu0 %v1518_v1  ;;  %1232 = vmatprep.subr.bf16.mxu1 %v1518_v1  ;;  %v1312_v34 = vld [vmem:[%s1573_s25 + $0x144] ss:$8 sps:$4 sm:$0xff]   ;;  %v1314_v35 = vld [vmem:[%s1573_s25 + $0x40] ss:$8 sps:$4 sm:$0xff]   ;;  %v1316_v37 = vld [vmem:[%s1573_s25 + $0x54] ss:$8 sps:$4 sm:$0xff]  }
  0x17   : > { %v1315_v36 = vld [vmem:[%s1573_s25 + $0x140] ss:$8 sps:$4 sm:$0xff]   ;;  %v1318_v38 = vld [vmem:[%s1573_s25 + $0x154] ss:$8 sps:$4 sm:$0xff]   ;;  %v1320_v39 = vld [vmem:[%s1573_s25 + $0x50] ss:$8 sps:$4 sm:$0xff]  }
  0x18   : > { %v1321_v40 = vld [vmem:[%s1573_s25 + $0x150] ss:$8 sps:$4 sm:$0xff]   ;;  %v1322_v41 = vld [vmem:[%s1573_s25 + $0x64] ss:$8 sps:$4 sm:$0xff]   ;;  %v1326_v43 = vld [vmem:[%s1573_s25 + $0x60] ss:$8 sps:$4 sm:$0xff]  }
  0x19   : > { %670 = vmatpush1.bf16.msra.mxu0 %v1273_v4  ;;  %1248 = vmatpush1.bf16.msra.mxu1 %v1273_v4  ;;  %v1324_v42 = vld [vmem:[%s1573_s25 + $0x164] ss:$8 sps:$4 sm:$0xff]   ;;  %v1327_v44 = vld [vmem:[%s1573_s25 + $0x160] ss:$8 sps:$4 sm:$0xff]   ;;  %v1328_v45 = vld [vmem:[%s1573_s25 + $0x74] ss:$8 sps:$4 sm:$0xff]  }
  0x1a   : > { %671 = vmatprep.subr.bf16.mxu0 %v1518_v1  ;;  %1233 = vmatprep.subr.bf16.mxu1 %v1518_v1  ;;  %v1330_v46 = vld [vmem:[%s1573_s25 + $0x174] ss:$8 sps:$4 sm:$0xff]   ;;  %v1332_v47 = vld [vmem:[%s1573_s25 + $0x70] ss:$8 sps:$4 sm:$0xff]   ;;  %v1334_v49 = vld [vmem:[%s1573_s25 + $0x84] ss:$8 sps:$4 sm:$0xff]  }
  0x1b   : > { %v1333_v48 = vld [vmem:[%s1573_s25 + $0x170] ss:$8 sps:$4 sm:$0xff]   ;;  %v1336_v50 = vld [vmem:[%s1573_s25 + $0x184] ss:$8 sps:$4 sm:$0xff]   ;;  %v1338_v51 = vld [vmem:[%s1573_s25 + $0x80] ss:$8 sps:$4 sm:$0xff]  }
  0x1c   : > { %v1339_v52 = vld [vmem:[%s1573_s25 + $0x180] ss:$8 sps:$4 sm:$0xff]   ;;  %v1340_v53 = vld [vmem:[%s1573_s25 + $0x94] ss:$8 sps:$4 sm:$0xff]   ;;  %v1344_v55 = vld [vmem:[%s1573_s25 + $0x90] ss:$8 sps:$4 sm:$0xff]  }
  0x1d   : > { %672 = vmatpush1.bf16.msra.mxu0 %v1274_v5  ;;  %1249 = vmatpush1.bf16.msra.mxu1 %v1274_v5  ;;  %v1342_v54 = vld [vmem:[%s1573_s25 + $0x194] ss:$8 sps:$4 sm:$0xff]   ;;  %v1345_v56 = vld [vmem:[%s1573_s25 + $0x190] ss:$8 sps:$4 sm:$0xff]   ;;  %v1346_v57 = vld [vmem:[%s1573_s25 + $0xa4] ss:$8 sps:$4 sm:$0xff]  }
  0x1e   : > { %673 = vmatprep.subr.bf16.mxu0 %v1518_v1  ;;  %1234 = vmatprep.subr.bf16.mxu1 %v1518_v1  ;;  %v1348_v58 = vld [vmem:[%s1573_s25 + $0x1a4] ss:$8 sps:$4 sm:$0xff]   ;;  %v1350_v59 = vld [vmem:[%s1573_s25 + $0xa0] ss:$8 sps:$4 sm:$0xff]   ;;  %v1352_v61 = vld [vmem:[%s1573_s25 + $0xb4] ss:$8 sps:$4 sm:$0xff]  }
  0x1f   : > { %v1351_v60 = vld [vmem:[%s1573_s25 + $0x1a0] ss:$8 sps:$4 sm:$0xff]   ;;  %v1354_v62 = vld [vmem:[%s1573_s25 + $0x1b4] ss:$8 sps:$4 sm:$0xff]   ;;  %v1356_v63 = vld [vmem:[%s1573_s25 + $0xb0] ss:$8 sps:$4 sm:$0xff]  }
  0x20   : > { %v1357_v0 = vld [vmem:[%s1573_s25 + $0x1b0] ss:$8 sps:$4 sm:$0xff]   ;;  %v1360_v2 = vld [vmem:[%s1573_s25 + $0x1c4] ss:$8 sps:$4 sm:$0xff]   ;;  %v1362_v3 = vld [vmem:[%s1573_s25 + $0xc0] ss:$8 sps:$4 sm:$0xff]  }
  0x21   : > { %674 = vmatpush1.bf16.msra.mxu0 %v1275_v7  ;;  %1250 = vmatpush1.bf16.msra.mxu1 %v1275_v7  ;;  %v1363_v4 = vld [vmem:[%s1573_s25 + $0x1c0] ss:$8 sps:$4 sm:$0xff]   ;;  %v1364_v5 = vld [vmem:[%s1573_s25 + $0xd4] ss:$8 sps:$4 sm:$0xff]   ;;  %v1368_v7 = vld [vmem:[%s1573_s25 + $0xd0] ss:$8 sps:$4 sm:$0xff]  }
  0x22   : > { %675 = vmatprep.subr.bf16.mxu0 %v1518_v1  ;;  %1235 = vmatprep.subr.bf16.mxu1 %v1518_v1  ;;  %v1366_v6 = vld [vmem:[%s1573_s25 + $0x1d4] ss:$8 sps:$4 sm:$0xff]   ;;  %v1369_v8 = vld [vmem:[%s1573_s25 + $0x1d0] ss:$8 sps:$4 sm:$0xff]  }
  0x25   : > { %676 = vmatpush1.bf16.msra.mxu0 %v1276_v9  ;;  %1251 = vmatpush1.bf16.msra.mxu1 %v1276_v9  ;;  %v1370_v9 = vld [vmem:[%s1573_s25 + $0xe4] ss:$8 sps:$4 sm:$0xff]  }
  0x26   : > { %677 = vmatprep.subr.bf16.mxu0 %v1518_v1  ;;  %1236 = vmatprep.subr.bf16.mxu1 %v1518_v1 }
  0x29   : > { %678 = vmatpush1.bf16.msra.mxu0 %v1277_v10  ;;  %1252 = vmatpush1.bf16.msra.mxu1 %v1277_v10  ;;  %v1372_v10 = vld [vmem:[%s1573_s25 + $0x1e4] ss:$8 sps:$4 sm:$0xff]  }
  0x2a   : > { %679 = vmatprep.subr.bf16.mxu0 %v1518_v1  ;;  %1237 = vmatprep.subr.bf16.mxu1 %v1518_v1 }
  0x2d   : > { %680 = vmatpush2.bf16.msra.mxu0 %v1278_v11  ;;  %1253 = vmatpush2.bf16.msra.mxu1 %v1278_v11  ;;  %v1374_v11 = vld [vmem:[%s1573_s25 + $0xe0] ss:$8 sps:$4 sm:$0xff]  }
  0x2e   : > { %681 = vmatprep.subr.bf16.mxu0 %v1518_v1  ;;  %1238 = vmatprep.subr.bf16.mxu1 %v1518_v1 }
  0x31   : > { %682 = vmatpush2.bf16.msra.mxu0 %v1279_v12  ;;  %1254 = vmatpush2.bf16.msra.mxu1 %v1279_v12  ;;  %v1375_v12 = vld [vmem:[%s1573_s25 + $0x1e0] ss:$8 sps:$4 sm:$0xff]  }
  0x32   : > { %683 = vmatprep.subr.bf16.mxu0 %v1518_v1  ;;  %1239 = vmatprep.subr.bf16.mxu1 %v1518_v1 }
  0x35   : > { %684 = vmatpush2.bf16.msra.mxu0 %v1280_v13  ;;  %1255 = vmatpush2.bf16.msra.mxu1 %v1280_v13  ;;  %v1376_v13 = vld [vmem:[%s1573_s25 + $0xf4] ss:$8 sps:$4 sm:$0xff]  }
  0x36   : > { %685 = vmatprep.subr.bf16.mxu0 %v1518_v1  ;;  %1240 = vmatprep.subr.bf16.mxu1 %v1518_v1 }
  0x39   : > { %686 = vmatpush2.bf16.msra.mxu0 %v1281_v14  ;;  %1256 = vmatpush2.bf16.msra.mxu1 %v1281_v14  ;;  %v1378_v14 = vld [vmem:[%s1573_s25 + $0x1f4] ss:$8 sps:$4 sm:$0xff]  }
  0x3a   : > { %687 = vmatprep.subr.bf16.mxu0 %v1518_v1  ;;  %1241 = vmatprep.subr.bf16.mxu1 %v1518_v1 }
  0x3d   : > { %688 = vmatpush2.bf16.msra.mxu0 %v1282_v15  ;;  %1257 = vmatpush2.bf16.msra.mxu1 %v1282_v15  ;;  %v1380_v15 = vld [vmem:[%s1573_s25 + $0xf0] ss:$8 sps:$4 sm:$0xff]  }
  0x3e   : > { %689 = vmatprep.subr.bf16.mxu0 %v1518_v1  ;;  %1242 = vmatprep.subr.bf16.mxu1 %v1518_v1 }
  0x41   : > { %690 = vmatpush2.bf16.msra.mxu0 %v1283_v16  ;;  %1258 = vmatpush2.bf16.msra.mxu1 %v1283_v16  ;;  %v1381_v16 = vld [vmem:[%s1573_s25 + $0x1f0] ss:$8 sps:$4 sm:$0xff]  }
  0x42   : > { %691 = vmatprep.subr.bf16.mxu0 %v1518_v1  ;;  %1243 = vmatprep.subr.bf16.mxu1 %v1518_v1 }
  0x45   : > { %692 = vmatpush2.bf16.msra.mxu0 %v1284_v17  ;;  %1259 = vmatpush2.bf16.msra.mxu1 %v1284_v17 }
  0x46   : > { %693 = vmatprep.subr.bf16.mxu0 %v1518_v1  ;;  %1244 = vmatprep.subr.bf16.mxu1 %v1518_v1  ;;  %v1358_v1 = vld [vmem:[%s1573_s25 + $0xc4] ss:$8 sps:$4 sm:$0xff]   ;;  %s1701_s25 = scalar_lea.vmem %s1772_s2, %s1228_s20 }
  0x49   : > { %694 = vmatpush2.bf16.msra.mxu0 %v1285_v18  ;;  %1260 = vmatpush2.bf16.msra.mxu1 %v1285_v18 }
  0x4c   : > { %696 = vmatmul.mubr.bf16.vlgmr.msra.gmra.mxu0 %v1286_v19  ;;  %824 = vmatmul.mubr.bf16.vlgmr.msra.gmra.mxu1 %v1289_v20 }
  0x4d   : > { %703 = vmatprep.mubr.bf16.mxu0 %v1292_v21  ;;  %831 = vmatprep.mubr.bf16.mxu1 %v1294_v22 }
  0x54   : > { %704 = vmatmul.mubr.bf16.gmra.mxu0 %v1296_v23  ;;  %832 = vmatmul.mubr.bf16.gmra.mxu1 %v1297_v24 }
  0x55   : > { %711 = vmatprep.mubr.bf16.mxu0 %v1298_v25  ;;  %839 = vmatprep.mubr.bf16.mxu1 %v1300_v26 }
  0x5c   : > { %712 = vmatmul.mubr.bf16.gmra.mxu0 %v1302_v27  ;;  %840 = vmatmul.mubr.bf16.gmra.mxu1 %v1303_v28 }
  0x5d   : > { %719 = vmatprep.mubr.bf16.mxu0 %v1304_v29  ;;  %847 = vmatprep.mubr.bf16.mxu1 %v1306_v30 }
  0x64   : > { %720 = vmatmul.mubr.bf16.gmra.mxu0 %v1308_v31  ;;  %848 = vmatmul.mubr.bf16.gmra.mxu1 %v1309_v32 }
  0x65   : > { %727 = vmatprep.mubr.bf16.mxu0 %v1310_v33  ;;  %855 = vmatprep.mubr.bf16.mxu1 %v1312_v34 }
  0x6c   : > { %728 = vmatmul.mubr.bf16.gmra.mxu0 %v1314_v35  ;;  %856 = vmatmul.mubr.bf16.gmra.mxu1 %v1315_v36 }
  0x6d   : > { %735 = vmatprep.mubr.bf16.mxu0 %v1316_v37  ;;  %863 = vmatprep.mubr.bf16.mxu1 %v1318_v38 }
  0x74   : > { %736 = vmatmul.mubr.bf16.gmra.mxu0 %v1320_v39  ;;  %864 = vmatmul.mubr.bf16.gmra.mxu1 %v1321_v40 }
  0x75   : > { %743 = vmatprep.mubr.bf16.mxu0 %v1322_v41  ;;  %871 = vmatprep.mubr.bf16.mxu1 %v1324_v42 }
  0x7c   : > { %744 = vmatmul.mubr.bf16.gmra.mxu0 %v1326_v43  ;;  %872 = vmatmul.mubr.bf16.gmra.mxu1 %v1327_v44 }
  0x7d   : > { %751 = vmatprep.mubr.bf16.mxu0 %v1328_v45  ;;  %879 = vmatprep.mubr.bf16.mxu1 %v1330_v46 }
  0x84   : > { %752 = vmatmul.mubr.bf16.gmra.mxu0 %v1332_v47  ;;  %880 = vmatmul.mubr.bf16.gmra.mxu1 %v1333_v48 }
  0x85   : > { %759 = vmatprep.mubr.bf16.mxu0 %v1334_v49  ;;  %887 = vmatprep.mubr.bf16.mxu1 %v1336_v50 }
  0x8c   : > { %760 = vmatmul.mubr.bf16.gmra.mxu0 %v1338_v51  ;;  %888 = vmatmul.mubr.bf16.gmra.mxu1 %v1339_v52 }
  0x8d   : > { %767 = vmatprep.mubr.bf16.mxu0 %v1340_v53  ;;  %895 = vmatprep.mubr.bf16.mxu1 %v1342_v54 }
  0x94   : > { %768 = vmatmul.mubr.bf16.gmra.mxu0 %v1344_v55  ;;  %896 = vmatmul.mubr.bf16.gmra.mxu1 %v1345_v56 }
  0x95   : > { %775 = vmatprep.mubr.bf16.mxu0 %v1346_v57  ;;  %903 = vmatprep.mubr.bf16.mxu1 %v1348_v58 }
  0x9c   : > { %776 = vmatmul.mubr.bf16.gmra.mxu0 %v1350_v59  ;;  %904 = vmatmul.mubr.bf16.gmra.mxu1 %v1351_v60 }
  0x9d   : > { %783 = vmatprep.mubr.bf16.mxu0 %v1352_v61  ;;  %911 = vmatprep.mubr.bf16.mxu1 %v1354_v62 }
  0xa4   : > { %784 = vmatmul.mubr.bf16.gmra.mxu0 %v1356_v63  ;;  %912 = vmatmul.mubr.bf16.gmra.mxu1 %v1357_v0 }
  0xa5   : > { %791 = vmatprep.mubr.bf16.mxu0 %v1358_v1  ;;  %919 = vmatprep.mubr.bf16.mxu1 %v1360_v2 }
  0xac   : > { %792 = vmatmul.mubr.bf16.gmra.mxu0 %v1362_v3  ;;  %920 = vmatmul.mubr.bf16.gmra.mxu1 %v1363_v4 }
  0xad   : > { %799 = vmatprep.mubr.bf16.mxu0 %v1364_v5  ;;  %927 = vmatprep.mubr.bf16.mxu1 %v1366_v6 }
  0xb4   : > { %800 = vmatmul.mubr.bf16.gmra.mxu0 %v1368_v7  ;;  %928 = vmatmul.mubr.bf16.gmra.mxu1 %v1369_v8 }
  0xb5   : > { %807 = vmatprep.mubr.bf16.mxu0 %v1370_v9  ;;  %935 = vmatprep.mubr.bf16.mxu1 %v1372_v10 }
  0xbc   : > { %808 = vmatmul.mubr.bf16.gmra.mxu0 %v1374_v11  ;;  %936 = vmatmul.mubr.bf16.gmra.mxu1 %v1375_v12 }
  0xbd   : > { %815 = vmatprep.mubr.bf16.mxu0 %v1376_v13  ;;  %943 = vmatprep.mubr.bf16.mxu1 %v1378_v14 }
  0xc4   : > { %816 = vmatmul.mubr.bf16.gmra.mxu0 %v1380_v15  ;;  %944 = vmatmul.mubr.bf16.gmra.mxu1 %v1381_v16 }
 0x10c   : > { %v697_v17 = vpop.f32.mrf.mxu0  ;;  %v825_v18 = vpop.f32.mrf.mxu1 }
 0x10d   : > { %1382 = vtanh.f32 %v697_v17 }
 0x10e   : > { %1384 = vtanh.f32 %v825_v18  ;;  %v699_v19 = vpop.f32.mrf.mxu0  ;;  %v827_v20 = vpop.f32.mrf.mxu1 }
 0x110   : > { %v700_v21 = vpop.f32.mrf.mxu0  ;;  %v828_v22 = vpop.f32.mrf.mxu1 }
 0x111   : > { %1386 = vtanh.f32 %v700_v21 }
 0x112   : > { %1388 = vtanh.f32 %v828_v22  ;;  %v702_v23 = vpop.f32.mrf.mxu0  ;;  %v830_v24 = vpop.f32.mrf.mxu1 }
 0x114   : > { %v705_v25 = vpop.f32.mrf.mxu0  ;;  %v833_v26 = vpop.f32.mrf.mxu1 }
 0x115   : > { %1390 = vtanh.f32 %v705_v25 }
 0x116   : > { %1392 = vtanh.f32 %v833_v26  ;;  %v707_v27 = vpop.f32.mrf.mxu0  ;;  %v835_v28 = vpop.f32.mrf.mxu1 }
 0x118   : > { %v708_v29 = vpop.f32.mrf.mxu0  ;;  %v836_v30 = vpop.f32.mrf.mxu1 }
 0x119   : > { %1394 = vtanh.f32 %v708_v29 }
 0x11a   : > { %v1383_v31 = vpop.eup %1382  ;;  %1396 = vtanh.f32 %v836_v30  ;;  %v710_v32 = vpop.f32.mrf.mxu0 }
 0x11b   : > { %v838_v33 = vpop.f32.mrf.mxu1  ;;  %v1385_v34 = vpop.eup %1384  ;;  %1016 = vst [vmem:[%s1701_s25] sm:$0xff] %v1383_v31 }
 0x11c   : > { %1048 = vst [vmem:[%s1701_s25 + $0x100] sm:$0xff] %v1385_v34  ;;  %v713_v35 = vpop.f32.mrf.mxu0 }
 0x11d   : > { %v841_v36 = vpop.f32.mrf.mxu1  ;;  %1398 = vtanh.f32 %v713_v35 }
 0x11e   : > { %v1387_v37 = vpop.eup %1386  ;;  %1400 = vtanh.f32 %v841_v36  ;;  %v715_v38 = vpop.f32.mrf.mxu0 }
 0x11f   : > { %v843_v39 = vpop.f32.mrf.mxu1  ;;  %v1389_v40 = vpop.eup %1388  ;;  %1017 = vst [vmem:[%s1701_s25 + $0x8] sm:$0xff] %v1387_v37 }
 0x120   : > { %1049 = vst [vmem:[%s1701_s25 + $0x108] sm:$0xff] %v1389_v40  ;;  %v716_v41 = vpop.f32.mrf.mxu0 }
 0x121   : > { %v844_v42 = vpop.f32.mrf.mxu1  ;;  %1402 = vtanh.f32 %v716_v41 }
 0x122   : > { %v1391_v43 = vpop.eup %1390  ;;  %1404 = vtanh.f32 %v844_v42  ;;  %v718_v44 = vpop.f32.mrf.mxu0 }
 0x123   : > { %v846_v45 = vpop.f32.mrf.mxu1  ;;  %v1393_v46 = vpop.eup %1392  ;;  %1018 = vst [vmem:[%s1701_s25 + $0x10] sm:$0xff] %v1391_v43 }
 0x124   : > { %1050 = vst [vmem:[%s1701_s25 + $0x110] sm:$0xff] %v1393_v46  ;;  %v721_v47 = vpop.f32.mrf.mxu0 }
 0x125   : > { %v849_v48 = vpop.f32.mrf.mxu1  ;;  %1406 = vtanh.f32 %v721_v47 }
 0x126   : > { %v1395_v49 = vpop.eup %1394  ;;  %1408 = vtanh.f32 %v849_v48  ;;  %v723_v50 = vpop.f32.mrf.mxu0 }
 0x127   : > { %v851_v51 = vpop.f32.mrf.mxu1  ;;  %v1397_v52 = vpop.eup %1396  ;;  %1019 = vst [vmem:[%s1701_s25 + $0x18] sm:$0xff] %v1395_v49 }
 0x128   : > { %1051 = vst [vmem:[%s1701_s25 + $0x118] sm:$0xff] %v1397_v52  ;;  %v724_v53 = vpop.f32.mrf.mxu0 }
 0x129   : > { %v852_v54 = vpop.f32.mrf.mxu1  ;;  %1410 = vtanh.f32 %v724_v53 }
 0x12a   : > { %v1399_v55 = vpop.eup %1398  ;;  %1412 = vtanh.f32 %v852_v54  ;;  %v726_v56 = vpop.f32.mrf.mxu0 }
 0x12b   : > { %v854_v57 = vpop.f32.mrf.mxu1  ;;  %v1401_v58 = vpop.eup %1400  ;;  %1020 = vst [vmem:[%s1701_s25 + $0x20] sm:$0xff] %v1399_v55 }
 0x12c   : > { %1052 = vst [vmem:[%s1701_s25 + $0x120] sm:$0xff] %v1401_v58  ;;  %v729_v59 = vpop.f32.mrf.mxu0 }
 0x12d   : > { %v857_v60 = vpop.f32.mrf.mxu1  ;;  %1414 = vtanh.f32 %v729_v59 }
 0x12e   : > { %v1403_v61 = vpop.eup %1402  ;;  %1416 = vtanh.f32 %v857_v60  ;;  %v731_v62 = vpop.f32.mrf.mxu0 }
 0x12f   : > { %v859_v63 = vpop.f32.mrf.mxu1  ;;  %v1405_v0 = vpop.eup %1404  ;;  %1021 = vst [vmem:[%s1701_s25 + $0x28] sm:$0xff] %v1403_v61 }
 0x130   : > { %1053 = vst [vmem:[%s1701_s25 + $0x128] sm:$0xff] %v1405_v0  ;;  %v732_v1 = vpop.f32.mrf.mxu0 }
 0x131   : > { %v860_v2 = vpop.f32.mrf.mxu1  ;;  %1418 = vtanh.f32 %v732_v1 }
 0x132   : > { %v1407_v3 = vpop.eup %1406  ;;  %1420 = vtanh.f32 %v860_v2  ;;  %v734_v4 = vpop.f32.mrf.mxu0 }
 0x133   : > { %v862_v5 = vpop.f32.mrf.mxu1  ;;  %v1409_v6 = vpop.eup %1408  ;;  %1022 = vst [vmem:[%s1701_s25 + $0x30] sm:$0xff] %v1407_v3 }
 0x134   : > { %1054 = vst [vmem:[%s1701_s25 + $0x130] sm:$0xff] %v1409_v6  ;;  %v737_v7 = vpop.f32.mrf.mxu0 }
 0x135   : > { %v865_v8 = vpop.f32.mrf.mxu1  ;;  %1422 = vtanh.f32 %v737_v7 }
 0x136   : > { %v1411_v9 = vpop.eup %1410  ;;  %1424 = vtanh.f32 %v865_v8  ;;  %v739_v10 = vpop.f32.mrf.mxu0 }
 0x137   : > { %v867_v11 = vpop.f32.mrf.mxu1  ;;  %v1413_v12 = vpop.eup %1412  ;;  %1023 = vst [vmem:[%s1701_s25 + $0x38] sm:$0xff] %v1411_v9 }
 0x138   : > { %1055 = vst [vmem:[%s1701_s25 + $0x138] sm:$0xff] %v1413_v12  ;;  %v740_v13 = vpop.f32.mrf.mxu0 }
 0x139   : > { %v868_v14 = vpop.f32.mrf.mxu1  ;;  %1426 = vtanh.f32 %v740_v13 }
 0x13a   : > { %v1415_v15 = vpop.eup %1414  ;;  %1428 = vtanh.f32 %v868_v14  ;;  %v742_v16 = vpop.f32.mrf.mxu0 }
 0x13b   : > { %v870_v17 = vpop.f32.mrf.mxu1  ;;  %v1417_v18 = vpop.eup %1416  ;;  %1024 = vst [vmem:[%s1701_s25 + $0x40] sm:$0xff] %v1415_v15 }
 0x13c   : > { %1056 = vst [vmem:[%s1701_s25 + $0x140] sm:$0xff] %v1417_v18  ;;  %v745_v19 = vpop.f32.mrf.mxu0 }
 0x13d   : > { %v873_v20 = vpop.f32.mrf.mxu1  ;;  %1430 = vtanh.f32 %v745_v19 }
 0x13e   : > { %v1419_v21 = vpop.eup %1418  ;;  %1432 = vtanh.f32 %v873_v20  ;;  %v747_v22 = vpop.f32.mrf.mxu0 }
 0x13f   : > { %v875_v23 = vpop.f32.mrf.mxu1  ;;  %v1421_v24 = vpop.eup %1420  ;;  %1025 = vst [vmem:[%s1701_s25 + $0x48] sm:$0xff] %v1419_v21 }
 0x140   : > { %1057 = vst [vmem:[%s1701_s25 + $0x148] sm:$0xff] %v1421_v24  ;;  %v748_v25 = vpop.f32.mrf.mxu0 }
 0x141   : > { %v876_v26 = vpop.f32.mrf.mxu1  ;;  %1434 = vtanh.f32 %v748_v25 }
 0x142   : > { %v1423_v27 = vpop.eup %1422  ;;  %1436 = vtanh.f32 %v876_v26  ;;  %v750_v28 = vpop.f32.mrf.mxu0 }
 0x143   : > { %v878_v29 = vpop.f32.mrf.mxu1  ;;  %v1425_v30 = vpop.eup %1424  ;;  %1026 = vst [vmem:[%s1701_s25 + $0x50] sm:$0xff] %v1423_v27 }
 0x144   : > { %1058 = vst [vmem:[%s1701_s25 + $0x150] sm:$0xff] %v1425_v30  ;;  %v753_v31 = vpop.f32.mrf.mxu0 }
 0x145   : > { %v881_v32 = vpop.f32.mrf.mxu1  ;;  %1438 = vtanh.f32 %v753_v31 }
 0x146   : > { %v1427_v33 = vpop.eup %1426  ;;  %1440 = vtanh.f32 %v881_v32  ;;  %v755_v34 = vpop.f32.mrf.mxu0 }
 0x147   : > { %v883_v35 = vpop.f32.mrf.mxu1  ;;  %v1429_v36 = vpop.eup %1428  ;;  %1027 = vst [vmem:[%s1701_s25 + $0x58] sm:$0xff] %v1427_v33 }
 0x148   : > { %1059 = vst [vmem:[%s1701_s25 + $0x158] sm:$0xff] %v1429_v36  ;;  %v756_v37 = vpop.f32.mrf.mxu0 }
 0x149   : > { %v884_v38 = vpop.f32.mrf.mxu1  ;;  %1442 = vtanh.f32 %v756_v37 }
 0x14a   : > { %v1431_v39 = vpop.eup %1430  ;;  %1444 = vtanh.f32 %v884_v38  ;;  %v758_v40 = vpop.f32.mrf.mxu0 }
 0x14b   : > { %v886_v41 = vpop.f32.mrf.mxu1  ;;  %v1433_v42 = vpop.eup %1432  ;;  %1028 = vst [vmem:[%s1701_s25 + $0x60] sm:$0xff] %v1431_v39 }
 0x14c   : > { %1060 = vst [vmem:[%s1701_s25 + $0x160] sm:$0xff] %v1433_v42  ;;  %v761_v43 = vpop.f32.mrf.mxu0 }
 0x14d   : > { %v889_v44 = vpop.f32.mrf.mxu1  ;;  %1446 = vtanh.f32 %v761_v43 }
 0x14e   : > { %v1435_v45 = vpop.eup %1434  ;;  %1448 = vtanh.f32 %v889_v44  ;;  %v763_v46 = vpop.f32.mrf.mxu0 }
 0x14f   : > { %v891_v47 = vpop.f32.mrf.mxu1  ;;  %v1437_v48 = vpop.eup %1436  ;;  %1029 = vst [vmem:[%s1701_s25 + $0x68] sm:$0xff] %v1435_v45 }
 0x150   : > { %1061 = vst [vmem:[%s1701_s25 + $0x168] sm:$0xff] %v1437_v48  ;;  %v764_v49 = vpop.f32.mrf.mxu0 }
 0x151   : > { %v892_v50 = vpop.f32.mrf.mxu1  ;;  %1450 = vtanh.f32 %v764_v49 }
 0x152   : > { %v1439_v51 = vpop.eup %1438  ;;  %1452 = vtanh.f32 %v892_v50  ;;  %v766_v52 = vpop.f32.mrf.mxu0 }
 0x153   : > { %v894_v53 = vpop.f32.mrf.mxu1  ;;  %v1441_v54 = vpop.eup %1440  ;;  %1030 = vst [vmem:[%s1701_s25 + $0x70] sm:$0xff] %v1439_v51 }
 0x154   : > { %1062 = vst [vmem:[%s1701_s25 + $0x170] sm:$0xff] %v1441_v54  ;;  %v769_v55 = vpop.f32.mrf.mxu0 }
 0x155   : > { %v897_v56 = vpop.f32.mrf.mxu1  ;;  %1454 = vtanh.f32 %v769_v55 }
 0x156   : > { %v1443_v57 = vpop.eup %1442  ;;  %1456 = vtanh.f32 %v897_v56  ;;  %v771_v58 = vpop.f32.mrf.mxu0 }
 0x157   : > { %v899_v59 = vpop.f32.mrf.mxu1  ;;  %v1445_v60 = vpop.eup %1444  ;;  %1031 = vst [vmem:[%s1701_s25 + $0x78] sm:$0xff] %v1443_v57 }
 0x158   : > { %1063 = vst [vmem:[%s1701_s25 + $0x178] sm:$0xff] %v1445_v60  ;;  %v772_v61 = vpop.f32.mrf.mxu0 }
 0x159   : > { %v900_v62 = vpop.f32.mrf.mxu1  ;;  %1458 = vtanh.f32 %v772_v61 }
 0x15a   : > { %v1447_v63 = vpop.eup %1446  ;;  %1460 = vtanh.f32 %v900_v62  ;;  %v774_v0 = vpop.f32.mrf.mxu0 }
 0x15b   : > { %v902_v1 = vpop.f32.mrf.mxu1  ;;  %v1449_v2 = vpop.eup %1448  ;;  %1032 = vst [vmem:[%s1701_s25 + $0x80] sm:$0xff] %v1447_v63 }
 0x15c   : > { %1064 = vst [vmem:[%s1701_s25 + $0x180] sm:$0xff] %v1449_v2  ;;  %v777_v3 = vpop.f32.mrf.mxu0 }
 0x15d   : > { %v905_v4 = vpop.f32.mrf.mxu1  ;;  %1462 = vtanh.f32 %v777_v3 }
 0x15e   : > { %v1451_v5 = vpop.eup %1450  ;;  %1464 = vtanh.f32 %v905_v4  ;;  %v779_v6 = vpop.f32.mrf.mxu0 }
 0x15f   : > { %v907_v7 = vpop.f32.mrf.mxu1  ;;  %v1453_v8 = vpop.eup %1452  ;;  %1033 = vst [vmem:[%s1701_s25 + $0x88] sm:$0xff] %v1451_v5 }
 0x160   : > { %1065 = vst [vmem:[%s1701_s25 + $0x188] sm:$0xff] %v1453_v8  ;;  %v780_v9 = vpop.f32.mrf.mxu0 }
 0x161   : > { %v908_v10 = vpop.f32.mrf.mxu1  ;;  %1466 = vtanh.f32 %v780_v9 }
 0x162   : > { %v1455_v11 = vpop.eup %1454  ;;  %1468 = vtanh.f32 %v908_v10  ;;  %v782_v12 = vpop.f32.mrf.mxu0 }
 0x163   : > { %v910_v13 = vpop.f32.mrf.mxu1  ;;  %v1457_v14 = vpop.eup %1456  ;;  %1034 = vst [vmem:[%s1701_s25 + $0x90] sm:$0xff] %v1455_v11 }
 0x164   : > { %1066 = vst [vmem:[%s1701_s25 + $0x190] sm:$0xff] %v1457_v14  ;;  %v785_v15 = vpop.f32.mrf.mxu0 }
 0x165   : > { %v913_v16 = vpop.f32.mrf.mxu1  ;;  %1470 = vtanh.f32 %v785_v15 }
 0x166   : > { %v1459_v17 = vpop.eup %1458  ;;  %1472 = vtanh.f32 %v913_v16  ;;  %v787_v18 = vpop.f32.mrf.mxu0 }
 0x167   : > { %v915_v19 = vpop.f32.mrf.mxu1  ;;  %v1461_v20 = vpop.eup %1460  ;;  %1035 = vst [vmem:[%s1701_s25 + $0x98] sm:$0xff] %v1459_v17 }
 0x168   : > { %1067 = vst [vmem:[%s1701_s25 + $0x198] sm:$0xff] %v1461_v20  ;;  %v788_v21 = vpop.f32.mrf.mxu0 }
 0x169   : > { %v916_v22 = vpop.f32.mrf.mxu1  ;;  %1474 = vtanh.f32 %v788_v21 }
 0x16a   : > { %v1463_v23 = vpop.eup %1462  ;;  %1476 = vtanh.f32 %v916_v22  ;;  %v790_v24 = vpop.f32.mrf.mxu0 }
 0x16b   : > { %v918_v25 = vpop.f32.mrf.mxu1  ;;  %v1465_v26 = vpop.eup %1464  ;;  %1036 = vst [vmem:[%s1701_s25 + $0xa0] sm:$0xff] %v1463_v23 }
 0x16c   : > { %1068 = vst [vmem:[%s1701_s25 + $0x1a0] sm:$0xff] %v1465_v26  ;;  %v793_v27 = vpop.f32.mrf.mxu0 }
 0x16d   : > { %v921_v28 = vpop.f32.mrf.mxu1  ;;  %1478 = vtanh.f32 %v793_v27 }
 0x16e   : > { %v1467_v29 = vpop.eup %1466  ;;  %1480 = vtanh.f32 %v921_v28  ;;  %v795_v30 = vpop.f32.mrf.mxu0 }
 0x16f   : > { %v923_v31 = vpop.f32.mrf.mxu1  ;;  %v1469_v32 = vpop.eup %1468  ;;  %1037 = vst [vmem:[%s1701_s25 + $0xa8] sm:$0xff] %v1467_v29 }
 0x170   : > { %1069 = vst [vmem:[%s1701_s25 + $0x1a8] sm:$0xff] %v1469_v32  ;;  %v796_v33 = vpop.f32.mrf.mxu0 }
 0x171   : > { %v924_v34 = vpop.f32.mrf.mxu1  ;;  %1482 = vtanh.f32 %v796_v33 }
 0x172   : > { %v1471_v35 = vpop.eup %1470  ;;  %1484 = vtanh.f32 %v924_v34  ;;  %v798_v36 = vpop.f32.mrf.mxu0 }
 0x173   : > { %v926_v37 = vpop.f32.mrf.mxu1  ;;  %v1473_v38 = vpop.eup %1472  ;;  %1038 = vst [vmem:[%s1701_s25 + $0xb0] sm:$0xff] %v1471_v35 }
 0x174   : > { %1070 = vst [vmem:[%s1701_s25 + $0x1b0] sm:$0xff] %v1473_v38  ;;  %v801_v39 = vpop.f32.mrf.mxu0 }
 0x175   : > { %v929_v40 = vpop.f32.mrf.mxu1  ;;  %1486 = vtanh.f32 %v801_v39 }
 0x176   : > { %v1475_v41 = vpop.eup %1474  ;;  %1488 = vtanh.f32 %v929_v40  ;;  %v803_v42 = vpop.f32.mrf.mxu0 }
 0x177   : > { %v931_v43 = vpop.f32.mrf.mxu1  ;;  %v1477_v44 = vpop.eup %1476  ;;  %1039 = vst [vmem:[%s1701_s25 + $0xb8] sm:$0xff] %v1475_v41 }
 0x178   : > { %1071 = vst [vmem:[%s1701_s25 + $0x1b8] sm:$0xff] %v1477_v44  ;;  %v804_v45 = vpop.f32.mrf.mxu0 }
 0x179   : > { %v932_v46 = vpop.f32.mrf.mxu1  ;;  %1490 = vtanh.f32 %v804_v45 }
 0x17a   : > { %v1479_v47 = vpop.eup %1478  ;;  %1492 = vtanh.f32 %v932_v46  ;;  %v806_v48 = vpop.f32.mrf.mxu0 }
 0x17b   : > { %v934_v49 = vpop.f32.mrf.mxu1  ;;  %v1481_v50 = vpop.eup %1480  ;;  %1040 = vst [vmem:[%s1701_s25 + $0xc0] sm:$0xff] %v1479_v47 }
 0x17c   : > { %1072 = vst [vmem:[%s1701_s25 + $0x1c0] sm:$0xff] %v1481_v50  ;;  %v809_v51 = vpop.f32.mrf.mxu0 }
 0x17d   : > { %v937_v52 = vpop.f32.mrf.mxu1  ;;  %1494 = vtanh.f32 %v809_v51 }
 0x17e   : > { %v1483_v53 = vpop.eup %1482  ;;  %1496 = vtanh.f32 %v937_v52  ;;  %v811_v54 = vpop.f32.mrf.mxu0 }
 0x17f   : > { %v939_v55 = vpop.f32.mrf.mxu1  ;;  %v1485_v56 = vpop.eup %1484  ;;  %1041 = vst [vmem:[%s1701_s25 + $0xc8] sm:$0xff] %v1483_v53 }
 0x180   : > { %1073 = vst [vmem:[%s1701_s25 + $0x1c8] sm:$0xff] %v1485_v56  ;;  %v812_v57 = vpop.f32.mrf.mxu0 }
 0x181   : > { %v940_v58 = vpop.f32.mrf.mxu1  ;;  %1498 = vtanh.f32 %v812_v57 }
 0x182   : > { %v1487_v59 = vpop.eup %1486  ;;  %1500 = vtanh.f32 %v940_v58  ;;  %v814_v60 = vpop.f32.mrf.mxu0 }
 0x183   : > { %v942_v61 = vpop.f32.mrf.mxu1  ;;  %v1489_v62 = vpop.eup %1488  ;;  %1042 = vst [vmem:[%s1701_s25 + $0xd0] sm:$0xff] %v1487_v59 }
 0x184   : > { %1074 = vst [vmem:[%s1701_s25 + $0x1d0] sm:$0xff] %v1489_v62  ;;  %v817_v63 = vpop.f32.mrf.mxu0 }
 0x185   : > { %v945_v0 = vpop.f32.mrf.mxu1  ;;  %1502 = vtanh.f32 %v817_v63 }
 0x186   : > { %v1491_v1 = vpop.eup %1490  ;;  %1504 = vtanh.f32 %v945_v0  ;;  %v819_v2 = vpop.f32.mrf.mxu0 }
 0x187   : > { %v947_v3 = vpop.f32.mrf.mxu1  ;;  %v1493_v4 = vpop.eup %1492  ;;  %1043 = vst [vmem:[%s1701_s25 + $0xd8] sm:$0xff] %v1491_v1 }
 0x188   : > { %1075 = vst [vmem:[%s1701_s25 + $0x1d8] sm:$0xff] %v1493_v4  ;;  %v820_v5 = vpop.f32.mrf.mxu0 }
 0x189   : > { %v948_v6 = vpop.f32.mrf.mxu1  ;;  %1506 = vtanh.f32 %v820_v5 }
 0x18a   : > { %v1495_v7 = vpop.eup %1494  ;;  %1508 = vtanh.f32 %v948_v6  ;;  %v822_v8 = vpop.f32.mrf.mxu0 }
 0x18b   : > { %v950_v9 = vpop.f32.mrf.mxu1  ;;  %v1497_v10 = vpop.eup %1496  ;;  %1044 = vst [vmem:[%s1701_s25 + $0xe0] sm:$0xff] %v1495_v7 }
 0x18c   : > { %1076 = vst [vmem:[%s1701_s25 + $0x1e0] sm:$0xff] %v1497_v10 }
 0x18e   : > { %v1499_v11 = vpop.eup %1498 }
 0x18f   : > { %v1501_v12 = vpop.eup %1500  ;;  %1045 = vst [vmem:[%s1701_s25 + $0xe8] sm:$0xff] %v1499_v11 }
 0x190   : > { %1077 = vst [vmem:[%s1701_s25 + $0x1e8] sm:$0xff] %v1501_v12 }
 0x192   : > { %v1503_v13 = vpop.eup %1502 }
 0x193   : > { %v1505_v14 = vpop.eup %1504  ;;  %1046 = vst [vmem:[%s1701_s25 + $0xf0] sm:$0xff] %v1503_v13 }
 0x194   : > { %1078 = vst [vmem:[%s1701_s25 + $0x1f0] sm:$0xff] %v1505_v14 }
 0x196   : > { %v1507_v15 = vpop.eup %1506 }
 0x197   : > { %v1509_v16 = vpop.eup %1508  ;;  %1047 = vst [vmem:[%s1701_s25 + $0xf8] sm:$0xff] %v1507_v15 }
 0x198   : > { %1079 = vst [vmem:[%s1701_s25 + $0x1f8] sm:$0xff] %v1509_v16 }
 0x199 PF: > { %s12_s9 = sadd.s32 1, %s1516_s9  }
 0x19a   : > { %p9_p4 = scmp.ge.s32.totalorder %s12_s9, 6  }
 0x19c   :  { %11 = sbr.rel (!%p9_p4) target bundleno = 1 (0x1), region = 58 }

</bundles_post_ra>
